<compile_context>
chip_gen: v7x
topology: tpu7x:2x2x1
jax: 0.10.0
libtpu: 0.0.40
codegen_flags: <defaults>
</compile_context>

<pallas_src>
import jax
import jax.numpy as jnp
from jax import lax
from jax.experimental import pallas as pl

N_SAMPLES = 2 ** 14
N_FRAMES = N_SAMPLES // 256          # 64
MODEL_DIM = 128                      # model_dim (forward hard-codes this in .view)
N_CLUSTERS = 512
BATCH = 2
KSIZE = 7
PAD = 3
NEG_SLOPE = 0.2


def _lrelu(x):
    return jnp.where(x >= 0.0, x, NEG_SLOPE * x)


def embed_conditioning_kernel(emb_ref, nrm_ref, w1_ref, b1_ref, w2_ref, b2_ref,
                              w3_ref, br1_ref, wr2_ref, br2_ref, o_ref):
    # emb_ref: (B*T, 128) -- embedding rows pre-gathered from the pre-folded table
    #                        (table @ wr1a)[indices]  (emb-half of reduce Linear1)
    # nrm_ref: (B, T, 1)  -- raw norms
    # w1: (7, 16)   b1: (1, 16)      conv1 im2col weights
    # w2: (112, 32) b2: (1, 32)      conv2 im2col weights
    # w3: (224,128)                  conv3 im2col weights, pre-folded with the
    #                                amp-half of reduce Linear1
    # br1: (1, 128)                  folded bias  (b3 @ wr1b + br1)
    # wr2: (128, 128)  br2: (1, 128) second reduce Linear
    f32 = jnp.float32
    Bn, T, _ = nrm_ref.shape
    M = Bn * T
    TP = pl.cdiv(T + 2 * PAD, 8) * 8          # sublane-aligned padded length (72)

    def conv_cols(x, cin):
        # Zero-pad each batch independently (no cross-batch bleed) to TP rows, then
        # im2col with static tap offsets -> (M, K*cin).  Column order j*cin + c
        # matches the (K*Cin, Cout) weight layout produced by prepare_params().
        lead = jnp.zeros((Bn, PAD, cin), f32)
        tail = jnp.zeros((Bn, TP - T - PAD, cin), f32)
        xp = jnp.concatenate([lead, x, tail], axis=1)                   # (Bn, TP, cin)
        cols = jnp.concatenate([xp[:, j:j + T, :] for j in range(KSIZE)], axis=2)
        return cols.reshape(M, KSIZE * cin)

    # ---- amp branch -------------------------------------------------------------
    # Conv1d(1,16,7,p=3) -> LReLU : one (M,7)@(7,16) matmul (no per-tap VPU loop)
    h = _lrelu(jnp.dot(conv_cols(nrm_ref[...].astype(f32), 1), w1_ref[...],
                       preferred_element_type=f32) + b1_ref[...])       # (M, 16)
    # Conv1d(16,32,7,p=3) -> LReLU : one (M,112)@(112,32) matmul
    g = _lrelu(jnp.dot(conv_cols(h.reshape(Bn, T, 16), 16), w2_ref[...],
                       preferred_element_type=f32) + b2_ref[...])       # (M, 32)
    # Conv1d(32,128,7,p=3) folded with the amp-half of reduce Linear1; the embedding
    # half arrives pre-gathered in emb_ref.
    r = emb_ref[...] + br1_ref[...] + jnp.dot(
        conv_cols(g.reshape(Bn, T, 32), 32), w3_ref[...],
        preferred_element_type=f32)                                      # (M, 128)

    # ---- reduce: LeakyReLU -> Linear(dim, dim) ------------------------------------
    out = jnp.dot(_lrelu(r), wr2_ref[...], preferred_element_type=f32) + br2_ref[...]
    o_ref[...] = out.astype(o_ref.dtype)      # lane-dense (M, 128) store


def prepare_params(params):
    """One-time weight prep: im2col layouts + folding of linear compositions."""
    table, w1, b1, w2, b2, w3, b3, wr1, br1, wr2, br2 = params
    # im2col weight layout: (K*Cin, Cout), row index = j*Cin + cin
    w1c = jnp.transpose(w1, (2, 1, 0)).reshape(KSIZE * 1, 16)
    w2c = jnp.transpose(w2, (2, 1, 0)).reshape(KSIZE * 16, 32)
    w3c = jnp.transpose(w3, (2, 1, 0)).reshape(KSIZE * 32, MODEL_DIM)
    wr1_io = wr1.T                                   # (2*dim, dim); rows = [emb | amp]
    wr1a, wr1b = wr1_io[:MODEL_DIM, :], wr1_io[MODEL_DIM:, :]
    # Fold (no nonlinearity between embedding/conv3 and the first reduce Linear):
    table_f = table @ wr1a                           # (n_clusters, dim)
    w3f = w3c @ wr1b                                 # (224, dim)
    br1f = (b3[None, :] @ wr1b) + br1[None, :]       # (1, dim)
    return (table_f, w1c, b1.reshape(1, -1), w2c, b2.reshape(1, -1),
            w3f, br1f, wr2.T, br2.reshape(1, -1))


def embed_conditioning(indices, norms, params):
    B = indices.shape[0]
    T, C = N_FRAMES, MODEL_DIM
    (table_f, w1c, b1r, w2c, b2r, w3f, br1f, wr2_io, br2r) = prepare_params(params)

    # Perf review 4(a): the embedding lookup is a plain XLA gather of the pre-folded
    # table in the wrapper.  This removes the 256 KiB table DMA and the one-hot
    # (M,512)@(512,128) matmul from the kernel; the gathered slab is lane-dense.
    emb_in = table_f[indices.astype(jnp.int32)].reshape(B * T, C).astype(jnp.float32)
    nrm3 = norms.reshape(B, T, 1).astype(jnp.float32)

    # Perf review 1: single grid step (no grid), batch folded into M = B*T rows.
    # Whole-array default BlockSpecs keep everything resident in VMEM (< 0.5 MiB).
    out2d = pl.pallas_call(
        embed_conditioning_kernel,
        out_shape=jax.ShapeDtypeStruct((B * T, C), jnp.float32),
    )(emb_in, nrm3, w1c, b1r, w2c, b2r, w3f, br1f, wr2_io, br2r)
    return out2d.reshape(B, T, C)


# ---------------- pure-JAX reference (PyTorch semantics, unfused) ----------------
def reference(indices, norms, params):
    table, w1, b1, w2, b2, w3, b3, wr1, br1, wr2, br2 = params
    B = indices.shape[0]
    emb = table[indices]                                 # (B, T, dim)
    x = norms.reshape(B, 1, N_FRAMES).astype(jnp.float32)

    def conv(x, w, b):
        y = lax.conv_general_dilated(
            x, w, window_strides=(1,), padding=[(PAD, PAD)],
            dimension_numbers=('NCH', 'OIH', 'NCH'))
        return y + b[None, :, None]

    h = _lrelu(conv(x, w1, b1))
    h = _lrelu(conv(h, w2, b2))
    amp = jnp.transpose(conv(h, w3, b3), (0, 2, 1))      # (B, T, dim)
    cat = jnp.concatenate([emb, amp], axis=-1)           # (B, T, 2*dim)
    r = _lrelu(cat @ wr1.T + br1)                        # Linear(2*dim, dim)
    return r @ wr2.T + br2                               # Linear(dim, dim)


if __name__ == "__main__":
    key = jax.random.PRNGKey(0)
    ks = jax.random.split(key, 13)
    s = 0.1
    indices = jax.random.randint(ks[0], (BATCH, N_FRAMES), 0, N_CLUSTERS, dtype=jnp.int32)
    norms = jax.random.normal(ks[1], (BATCH, N_FRAMES), jnp.float32)

    table = jax.random.normal(ks[2], (N_CLUSTERS, MODEL_DIM), jnp.float32) * s
    w1 = jax.random.normal(ks[3], (16, 1, KSIZE), jnp.float32) * s
    b1 = jax.random.normal(ks[4], (16,), jnp.float32) * s
    w2 = jax.random.normal(ks[5], (32, 16, KSIZE), jnp.float32) * s
    b2 = jax.random.normal(ks[6], (32,), jnp.float32) * s
    w3 = jax.random.normal(ks[7], (MODEL_DIM, 32, KSIZE), jnp.float32) * s
    b3 = jax.random.normal(ks[8], (MODEL_DIM,), jnp.float32) * s
    wr1 = jax.random.normal(ks[9], (MODEL_DIM, 2 * MODEL_DIM), jnp.float32) * s
    br1 = jax.random.normal(ks[10], (MODEL_DIM,), jnp.float32) * s
    wr2 = jax.random.normal(ks[11], (MODEL_DIM, MODEL_DIM), jnp.float32) * s
    br2 = jax.random.normal(ks[12], (MODEL_DIM,), jnp.float32) * s

    params = (table, w1, b1, w2, b2, w3, b3, wr1, br1, wr2, br2)

    run_fn = jax.jit(embed_conditioning)
    out = jax.block_until_ready(run_fn(indices, norms, params))
    ref = reference(indices, norms, params)

    assert out.shape == (BATCH, N_FRAMES, MODEL_DIM)
    err = float(jnp.max(jnp.abs(out - ref)))
    assert jnp.allclose(out, ref, atol=1e-3, rtol=1e-3), err
    print("KERNEL_OK")
</pallas_src>

<mosaic_0001>
module attributes {stable_mosaic.version = 11 : i64} {
  func.func @embed_conditioning_kernel(%arg0: memref<128x128xf32, #tpu.memory_space<vmem>>, %arg1: memref<2x64x1xf32, #tpu.memory_space<vmem>>, %arg2: memref<7x16xf32, #tpu.memory_space<vmem>>, %arg3: memref<1x16xf32, #tpu.memory_space<vmem>>, %arg4: memref<112x32xf32, #tpu.memory_space<vmem>>, %arg5: memref<1x32xf32, #tpu.memory_space<vmem>>, %arg6: memref<224x128xf32, #tpu.memory_space<vmem>>, %arg7: memref<1x128xf32, #tpu.memory_space<vmem>>, %arg8: memref<128x128xf32, #tpu.memory_space<vmem>>, %arg9: memref<1x128xf32, #tpu.memory_space<vmem>>, %arg10: memref<128x128xf32, #tpu.memory_space<vmem>>) attributes {dimension_semantics = [], scalar_prefetch = 0 : i64, scratch_operands = 0 : i64, tpu.core_type = #tpu.core_type<tc>} {
    %c0 = arith.constant 0 : index
    %c0_0 = arith.constant 0 : index
    %c0_1 = arith.constant 0 : index
    %0 = vector.load %arg1[%c0, %c0_0, %c0_1] : memref<2x64x1xf32, #tpu.memory_space<vmem>>, vector<2x64x1xf32>
    %cst = arith.constant 0.000000e+00 : f32
    %1 = vector.broadcast %cst : f32 to vector<2x3x1xf32>
    %cst_2 = arith.constant 0.000000e+00 : f32
    %2 = vector.broadcast %cst_2 : f32 to vector<2x5x1xf32>
    %3 = tpu.concatenate %1, %0, %2 in 1 : vector<2x3x1xf32>, vector<2x64x1xf32>, vector<2x5x1xf32> -> vector<2x72x1xf32>
    %4 = vector.extract_strided_slice %3 {offsets = [0, 0, 0], sizes = [2, 64, 1], strides = [1, 1, 1]} : vector<2x72x1xf32> to vector<2x64x1xf32>
    %5 = vector.extract_strided_slice %3 {offsets = [0, 1, 0], sizes = [2, 64, 1], strides = [1, 1, 1]} : vector<2x72x1xf32> to vector<2x64x1xf32>
    %6 = vector.extract_strided_slice %3 {offsets = [0, 2, 0], sizes = [2, 64, 1], strides = [1, 1, 1]} : vector<2x72x1xf32> to vector<2x64x1xf32>
    %7 = vector.extract_strided_slice %3 {offsets = [0, 3, 0], sizes = [2, 64, 1], strides = [1, 1, 1]} : vector<2x72x1xf32> to vector<2x64x1xf32>
    %8 = vector.extract_strided_slice %3 {offsets = [0, 4, 0], sizes = [2, 64, 1], strides = [1, 1, 1]} : vector<2x72x1xf32> to vector<2x64x1xf32>
    %9 = vector.extract_strided_slice %3 {offsets = [0, 5, 0], sizes = [2, 64, 1], strides = [1, 1, 1]} : vector<2x72x1xf32> to vector<2x64x1xf32>
    %10 = vector.extract_strided_slice %3 {offsets = [0, 6, 0], sizes = [2, 64, 1], strides = [1, 1, 1]} : vector<2x72x1xf32> to vector<2x64x1xf32>
    %11 = tpu.concatenate %4, %5, %6, %7, %8, %9, %10 in 2 : vector<2x64x1xf32>, vector<2x64x1xf32>, vector<2x64x1xf32>, vector<2x64x1xf32>, vector<2x64x1xf32>, vector<2x64x1xf32>, vector<2x64x1xf32> -> vector<2x64x7xf32>
    %12 = vector.shape_cast %11 : vector<2x64x7xf32> to vector<128x7xf32>
    %c0_3 = arith.constant 0 : index
    %c0_4 = arith.constant 0 : index
    %13 = vector.load %arg2[%c0_3, %c0_4] : memref<7x16xf32, #tpu.memory_space<vmem>>, vector<7x16xf32>
    %cst_5 = arith.constant dense<0.000000e+00> : vector<128x16xf32>
    %14 = tpu.matmul %12, %13, %cst_5 {dimension_numbers = #tpu.dot_dimension_numbers<[1], [0], [0], [1], [0, 0, 1, 1], [], []>} : vector<128x7xf32>, vector<7x16xf32>, vector<128x16xf32> -> vector<128x16xf32>
    %c0_6 = arith.constant 0 : index
    %c0_7 = arith.constant 0 : index
    %15 = vector.load %arg3[%c0_6, %c0_7] : memref<1x16xf32, #tpu.memory_space<vmem>>, vector<1x16xf32>
    %16 = vector.broadcast %15 : vector<1x16xf32> to vector<128x16xf32>
    %17 = arith.addf %14, %16 : vector<128x16xf32>
    %cst_8 = arith.constant 0.000000e+00 : f32
    %18 = vector.broadcast %cst_8 : f32 to vector<128x16xf32>
    %19 = arith.cmpf oge, %17, %18 : vector<128x16xf32>
    %cst_9 = arith.constant 2.000000e-01 : f32
    %20 = vector.broadcast %cst_9 : f32 to vector<128x16xf32>
    %21 = arith.mulf %20, %17 : vector<128x16xf32>
    %22 = arith.select %19, %17, %21 : vector<128x16xi1>, vector<128x16xf32>
    %23 = vector.shape_cast %22 : vector<128x16xf32> to vector<2x64x16xf32>
    %cst_10 = arith.constant 0.000000e+00 : f32
    %24 = vector.broadcast %cst_10 : f32 to vector<2x3x16xf32>
    %cst_11 = arith.constant 0.000000e+00 : f32
    %25 = vector.broadcast %cst_11 : f32 to vector<2x5x16xf32>
    %26 = tpu.concatenate %24, %23, %25 in 1 : vector<2x3x16xf32>, vector<2x64x16xf32>, vector<2x5x16xf32> -> vector<2x72x16xf32>
    %27 = vector.extract_strided_slice %26 {offsets = [0, 0, 0], sizes = [2, 64, 16], strides = [1, 1, 1]} : vector<2x72x16xf32> to vector<2x64x16xf32>
    %28 = vector.extract_strided_slice %26 {offsets = [0, 1, 0], sizes = [2, 64, 16], strides = [1, 1, 1]} : vector<2x72x16xf32> to vector<2x64x16xf32>
    %29 = vector.extract_strided_slice %26 {offsets = [0, 2, 0], sizes = [2, 64, 16], strides = [1, 1, 1]} : vector<2x72x16xf32> to vector<2x64x16xf32>
    %30 = vector.extract_strided_slice %26 {offsets = [0, 3, 0], sizes = [2, 64, 16], strides = [1, 1, 1]} : vector<2x72x16xf32> to vector<2x64x16xf32>
    %31 = vector.extract_strided_slice %26 {offsets = [0, 4, 0], sizes = [2, 64, 16], strides = [1, 1, 1]} : vector<2x72x16xf32> to vector<2x64x16xf32>
    %32 = vector.extract_strided_slice %26 {offsets = [0, 5, 0], sizes = [2, 64, 16], strides = [1, 1, 1]} : vector<2x72x16xf32> to vector<2x64x16xf32>
    %33 = vector.extract_strided_slice %26 {offsets = [0, 6, 0], sizes = [2, 64, 16], strides = [1, 1, 1]} : vector<2x72x16xf32> to vector<2x64x16xf32>
    %34 = tpu.concatenate %27, %28, %29, %30, %31, %32, %33 in 2 : vector<2x64x16xf32>, vector<2x64x16xf32>, vector<2x64x16xf32>, vector<2x64x16xf32>, vector<2x64x16xf32>, vector<2x64x16xf32>, vector<2x64x16xf32> -> vector<2x64x112xf32>
    %35 = vector.shape_cast %34 : vector<2x64x112xf32> to vector<128x112xf32>
    %c0_12 = arith.constant 0 : index
    %c0_13 = arith.constant 0 : index
    %36 = vector.load %arg4[%c0_12, %c0_13] : memref<112x32xf32, #tpu.memory_space<vmem>>, vector<112x32xf32>
    %cst_14 = arith.constant dense<0.000000e+00> : vector<128x32xf32>
    %37 = tpu.matmul %35, %36, %cst_14 {dimension_numbers = #tpu.dot_dimension_numbers<[1], [0], [0], [1], [0, 0, 1, 1], [], []>} : vector<128x112xf32>, vector<112x32xf32>, vector<128x32xf32> -> vector<128x32xf32>
    %c0_15 = arith.constant 0 : index
    %c0_16 = arith.constant 0 : index
    %38 = vector.load %arg5[%c0_15, %c0_16] : memref<1x32xf32, #tpu.memory_space<vmem>>, vector<1x32xf32>
    %39 = vector.broadcast %38 : vector<1x32xf32> to vector<128x32xf32>
    %40 = arith.addf %37, %39 : vector<128x32xf32>
    %cst_17 = arith.constant 0.000000e+00 : f32
    %41 = vector.broadcast %cst_17 : f32 to vector<128x32xf32>
    %42 = arith.cmpf oge, %40, %41 : vector<128x32xf32>
    %cst_18 = arith.constant 2.000000e-01 : f32
    %43 = vector.broadcast %cst_18 : f32 to vector<128x32xf32>
    %44 = arith.mulf %43, %40 : vector<128x32xf32>
    %45 = arith.select %42, %40, %44 : vector<128x32xi1>, vector<128x32xf32>
    %c0_19 = arith.constant 0 : index
    %c0_20 = arith.constant 0 : index
    %46 = vector.load %arg0[%c0_19, %c0_20] : memref<128x128xf32, #tpu.memory_space<vmem>>, vector<128x128xf32>
    %c0_21 = arith.constant 0 : index
    %c0_22 = arith.constant 0 : index
    %47 = vector.load %arg7[%c0_21, %c0_22] : memref<1x128xf32, #tpu.memory_space<vmem>>, vector<1x128xf32>
    %48 = vector.broadcast %47 : vector<1x128xf32> to vector<128x128xf32>
    %49 = arith.addf %46, %48 : vector<128x128xf32>
    %50 = vector.shape_cast %45 : vector<128x32xf32> to vector<2x64x32xf32>
    %cst_23 = arith.constant 0.000000e+00 : f32
    %51 = vector.broadcast %cst_23 : f32 to vector<2x3x32xf32>
    %cst_24 = arith.constant 0.000000e+00 : f32
    %52 = vector.broadcast %cst_24 : f32 to vector<2x5x32xf32>
    %53 = tpu.concatenate %51, %50, %52 in 1 : vector<2x3x32xf32>, vector<2x64x32xf32>, vector<2x5x32xf32> -> vector<2x72x32xf32>
    %54 = vector.extract_strided_slice %53 {offsets = [0, 0, 0], sizes = [2, 64, 32], strides = [1, 1, 1]} : vector<2x72x32xf32> to vector<2x64x32xf32>
    %55 = vector.extract_strided_slice %53 {offsets = [0, 1, 0], sizes = [2, 64, 32], strides = [1, 1, 1]} : vector<2x72x32xf32> to vector<2x64x32xf32>
    %56 = vector.extract_strided_slice %53 {offsets = [0, 2, 0], sizes = [2, 64, 32], strides = [1, 1, 1]} : vector<2x72x32xf32> to vector<2x64x32xf32>
    %57 = vector.extract_strided_slice %53 {offsets = [0, 3, 0], sizes = [2, 64, 32], strides = [1, 1, 1]} : vector<2x72x32xf32> to vector<2x64x32xf32>
    %58 = vector.extract_strided_slice %53 {offsets = [0, 4, 0], sizes = [2, 64, 32], strides = [1, 1, 1]} : vector<2x72x32xf32> to vector<2x64x32xf32>
    %59 = vector.extract_strided_slice %53 {offsets = [0, 5, 0], sizes = [2, 64, 32], strides = [1, 1, 1]} : vector<2x72x32xf32> to vector<2x64x32xf32>
    %60 = vector.extract_strided_slice %53 {offsets = [0, 6, 0], sizes = [2, 64, 32], strides = [1, 1, 1]} : vector<2x72x32xf32> to vector<2x64x32xf32>
    %61 = tpu.concatenate %54, %55, %56, %57, %58, %59, %60 in 2 : vector<2x64x32xf32>, vector<2x64x32xf32>, vector<2x64x32xf32>, vector<2x64x32xf32>, vector<2x64x32xf32>, vector<2x64x32xf32>, vector<2x64x32xf32> -> vector<2x64x224xf32>
    %62 = vector.shape_cast %61 : vector<2x64x224xf32> to vector<128x224xf32>
    %c0_25 = arith.constant 0 : index
    %c0_26 = arith.constant 0 : index
    %63 = vector.load %arg6[%c0_25, %c0_26] : memref<224x128xf32, #tpu.memory_space<vmem>>, vector<224x128xf32>
    %cst_27 = arith.constant dense<0.000000e+00> : vector<128x128xf32>
    %64 = tpu.matmul %62, %63, %cst_27 {dimension_numbers = #tpu.dot_dimension_numbers<[1], [0], [0], [1], [0, 0, 1, 1], [], []>} : vector<128x224xf32>, vector<224x128xf32>, vector<128x128xf32> -> vector<128x128xf32>
    %65 = arith.addf %49, %64 : vector<128x128xf32>
    %cst_28 = arith.constant 0.000000e+00 : f32
    %66 = vector.broadcast %cst_28 : f32 to vector<128x128xf32>
    %67 = arith.cmpf oge, %65, %66 : vector<128x128xf32>
    %cst_29 = arith.constant 2.000000e-01 : f32
    %68 = vector.broadcast %cst_29 : f32 to vector<128x128xf32>
    %69 = arith.mulf %68, %65 : vector<128x128xf32>
    %70 = arith.select %67, %65, %69 : vector<128x128xi1>, vector<128x128xf32>
    %c0_30 = arith.constant 0 : index
    %c0_31 = arith.constant 0 : index
    %71 = vector.load %arg8[%c0_30, %c0_31] : memref<128x128xf32, #tpu.memory_space<vmem>>, vector<128x128xf32>
    %cst_32 = arith.constant dense<0.000000e+00> : vector<128x128xf32>
    %72 = tpu.matmul %70, %71, %cst_32 {dimension_numbers = #tpu.dot_dimension_numbers<[1], [0], [0], [1], [0, 0, 1, 1], [], []>} : vector<128x128xf32>, vector<128x128xf32>, vector<128x128xf32> -> vector<128x128xf32>
    %c0_33 = arith.constant 0 : index
    %c0_34 = arith.constant 0 : index
    %73 = vector.load %arg9[%c0_33, %c0_34] : memref<1x128xf32, #tpu.memory_space<vmem>>, vector<1x128xf32>
    %74 = vector.broadcast %73 : vector<1x128xf32> to vector<128x128xf32>
    %75 = arith.addf %72, %74 : vector<128x128xf32>
    %c0_35 = arith.constant 0 : index
    %c0_36 = arith.constant 0 : index
    %76 = vector.load %arg10[%c0_35, %c0_36] : memref<128x128xf32, #tpu.memory_space<vmem>>, vector<128x128xf32>
    tpu.vector_store %arg10[%c0_35, %c0_36], %75 {strides = array<i32>} : memref<128x128xf32, #tpu.memory_space<vmem>>, vector<128x128xf32>,
    return
  }
}

</mosaic_0001>

<bundles_post_ra>
// kernel: embed_conditioning.1
= control target key start
LH: loop header
LB: loop body
LE: loop exit
PB: predicated region body
PF: predicated region fallthrough
CT: control target
= control target key end

     0   :  { %vm68_vm0 = vcmask 1042432   ;;  %vm208_vm1 = vcmask 1045504   ;;  %vm125_vm2 = vcmask 1046528   ;;  %s5594_s0 = inlined_call_operand.vmem [shape: f32[128,128], index: 0, kind: input, shape index: {}]   ;;  %s5595_s1 = inlined_call_operand.vmem [shape: f32[2,64,1], index: 1, kind: input, shape index: {}]   ;;  %s5596_s2 = inlined_call_operand.vmem [shape: f32[7,16], index: 2, kind: input, shape index: {}]   ;;  %s5597_s3 = inlined_call_operand.vmem [shape: f32[1,16], index: 3, kind: input, shape index: {}]   ;;  %s5598_s4 = inlined_call_operand.vmem [shape: f32[112,32], index: 4, kind: input, shape index: {}]   ;;  %s5599_s5 = inlined_call_operand.vmem [shape: f32[1,32], index: 5, kind: input, shape index: {}]   ;;  %s5600_s6 = inlined_call_operand.vmem [shape: f32[224,128], index: 6, kind: input, shape index: {}]   ;;  %s5601_s7 = inlined_call_operand.vmem [shape: f32[1,128], index: 7, kind: input, shape index: {}]   ;;  %s5602_s8 = inlined_call_operand.vmem [shape: f32[128,128], index: 8, kind: input, shape index: {}]   ;;  %s5603_s9 = inlined_call_operand.vmem [shape: f32[1,128], index: 9, kind: input, shape index: {}]   ;;  %s5604_s10 = inlined_call_operand.hbm [shape: f32[128,128], index: 10, kind: output, shape index: {}]  }
   0x1   :  { %v36_v0 = vld [vmem:[%s5595_s1] sm:$0xff]  ;;  %v37_v1 = vld [vmem:[%s5595_s1 + $0x8] sm:$0xff]  ;;  %v38_v4 = vld [vmem:[%s5595_s1 + $0x10] sm:$0xff] }
   0x2   :  { %v69_v2 = vrot.slane %v36_v0, 5  ;;  %v70_v3 = vrot.slane %v37_v1, 5  ;;  %v72_v5 = vrot.slane %v38_v4, 5  ;;  %v39_v6 = vld [vmem:[%s5595_s1 + $0x18] sm:$0xff] }
   0x3   :  { %v74_v14 = vrot.slane %v39_v6, 5 }
   0x4   :  { %v3649_v7 = vsel %vm68_vm0, %v69_v2, %v70_v3  ;;  %v3652_v8 = vsel %vm68_vm0, 0.0, %v69_v2  ;;  %v3659_v13 = vsel %vm68_vm0, %v70_v3, %v72_v5 }
   0x5   :  { %v209_v9 = vrot.slane %v3652_v8, 2  ;;  %v210_v10 = vrot.slane %v3649_v7, 2  ;;  %v126_v11 = vrot.slane %v3652_v8, 1  ;;  %v127_v12 = vrot.slane %v3649_v7, 1 }
   0x6   :  { %v212_v17 = vrot.slane %v3659_v13, 2  ;;  %v129_v18 = vrot.slane %v3659_v13, 1 }
   0x7   :  { %v211_v15 = vsel %vm208_vm1, %v209_v9, %v210_v10  ;;  %v128_v16 = vsel %vm125_vm2, %v126_v11, %v127_v12 }
   0x8   :  { %15 = vsyncpa [#allocation3], 0  ;;  %s3565_s21 = smov 2   ;;  %s3566_s22 = smov 1   ;;  %v293_v19 = vrot.slane %v3649_v7, 3  ;;  %v292_v20 = vrot.slane %v3652_v8, 3  ;;  %v213_v21 = vsel %vm208_vm1, %v210_v10, %v212_v17  ;;  %v130_v22 = vsel %vm125_vm2, %v127_v12, %v129_v18 }
   0x9   :  { %243 = vrot.lane.b32.xlu1 %v211_v15, %s3565_s21  ;;  %160 = vrot.lane.b32.xlu0 %v128_v16, %s3566_s22  ;;  %vm291_vm3 = vcmask 1044480   ;;  %v295_v23 = vrot.slane %v3659_v13, 3  ;;  %v3673_v24 = vsel %vm68_vm0, %v72_v5, %v74_v14  ;;  %v40_v25 = vld [vmem:[%s5595_s1 + $0x20] sm:$0xff]  ;;  %v375_v29 = vrot.slane %v3652_v8, 4  ;;  %s3567_s25 = smov 3   ;;  %s3568_s26 = smov 4  }
   0xa   :  { %v294_v26 = vsel %vm291_vm3, %v292_v20, %v293_v19  ;;  %v131_v28 = vrot.slane %v3673_v24, 1  ;;  %v376_v30 = vrot.slane %v3649_v7, 4  ;;  %vm374_vm4 = vcmask 1043456   ;;  %s3569_s27 = smov 5   ;;  %v724_v43 = vld [vmem:[%s5596_s2] sm:$0x7f] }
   0xb   :  { %v296_v27 = vsel %vm291_vm3, %v293_v19, %v295_v23  ;;  %v76_v31 = vrot.slane %v40_v25, 5  ;;  %v457_v32 = vrot.slane %v3652_v8, 5  ;;  %v458_v35 = vrot.slane %v3649_v7, 5  ;;  %3174 = vmatprep.subr.msk.mxu1 %vm125_vm2, %v724_v43  ;;  %v41_v48 = vld [vmem:[%s5595_s1 + $0x28] sm:$0xff]  ;;  %s3570_s2 = smov 6   ;;  %v42_v59 = vld [vmem:[%s5595_s1 + $0x30] sm:$0xff] }
   0xc   :  { %v132_v33 = vsel %vm125_vm2, %v129_v18, %v131_v28  ;;  %v377_v34 = vsel %vm374_vm4, %v375_v29, %v376_v30  ;;  %v378_v36 = vrot.slane %v3659_v13, 4  ;;  %v214_v40 = vrot.slane %v3673_v24, 2  ;;  %3175 = vmatpush3.msk.msra.mxu1 %vm125_vm2, %v724_v43  ;;  %s3573_s30 = smov 96   ;;  %s3574_s11 = smov 32  }
   0xd   :  { %245 = vrot.lane.b32.xlu1 %v213_v21, %s3565_s21  ;;  %162 = vrot.lane.b32.xlu0 %v130_v22, %s3566_s22  ;;  %v3693_v37 = vsel %vm68_vm0, %v74_v14, %v76_v31  ;;  %v459_v38 = vsel %vm68_vm0, %v457_v32, %v458_v35  ;;  %v540_v42 = vrot.slane %v3652_v8, 6  ;;  %v541_v46 = vrot.slane %v3649_v7, 6  ;;  %s3575_s16 = smov 48  }
   0xe   :  { %v379_v39 = vsel %vm374_vm4, %v376_v30, %v378_v36  ;;  %v133_v41 = vrot.slane %v3693_v37, 1  ;;  %v215_v44 = vsel %vm208_vm1, %v212_v17, %v214_v40  ;;  %v460_v47 = vrot.slane %v3659_v13, 5  ;;  %v43_v30 = vld [vmem:[%s5595_s1 + $0x38] sm:$0xff] }
   0xf   :  { %vm539_vm5 = vcmask 1041408   ;;  %v297_v51 = vrot.slane %v3673_v24, 3  ;;  %v216_v52 = vrot.slane %v3693_v37, 2  ;;  %v78_v53 = vrot.slane %v41_v48, 5 }
  0x10   :  { %v134_v45 = vsel %vm125_vm2, %v131_v28, %v133_v41  ;;  %v542_v49 = vsel %vm539_vm5, %v540_v42, %v541_v46  ;;  %v461_v50 = vsel %vm68_vm0, %v458_v35, %v460_v47  ;;  %v299_v56 = vrot.slane %v3693_v37, 3 }
  0x11   :  { %328 = vrot.lane.b32.xlu1 %v296_v27, %s3567_s25  ;;  %326 = vrot.lane.b32.xlu0 %v294_v26, %s3567_s25  ;;  %v298_v54 = vsel %vm291_vm3, %v295_v23, %v297_v51  ;;  %v217_v55 = vsel %vm208_vm1, %v214_v40, %v216_v52  ;;  %v543_v57 = vrot.slane %v3659_v13, 6  ;;  %v3729_v58 = vsel %vm68_vm0, %v76_v31, %v78_v53 }
  0x12   :  { %v300_v60 = vsel %vm291_vm3, %v297_v51, %v299_v56  ;;  %v135_v62 = vrot.slane %v3729_v58, 1  ;;  %v380_v63 = vrot.slane %v3673_v24, 4  ;;  %v80_v0 = vrot.slane %v42_v59, 5 }
  0x13   :  { %v544_v61 = vsel %vm539_vm5, %v541_v46, %v543_v57  ;;  %v462_v3 = vrot.slane %v3673_v24, 5  ;;  %v382_v4 = vrot.slane %v3693_v37, 4  ;;  %v218_v10 = vrot.slane %v3729_v58, 2 }
  0x14   :  { %v136_v1 = vsel %vm125_vm2, %v133_v41, %v135_v62  ;;  %v381_v2 = vsel %vm374_vm4, %v378_v36, %v380_v63  ;;  %v3747_v5 = vsel %vm68_vm0, %v78_v53, %v80_v0  ;;  %v545_v15 = vrot.slane %v3673_v24, 6 }
  0x15   :  { %164 = vrot.lane.b32.xlu1 %v132_v33, %s3566_s22  ;;  %409 = vrot.lane.b32.xlu0 %v377_v34, %s3568_s26  ;;  %v463_v6 = vsel %vm68_vm0, %v460_v47, %v462_v3  ;;  %v383_v9 = vsel %vm374_vm4, %v380_v63, %v382_v4  ;;  %v137_v11 = vrot.slane %v3747_v5, 1  ;;  %v219_v12 = vsel %vm208_vm1, %v216_v52, %v218_v10 }
  0x16   :  { %v464_v16 = vrot.slane %v3693_v37, 5  ;;  %v546_v17 = vsel %vm539_vm5, %v543_v57, %v545_v15  ;;  %v301_v19 = vrot.slane %v3729_v58, 3  ;;  %v220_v20 = vrot.slane %v3747_v5, 2 }
  0x17   :  { %v138_v14 = vsel %vm125_vm2, %v135_v62, %v137_v11  ;;  %v303_v23 = vrot.slane %v3747_v5, 3  ;;  %v547_v25 = vrot.slane %v3693_v37, 6  ;;  %v384_v28 = vrot.slane %v3729_v58, 4  ;;  %v46_v62 = vld [vmem:[%s5595_s1 + $0x50] sm:$0xff] }
  0x18   :  { %v465_v18 = vsel %vm68_vm0, %v462_v3, %v464_v16  ;;  %v302_v21 = vsel %vm291_vm3, %v299_v56, %v301_v19  ;;  %v221_v22 = vsel %vm208_vm1, %v218_v10, %v220_v20  ;;  %v386_v29 = vrot.slane %v3747_v5, 4 }
  0x19   :  { %491 = vrot.lane.b32.xlu1 %v459_v38, %s3569_s27  ;;  %411 = vrot.lane.b32.xlu0 %v379_v39, %s3568_s26  ;;  %v304_v26 = vsel %vm291_vm3, %v301_v19, %v303_v23  ;;  %v548_v27 = vsel %vm539_vm5, %v545_v15, %v547_v25  ;;  %v385_v32 = vsel %vm374_vm4, %v382_v4, %v384_v28  ;;  %v466_v33 = vrot.slane %v3729_v58, 5 }
  0x1a   :  { %v387_v31 = vsel %vm374_vm4, %v384_v28, %v386_v29  ;;  %v468_v34 = vrot.slane %v3747_v5, 5  ;;  %v82_v35 = vrot.slane %v43_v30, 5  ;;  %v549_v39 = vrot.slane %v3729_v58, 6 }
  0x1b   :  { %v467_v38 = vsel %vm68_vm0, %v464_v16, %v466_v33  ;;  %v551_v40 = vrot.slane %v3747_v5, 6  ;;  %vm622_vm6 = vcmask 7168   ;;  %vm639_vm7 = vcmask 15360  }
  0x1c   :  { %v469_v36 = vsel %vm68_vm0, %v466_v33, %v468_v34  ;;  %v3795_v41 = vsel %vm68_vm0, %v80_v0, %v82_v35  ;;  %v119_v42 = vsel %vm68_vm0, %v82_v35, 0.0  ;;  %vm656_vm8 = vcmask 23552  }
  0x1d   :  { %247 = vrot.lane.b32.xlu1 %v215_v44, %s3565_s21  ;;  %166 = vrot.lane.b32.xlu0 %v134_v45, %s3566_s22  ;;  %v552_v43 = vsel %vm539_vm5, %v549_v39, %v551_v40  ;;  %v550_v44 = vsel %vm539_vm5, %v547_v25, %v549_v39  ;;  %v139_v45 = vrot.slane %v3795_v41, 1  ;;  %v141_v46 = vrot.slane %v119_v42, 1 }
  0x1e   :  { %v305_v53 = vrot.slane %v3795_v41, 3  ;;  %v388_v57 = vrot.slane %v3795_v41, 4  ;;  %v390_v59 = vrot.slane %v119_v42, 4  ;;  %v555_v10 = vrot.slane %v119_v42, 6 }
  0x1f   :  { %v142_v47 = vsel %vm125_vm2, %v139_v45, %v141_v46  ;;  %v140_v48 = vsel %vm125_vm2, %v137_v11, %v139_v45  ;;  %vm673_vm9 = vcmask 31744   ;;  %vm690_vm10 = vcmask 39936  }
  0x20   :  { %v306_v56 = vsel %vm291_vm3, %v303_v23, %v305_v53  ;;  %v391_v63 = vsel %vm374_vm4, %v388_v57, %v390_v59  ;;  %v389_v0 = vsel %vm374_vm4, %v386_v29, %v388_v57  ;;  %vm707_vm11 = vcmask 48128  }
  0x21   :  { %574 = vrot.lane.b32.xlu1 %v542_v49, %s3570_s2  ;;  %493 = vrot.lane.b32.xlu0 %v461_v50, %s3569_s27  ;;  %v222_v49 = vrot.slane %v3795_v41, 2  ;;  %v224_v50 = vrot.slane %v119_v42, 2  ;;  %vm732_vm12 = vcmask 56320  }
  0x23   :  { %v225_v51 = vsel %vm208_vm1, %v222_v49, %v224_v50  ;;  %v223_v52 = vsel %vm208_vm1, %v220_v20, %v222_v49 }
  0x25   :  { %330 = vrot.lane.b32.xlu1 %v298_v54, %s3567_s25  ;;  %249 = vrot.lane.b32.xlu0 %v217_v55, %s3565_s21  ;;  %v307_v54 = vrot.slane %v119_v42, 3 }
  0x27   :  { %v308_v55 = vsel %vm291_vm3, %v305_v53, %v307_v54 }
  0x29   :  { %332 = vrot.lane.b32.xlu1 %v300_v60, %s3567_s25  ;;  %576 = vrot.lane.b32.xlu0 %v544_v61, %s3570_s2  ;;  %v44_v60 = vld [vmem:[%s5595_s1 + $0x40] sm:$0xff]  ;;  %v45_v61 = vld [vmem:[%s5595_s1 + $0x48] sm:$0xff] }
  0x2a   :  { %v84_v3 = vrot.slane %v44_v60, 5  ;;  %v85_v4 = vrot.slane %v45_v61, 5 }
  0x2c   :  { %v3844_v16 = vsel %vm68_vm0, 0.0, %v84_v3 }
  0x2d   :  { %168 = vrot.lane.b32.xlu1 %v136_v1, %s3566_s22  ;;  %413 = vrot.lane.b32.xlu0 %v381_v2, %s3568_s26  ;;  %v470_v1 = vrot.slane %v3795_v41, 5  ;;  %v472_v2 = vrot.slane %v119_v42, 5  ;;  %v226_v28 = vrot.slane %v3844_v16, 2  ;;  %v392_v42 = vrot.slane %v3844_v16, 4 }
  0x2e   :  { %v474_v45 = vrot.slane %v3844_v16, 5 }
  0x2f   :  { %v473_v11 = vsel %vm68_vm0, %v470_v1, %v472_v2 }
  0x31   :  { %495 = vrot.lane.b32.xlu1 %v463_v6, %s3569_s27  ;;  %415 = vrot.lane.b32.xlu0 %v383_v9, %s3568_s26  ;;  %v87_v6 = vrot.slane %v46_v62, 5  ;;  %v553_v9 = vrot.slane %v3795_v41, 6 }
  0x33   :  { %v3841_v15 = vsel %vm68_vm0, %v85_v4, %v87_v6 }
  0x34   :  { %v146_v20 = vrot.slane %v3841_v15, 1  ;;  %v395_v49 = vrot.slane %v3841_v15, 4  ;;  %v477_v60 = vrot.slane %v3841_v15, 5 }
  0x35   :  { %251 = vrot.lane.b32.xlu1 %v219_v12, %s3565_s21  ;;  %170 = vrot.lane.b32.xlu0 %v138_v14, %s3566_s22  ;;  %v471_v12 = vsel %vm68_vm0, %v468_v34, %v470_v1  ;;  %v3838_v14 = vsel %vm68_vm0, %v84_v3, %v85_v4  ;;  %v309_v34 = vrot.slane %v3844_v16, 3 }
  0x36   :  { %v144_v19 = vrot.slane %v3838_v14, 1  ;;  %v227_v23 = vrot.slane %v3838_v14, 2  ;;  %v310_v30 = vrot.slane %v3838_v14, 3  ;;  %v558_v59 = vrot.slane %v3838_v14, 6 }
  0x38   :  { %v147_v25 = vsel %vm125_vm2, %v144_v19, %v146_v20  ;;  %v228_v33 = vsel %vm208_vm1, %v226_v28, %v227_v23  ;;  %v311_v39 = vsel %vm291_vm3, %v309_v34, %v310_v30 }
  0x39   :  { %578 = vrot.lane.b32.xlu1 %v546_v17, %s3570_s2  ;;  %497 = vrot.lane.b32.xlu0 %v465_v18, %s3569_s27  ;;  %v556_v17 = vsel %vm539_vm5, %v553_v9, %v555_v10  ;;  %v554_v18 = vsel %vm539_vm5, %v551_v40, %v553_v9 }
  0x3d   :  { %334 = vrot.lane.b32.xlu1 %v302_v21, %s3567_s25  ;;  %253 = vrot.lane.b32.xlu0 %v221_v22, %s3565_s21  ;;  %v143_v21 = vrot.slane %v3844_v16, 1  ;;  %v47_v22 = vld [vmem:[%s5595_s1 + $0x58] sm:$0xff] }
  0x3e   :  { %v89_v29 = vrot.slane %v47_v22, 5 }
  0x40   :  { %v3871_v35 = vsel %vm68_vm0, %v87_v6, %v89_v29 }
  0x41   :  { %336 = vrot.lane.b32.xlu1 %v304_v26, %s3567_s25  ;;  %580 = vrot.lane.b32.xlu0 %v548_v27, %s3570_s2  ;;  %v145_v26 = vsel %vm125_vm2, %v143_v21, %v144_v19  ;;  %v229_v27 = vrot.slane %v3841_v15, 2  ;;  %v148_v40 = vrot.slane %v3871_v35, 1  ;;  %v231_v53 = vrot.slane %v3871_v35, 2  ;;  %v3931_v21 = vld [vmem:[%s5595_s1 + $0x70] sm:$0xff] }
  0x42   :  { %v314_v2 = vrot.slane %v3871_v35, 3 }
  0x43   :  { %v149_v46 = vsel %vm125_vm2, %v146_v20, %v148_v40 }
  0x45   :  { %419 = vrot.lane.b32.xlu1 %v387_v31, %s3568_s26  ;;  %417 = vrot.lane.b32.xlu0 %v385_v32, %s3568_s26  ;;  %v312_v31 = vrot.slane %v3841_v15, 3  ;;  %v230_v32 = vsel %vm208_vm1, %v227_v23, %v229_v27 }
  0x47   :  { %v315_v10 = vsel %vm291_vm3, %v312_v31, %v314_v2 }
  0x49   :  { %501 = vrot.lane.b32.xlu1 %v469_v36, %s3569_s27  ;;  %499 = vrot.lane.b32.xlu0 %v467_v38, %s3569_s27  ;;  %v48_v36 = vld [vmem:[%s5595_s1 + $0x60] sm:$0xff]  ;;  %v313_v38 = vsel %vm291_vm3, %v310_v30, %v312_v31 }
  0x4d   :  { %584 = vrot.lane.b32.xlu1 %v552_v43, %s3570_s2  ;;  %582 = vrot.lane.b32.xlu0 %v550_v44, %s3570_s2  ;;  %v393_v43 = vrot.slane %v3838_v14, 4  ;;  %v91_v44 = vrot.slane %v48_v36, 5 }
  0x4f   :  { %v3891_v50 = vsel %vm68_vm0, %v89_v29, %v91_v44  ;;  %v95_v29 = vrot.slane %v3931_v21, 5 }
  0x50   :  { %v150_v54 = vrot.slane %v3891_v50, 1  ;;  %v233_v3 = vrot.slane %v3891_v50, 2 }
  0x51   :  { %174 = vrot.lane.b32.xlu1 %v142_v47, %s3566_s22  ;;  %172 = vrot.lane.b32.xlu0 %v140_v48, %s3566_s22  ;;  %v394_v47 = vsel %vm374_vm4, %v392_v42, %v393_v43  ;;  %v475_v48 = vrot.slane %v3838_v14, 5 }
  0x52   :  { %v151_v57 = vsel %vm125_vm2, %v148_v40, %v150_v54 }
  0x53   :  { %v478_v1 = vsel %vm68_vm0, %v475_v48, %v477_v60 }
  0x55   :  { %257 = vrot.lane.b32.xlu1 %v225_v51, %s3565_s21  ;;  %255 = vrot.lane.b32.xlu0 %v223_v52, %s3565_s21  ;;  %v476_v51 = vsel %vm68_vm0, %v474_v45, %v475_v48  ;;  %v396_v52 = vsel %vm374_vm4, %v393_v43, %v395_v49 }
  0x59   :  { %340 = vrot.lane.b32.xlu1 %v308_v55, %s3567_s25  ;;  %338 = vrot.lane.b32.xlu0 %v306_v56, %s3567_s25  ;;  %v557_v55 = vrot.slane %v3844_v16, 6  ;;  %v232_v56 = vsel %vm208_vm1, %v229_v27, %v231_v53 }
  0x5d   :  { %423 = vrot.lane.b32.xlu1 %v391_v63, %s3568_s26  ;;  %421 = vrot.lane.b32.xlu0 %v389_v0, %s3568_s26  ;;  %v49_v63 = vld [vmem:[%s5595_s1 + $0x68] sm:$0xff]  ;;  %v559_v0 = vsel %vm539_vm5, %v557_v55, %v558_v59 }
  0x5e   :  { %v93_v9 = vrot.slane %v49_v63, 5 }
  0x60   :  { %v3926_v20 = vsel %vm68_vm0, %v91_v44, %v93_v9 }
  0x61   :  { %505 = vrot.lane.b32.xlu1 %v473_v11, %s3569_s27  ;;  %503 = vrot.lane.b32.xlu0 %v471_v12, %s3569_s27  ;;  %v234_v11 = vsel %vm208_vm1, %v231_v53, %v233_v3  ;;  %v316_v12 = vrot.slane %v3891_v50, 3  ;;  %v235_v40 = vrot.slane %v3926_v20, 2  ;;  %v481_v53 = vrot.slane %v3891_v50, 5 }
  0x63   :  { %v317_v22 = vsel %vm291_vm3, %v314_v2, %v316_v12  ;;  %v236_v48 = vsel %vm208_vm1, %v233_v3, %v235_v40 }
  0x65   :  { %588 = vrot.lane.b32.xlu1 %v556_v17, %s3570_s2  ;;  %586 = vrot.lane.b32.xlu0 %v554_v18, %s3570_s2  ;;  %v560_v17 = vrot.slane %v3841_v15, 6 }
  0x67   :  { %v561_v23 = vsel %vm539_vm5, %v558_v59, %v560_v17 }
  0x69   :  { %178 = vrot.lane.b32.xlu1 %v147_v25, %s3566_s22  ;;  %176 = vrot.lane.b32.xlu0 %v145_v26, %s3566_s22  ;;  %v152_v25 = vrot.slane %v3926_v20, 1  ;;  %v397_v26 = vrot.slane %v3871_v35, 4 }
  0x6b   :  { %v153_v30 = vsel %vm125_vm2, %v150_v54, %v152_v25  ;;  %v398_v31 = vsel %vm374_vm4, %v395_v49, %v397_v26 }
  0x6d   :  { %261 = vrot.lane.b32.xlu1 %v230_v32, %s3565_s21  ;;  %259 = vrot.lane.b32.xlu0 %v228_v33, %s3565_s21  ;;  %v479_v32 = vrot.slane %v3871_v35, 5  ;;  %v399_v33 = vrot.slane %v3891_v50, 4 }
  0x6f   :  { %v480_v42 = vsel %vm68_vm0, %v477_v60, %v479_v32  ;;  %v400_v43 = vsel %vm374_vm4, %v397_v26, %v399_v33 }
  0x71   :  { %344 = vrot.lane.b32.xlu1 %v313_v38, %s3567_s25  ;;  %342 = vrot.lane.b32.xlu0 %v311_v39, %s3567_s25  ;;  %v3953_v38 = vsel %vm68_vm0, %v93_v9, %v95_v29 }
  0x72   :  { %v154_v44 = vrot.slane %v3953_v38, 1  ;;  %v237_v63 = vrot.slane %v3953_v38, 2  ;;  %v320_v3 = vrot.slane %v3953_v38, 3 }
  0x75   :  { %180 = vrot.lane.b32.xlu1 %v149_v46, %s3566_s22  ;;  %425 = vrot.lane.b32.xlu0 %v394_v47, %s3568_s26 }
  0x79   :  { %507 = vrot.lane.b32.xlu1 %v476_v51, %s3569_s27  ;;  %427 = vrot.lane.b32.xlu0 %v396_v52, %s3568_s26  ;;  %v155_v51 = vsel %vm125_vm2, %v152_v25, %v154_v44  ;;  %v562_v52 = vrot.slane %v3871_v35, 6  ;;  %v403_v25 = vrot.slane %v3953_v38, 4 }
  0x7b   :  { %v244_v61 = vpop.permute.xlu1 %243  ;;  %v161_v62 = vpop.permute.xlu0 %160  ;;  %v563_v60 = vsel %vm539_vm5, %v560_v17, %v562_v52 }
  0x7c   :  { %v623_v39 = vsel %vm622_vm6, %v3652_v8, %v161_v62  ;;  %v318_v62 = vrot.slane %v3926_v20, 3 }
  0x7d   :  { %263 = vrot.lane.b32.xlu1 %v232_v56, %s3565_s21  ;;  %182 = vrot.lane.b32.xlu0 %v151_v57, %s3566_s22  ;;  %v640_v46 = vsel %vm639_vm7, %v623_v39, %v244_v61  ;;  %v482_v61 = vsel %vm68_vm0, %v479_v32, %v481_v53 }
  0x7e   :  { %v319_v9 = vsel %vm291_vm3, %v316_v12, %v318_v62  ;;  %v321_v12 = vsel %vm291_vm3, %v318_v62, %v320_v3 }
  0x7f   :  { %v3915_v4 = vpop.permute.xlu1 %245  ;;  %v163_v6 = vpop.permute.xlu0 %162 }
  0x80   :  { %v624_v59 = vsel %vm622_vm6, %v3649_v7, %v163_v6 }
  0x81   :  { %590 = vrot.lane.b32.xlu1 %v559_v0, %s3570_s2  ;;  %509 = vrot.lane.b32.xlu0 %v478_v1, %s3569_s27  ;;  %v641_v7 = vsel %vm639_vm7, %v624_v59, %v3915_v4  ;;  %v564_v4 = vrot.slane %v3891_v50, 6 }
  0x83   :  { %v3923_v18 = vpop.permute.xlu1 %328  ;;  %v327_v19 = vpop.permute.xlu0 %326 }
  0x84   :  { %v657_v47 = vsel %vm656_vm8, %v640_v46, %v327_v19  ;;  %v658_v2 = vsel %vm656_vm8, %v641_v7, %v3923_v18  ;;  %v568_v46 = vrot.slane %v3953_v38, 6 }
  0x85   :  { %346 = vrot.lane.b32.xlu1 %v315_v10, %s3567_s25  ;;  %265 = vrot.lane.b32.xlu0 %v234_v11, %s3565_s21  ;;  %v238_v10 = vsel %vm208_vm1, %v235_v40, %v237_v63 }
  0x87   :  { %v3941_v27 = vpop.permute.xlu1 %164  ;;  %v410_v28 = vpop.permute.xlu0 %409 }
  0x88   :  { %v674_v49 = vsel %vm673_vm9, %v657_v47, %v410_v28 }
  0x89   :  { %348 = vrot.lane.b32.xlu1 %v317_v22, %s3567_s25  ;;  %592 = vrot.lane.b32.xlu0 %v561_v23, %s3570_s2  ;;  %v565_v22 = vsel %vm539_vm5, %v562_v52, %v564_v4  ;;  %v401_v23 = vrot.slane %v3926_v20, 4 }
  0x8b   :  { %v492_v34 = vpop.permute.xlu1 %491  ;;  %v412_v36 = vpop.permute.xlu0 %411  ;;  %v402_v32 = vsel %vm374_vm4, %v399_v33, %v401_v23 }
  0x8c   :  { %v691_v54 = vsel %vm690_vm10, %v674_v49, %v492_v34  ;;  %v675_v6 = vsel %vm673_vm9, %v658_v2, %v412_v36  ;;  %v483_v34 = vrot.slane %v3926_v20, 5  ;;  %v485_v36 = vrot.slane %v3953_v38, 5 }
  0x8d   :  { %184 = vrot.lane.b32.xlu1 %v153_v30, %s3566_s22  ;;  %429 = vrot.lane.b32.xlu0 %v398_v31, %s3568_s26  ;;  %v51_v30 = vld [vmem:[%s5595_s1 + $0x78] sm:$0xff]  ;;  %v404_v31 = vsel %vm374_vm4, %v401_v23, %v403_v25 }
  0x8e   :  { %v486_v47 = vsel %vm68_vm0, %v483_v34, %v485_v36  ;;  %v484_v33 = vsel %vm68_vm0, %v481_v53, %v483_v34 }
  0x8f   :  { %v3965_v45 = vpop.permute.xlu1 %247  ;;  %v3967_v8 = vpop.permute.xlu0 %166 }
  0x90   :  { %v626_v2 = vsel %vm622_vm6, %v3673_v24, %v3967_v8 }
  0x91   :  { %511 = vrot.lane.b32.xlu1 %v480_v42, %s3569_s27  ;;  %431 = vrot.lane.b32.xlu0 %v400_v43, %s3568_s26  ;;  %v97_v42 = vrot.slane %v51_v30, 5  ;;  %v566_v43 = vrot.slane %v3926_v20, 6 }
  0x93   :  { %v575_v55 = vpop.permute.xlu1 %574  ;;  %v494_v56 = vpop.permute.xlu0 %493  ;;  %v4048_v52 = vsel %vm68_vm0, %v95_v29, %v97_v42 }
  0x94   :  { %v708_v57 = vsel %vm707_vm11, %v691_v54, %v575_v55  ;;  %v692_v11 = vsel %vm690_vm10, %v675_v6, %v494_v56  ;;  %v4051_v54 = vsel %vm68_vm0, %v97_v42, 0.0  ;;  %v156_v29 = vrot.slane %v4048_v52, 1 }
  0x95   :  { %267 = vrot.lane.b32.xlu1 %v236_v48, %s3565_s21  ;;  %186 = vrot.lane.b32.xlu0 %v155_v51, %s3566_s22  ;;  %v625_v48 = vsel %vm622_vm6, %v3659_v13, %v3941_v27  ;;  %v569_v13 = vsel %vm539_vm5, %v566_v43, %v568_v46  ;;  %v567_v27 = vsel %vm539_vm5, %v564_v4, %v566_v43  ;;  %v158_v53 = vrot.slane %v4051_v54, 1 }
  0x96   :  { %3176 = vmatprep.mubr.msk.f32.mxu1 %vm732_vm12, %v708_v57  ;;  %v642_v55 = vsel %vm639_vm7, %v625_v48, %v3965_v45  ;;  %v157_v62 = vsel %vm125_vm2, %v154_v44, %v156_v29  ;;  %v241_v7 = vrot.slane %v4051_v54, 2  ;;  %v322_v44 = vrot.slane %v4048_v52, 3 }
  0x97   :  { %v331_v0 = vpop.permute.xlu1 %330  ;;  %v3991_v1 = vpop.permute.xlu0 %249  ;;  %v324_v8 = vrot.slane %v4051_v54, 3  ;;  %v405_v23 = vrot.slane %v4048_v52, 4  ;;  %v489_v34 = vrot.slane %v4051_v54, 5 }
  0x98   :  { %v659_v56 = vsel %vm656_vm8, %v642_v55, %v331_v0  ;;  %v239_v0 = vrot.slane %v4048_v52, 2 }
  0x99   :  { %594 = vrot.lane.b32.xlu1 %v563_v60, %s3570_s2  ;;  %513 = vrot.lane.b32.xlu0 %v482_v61, %s3569_s27  ;;  %v159_v61 = vsel %vm125_vm2, %v156_v29, %v158_v53 }
  0x9a   :  { %v240_v24 = vsel %vm208_vm1, %v237_v63, %v239_v0  ;;  %v323_v63 = vsel %vm291_vm3, %v320_v3, %v322_v44  ;;  %v406_v3 = vsel %vm374_vm4, %v403_v25, %v405_v23 }
  0x9b   :  { %v333_v17 = vpop.permute.xlu1 %332  ;;  %v577_v18 = vpop.permute.xlu0 %576 }
  0x9c   :  { %v709_v19 = vsel %vm707_vm11, %v692_v11, %v577_v18  ;;  %v242_v18 = vsel %vm208_vm1, %v239_v0, %v241_v7 }
  0x9d   :  { %350 = vrot.lane.b32.xlu1 %v319_v9, %s3567_s25  ;;  %269 = vrot.lane.b32.xlu0 %v238_v10, %s3565_s21  ;;  %v643_v10 = vsel %vm639_vm7, %v626_v2, %v3991_v1 }
  0x9e   :  { %3177 = vmatmul.mubr.msk.f32.vlgmr.msra.gmra.mrb[0].mxu1 %vm732_vm12, %v709_v19  ;;  %v660_v4 = vsel %vm656_vm8, %v643_v10, %v333_v17 }
  0x9f   :  { %v4019_v26 = vpop.permute.xlu1 %168  ;;  %v414_v28 = vpop.permute.xlu0 %413 }
  0xa0   :  { %v676_v21 = vsel %vm673_vm9, %v659_v56, %v414_v28  ;;  %v407_v28 = vrot.slane %v4051_v54, 4 }
  0xa1   :  { %352 = vrot.lane.b32.xlu1 %v321_v12, %s3567_s25  ;;  %596 = vrot.lane.b32.xlu0 %v565_v22, %s3570_s2  ;;  %v325_v22 = vsel %vm291_vm3, %v322_v44, %v324_v8 }
  0xa3   :  { %v496_v39 = vpop.permute.xlu1 %495  ;;  %v416_v40 = vpop.permute.xlu0 %415 }
  0xa4   :  { %v693_v45 = vsel %vm690_vm10, %v676_v21, %v496_v39  ;;  %v677_v11 = vsel %vm673_vm9, %v660_v4, %v416_v40  ;;  %v408_v39 = vsel %vm374_vm4, %v405_v23, %v407_v28  ;;  %v627_v40 = vsel %vm622_vm6, %v3693_v37, %v4019_v26 }
  0xa5   :  { %435 = vrot.lane.b32.xlu1 %v404_v31, %s3568_s26  ;;  %433 = vrot.lane.b32.xlu0 %v402_v32, %s3568_s26  ;;  %v487_v32 = vrot.slane %v4048_v52, 5  ;;  %v570_v26 = vrot.slane %v4048_v52, 6 }
  0xa7   :  { %v252_v49 = vpop.permute.xlu1 %251  ;;  %v171_v51 = vpop.permute.xlu0 %170  ;;  %v490_v55 = vsel %vm68_vm0, %v487_v32, %v489_v34  ;;  %v488_v37 = vsel %vm68_vm0, %v485_v36, %v487_v32 }
  0xa8   :  { %v628_v42 = vsel %vm622_vm6, %v3729_v58, %v171_v51 }
  0xa9   :  { %517 = vrot.lane.b32.xlu1 %v486_v47, %s3569_s27  ;;  %515 = vrot.lane.b32.xlu0 %v484_v33, %s3569_s27  ;;  %v644_v33 = vsel %vm639_vm7, %v627_v40, %v252_v49  ;;  %v572_v49 = vrot.slane %v4051_v54, 6  ;;  %v571_v54 = vsel %vm539_vm5, %v568_v46, %v570_v26 }
  0xab   :  { %v579_v57 = vpop.permute.xlu1 %578  ;;  %v498_v59 = vpop.permute.xlu0 %497  ;;  %v573_v36 = vsel %vm539_vm5, %v570_v26, %v572_v49 }
  0xac   :  { %v710_v60 = vsel %vm707_vm11, %v693_v45, %v579_v57  ;;  %v694_v1 = vsel %vm690_vm10, %v677_v11, %v498_v59 }
  0xad   :  { %600 = vrot.lane.b32.xlu1 %v569_v13, %s3570_s2  ;;  %598 = vrot.lane.b32.xlu0 %v567_v27, %s3570_s2 }
  0xae   :  { %3179 = vmatprep.mubr.msk.f32.mxu1 %vm732_vm12, %v710_v60 }
  0xaf   :  { %v335_v6 = vpop.permute.xlu1 %334  ;;  %v254_v9 = vpop.permute.xlu0 %253 }
  0xb0   :  { %v645_v48 = vsel %vm639_vm7, %v628_v42, %v254_v9  ;;  %v661_v56 = vsel %vm656_vm8, %v644_v33, %v335_v6 }
  0xb1   :  { %190 = vrot.lane.b32.xlu1 %v159_v61, %s3566_s22  ;;  %188 = vrot.lane.b32.xlu0 %v157_v62, %s3566_s22 }
  0xb3   :  { %v337_v19 = vpop.permute.xlu1 %336  ;;  %v581_v17 = vpop.permute.xlu0 %580 }
  0xb4   :  { %v711_v12 = vsel %vm707_vm11, %v694_v1, %v581_v17  ;;  %v662_v13 = vsel %vm656_vm8, %v645_v48, %v337_v19 }
  0xb5   :  { %273 = vrot.lane.b32.xlu1 %v242_v18, %s3565_s21  ;;  %271 = vrot.lane.b32.xlu0 %v240_v24, %s3565_s21 }
  0xb6   :  { %3180 = vmatmul.mubr.msk.f32.gmra.mrb[2].mxu1 %vm732_vm12, %v711_v12 }
  0xb7   :  { %v420_v30 = vpop.permute.xlu1 %419  ;;  %v418_v31 = vpop.permute.xlu0 %417 }
  0xb8   :  { %v679_v58 = vsel %vm673_vm9, %v662_v13, %v420_v30  ;;  %v678_v25 = vsel %vm673_vm9, %v661_v56, %v418_v31 }
  0xb9   :  { %356 = vrot.lane.b32.xlu1 %v325_v22, %s3567_s25  ;;  %354 = vrot.lane.b32.xlu0 %v323_v63, %s3567_s25  ;;  %s3576_s25 = smov 64  }
  0xbb   :  { %v502_v43 = vpop.permute.xlu1 %501  ;;  %v500_v47 = vpop.permute.xlu0 %499 }
  0xbc   :  { %v696_v51 = vsel %vm690_vm10, %v679_v58, %v502_v43  ;;  %v695_v21 = vsel %vm690_vm10, %v678_v25, %v500_v47 }
  0xbd   :  { %439 = vrot.lane.b32.xlu1 %v408_v39, %s3568_s26  ;;  %437 = vrot.lane.b32.xlu0 %v406_v3, %s3568_s26 }
  0xbf   :  { %v585_v27 = vpop.permute.xlu1 %584  ;;  %v583_v29 = vpop.permute.xlu0 %582 }
  0xc0   :  { %v713_v53 = vsel %vm707_vm11, %v696_v51, %v585_v27  ;;  %v712_v45 = vsel %vm707_vm11, %v695_v21, %v583_v29 }
  0xc1   :  { %521 = vrot.lane.b32.xlu1 %v490_v55, %s3569_s27  ;;  %519 = vrot.lane.b32.xlu0 %v488_v37, %s3569_s27  ;;  %s3571_s27 = smov 80  }
  0xc2   :  { %3182 = vmatprep.mubr.msk.f32.mxu1 %vm732_vm12, %v712_v45 }
  0xc3   :  { %3183 = vmatmul.mubr.msk.f32.gmra.mrb[4].mxu1 %vm732_vm12, %v713_v53  ;;  %v175_v57 = vpop.permute.xlu1 %174  ;;  %v173_v59 = vpop.permute.xlu0 %172 }
  0xc4   :  { %v630_v6 = vsel %vm622_vm6, %v3795_v41, %v175_v57  ;;  %v629_v46 = vsel %vm622_vm6, %v3747_v5, %v173_v59 }
  0xc5   :  { %604 = vrot.lane.b32.xlu1 %v573_v36, %s3570_s2  ;;  %602 = vrot.lane.b32.xlu0 %v571_v54, %s3570_s2  ;;  %s3572_s2 = smov 16  }
  0xc7   :  { %v258_v60 = vpop.permute.xlu1 %257  ;;  %v256_v61 = vpop.permute.xlu0 %255 }
  0xc8   :  { %v647_v4 = vsel %vm639_vm7, %v630_v6, %v258_v60  ;;  %v646_v44 = vsel %vm639_vm7, %v629_v46, %v256_v61 }
  0xcb   :  { %v341_v62 = vpop.permute.xlu1 %340  ;;  %v339_v0 = vpop.permute.xlu0 %338 }
  0xcc   :  { %v664_v11 = vsel %vm656_vm8, %v647_v4, %v341_v62  ;;  %v663_v18 = vsel %vm656_vm8, %v646_v44, %v339_v0 }
  0xcf   :  { %v424_v7 = vpop.permute.xlu1 %423  ;;  %v422_v2 = vpop.permute.xlu0 %421 }
  0xd0   :  { %v681_v24 = vsel %vm673_vm9, %v664_v11, %v424_v7  ;;  %v680_v8 = vsel %vm673_vm9, %v663_v18, %v422_v2 }
  0xd3   :  { %v506_v9 = vpop.permute.xlu1 %505  ;;  %v504_v10 = vpop.permute.xlu0 %503 }
  0xd4   :  { %v698_v1 = vsel %vm690_vm10, %v681_v24, %v506_v9  ;;  %v697_v41 = vsel %vm690_vm10, %v680_v8, %v504_v10 }
  0xd7   :  { %v589_v19 = vpop.permute.xlu1 %588  ;;  %v587_v5 = vpop.permute.xlu0 %586 }
  0xd8   :  { %v715_v17 = vsel %vm707_vm11, %v698_v1, %v589_v19  ;;  %v714_v12 = vsel %vm707_vm11, %v697_v41, %v587_v5 }
  0xd9   :  { %3185 = vmatprep.mubr.msk.f32.mxu1 %vm732_vm12, %v714_v12 }
  0xda   :  { %3186 = vmatmul.mubr.msk.f32.gmra.mrb[6].mxu1 %vm732_vm12, %v715_v17 }
  0xdb   :  { %v179_v22 = vpop.permute.xlu1 %178  ;;  %v177_v63 = vpop.permute.xlu0 %176 }
  0xdc   :  { %v631_v40 = vsel %vm622_vm6, %v3844_v16, %v177_v63  ;;  %v632_v58 = vsel %vm622_vm6, %v3838_v14, %v179_v22 }
  0xdf   :  { %v262_v23 = vpop.permute.xlu1 %261  ;;  %v260_v28 = vpop.permute.xlu0 %259 }
  0xe0   :  { %v648_v47 = vsel %vm639_vm7, %v631_v40, %v260_v28  ;;  %v649_v26 = vsel %vm639_vm7, %v632_v58, %v262_v23 }
  0xe3   :  { %v345_v30 = vpop.permute.xlu1 %344  ;;  %v343_v31 = vpop.permute.xlu0 %342 }
  0xe4   :  { %v665_v33 = vsel %vm656_vm8, %v648_v47, %v343_v31  ;;  %v666_v49 = vsel %vm656_vm8, %v649_v26, %v345_v30 }
  0xe7   :  { %v181_v32 = vpop.permute.xlu1 %180  ;;  %v426_v34 = vpop.permute.xlu0 %425 }
  0xe8   :  { %v682_v48 = vsel %vm673_vm9, %v665_v33, %v426_v34  ;;  %v633_v57 = vsel %vm622_vm6, %v3841_v15, %v181_v32 }
  0xeb   :  { %v508_v39 = vpop.permute.xlu1 %507  ;;  %v428_v3 = vpop.permute.xlu0 %427 }
  0xec   :  { %v699_v55 = vsel %vm690_vm10, %v682_v48, %v508_v39  ;;  %v683_v51 = vsel %vm673_vm9, %v666_v49, %v428_v3 }
  0xef   :  { %v264_v42 = vpop.permute.xlu1 %263  ;;  %v183_v43 = vpop.permute.xlu0 %182 }
  0xf0   :  { %v650_v61 = vsel %vm639_vm7, %v633_v57, %v264_v42  ;;  %v634_v9 = vsel %vm622_vm6, %v3871_v35, %v183_v43 }
  0xf3   :  { %v591_v56 = vpop.permute.xlu1 %590  ;;  %v510_v13 = vpop.permute.xlu0 %509 }
  0xf4   :  { %v716_v37 = vsel %vm707_vm11, %v699_v55, %v591_v56  ;;  %v700_v21 = vsel %vm690_vm10, %v683_v51, %v510_v13 }
  0xf5   :  { %3188 = vmatprep.mubr.msk.f32.mxu1 %vm732_vm12, %v716_v37 }
  0xf7   :  { %v347_v16 = vpop.permute.xlu1 %346  ;;  %v266_v25 = vpop.permute.xlu0 %265 }
  0xf8   :  { %v667_v62 = vsel %vm656_vm8, %v650_v61, %v347_v16  ;;  %v651_v4 = vsel %vm639_vm7, %v634_v9, %v266_v25 }
  0xfb   :  { %v349_v27 = vpop.permute.xlu1 %348  ;;  %v593_v29 = vpop.permute.xlu0 %592 }
  0xfc   :  { %v717_v53 = vsel %vm707_vm11, %v700_v21, %v593_v29  ;;  %v668_v44 = vsel %vm656_vm8, %v651_v4, %v349_v27 }
  0xfd   :  { %3189 = vmatmul.mubr.msk.f32.gmra.mrb[8].mxu1 %vm732_vm12, %v717_v53 }
  0xff   :  { %v185_v45 = vpop.permute.xlu1 %184  ;;  %v430_v14 = vpop.permute.xlu0 %429 }
 0x100   :  { %v684_v0 = vsel %vm673_vm9, %v667_v62, %v430_v14  ;;  %v635_v35 = vsel %vm622_vm6, %v3891_v50, %v185_v45 }
 0x103   :  { %v512_v36 = vpop.permute.xlu1 %511  ;;  %v432_v54 = vpop.permute.xlu0 %431 }
 0x104   :  { %v701_v7 = vsel %vm690_vm10, %v684_v0, %v512_v36  ;;  %v685_v11 = vsel %vm673_vm9, %v668_v44, %v432_v54  ;;  %v4226_v36 = vld [vmem:[%s5597_s3] ss:$0 sm:$0xff] }
 0x107   :  { %v268_v59 = vpop.permute.xlu1 %267  ;;  %v187_v60 = vpop.permute.xlu0 %186 }
 0x108   :  { %v636_v5 = vsel %vm622_vm6, %v3926_v20, %v187_v60  ;;  %v652_v22 = vsel %vm639_vm7, %v635_v35, %v268_v59 }
 0x10b   :  { %v595_v2 = vpop.permute.xlu1 %594  ;;  %v514_v6 = vpop.permute.xlu0 %513 }
 0x10c   :  { %v718_v46 = vsel %vm707_vm11, %v701_v7, %v595_v2  ;;  %v702_v18 = vsel %vm690_vm10, %v685_v11, %v514_v6 }
 0x10d   :  { %3191 = vmatprep.mubr.msk.f32.mxu1 %vm732_vm12, %v718_v46 }
 0x10f   :  { %v351_v15 = vpop.permute.xlu1 %350  ;;  %v270_v10 = vpop.permute.xlu0 %269 }
 0x110   :  { %v653_v63 = vsel %vm639_vm7, %v636_v5, %v270_v10  ;;  %v669_v23 = vsel %vm656_vm8, %v652_v22, %v351_v15  ;;  %v1645_v5 = vld [vmem:[%s5598_s4 + $0x10] sm:$0xff] }
 0x113   :  { %v353_v24 = vpop.permute.xlu1 %352  ;;  %v597_v8 = vpop.permute.xlu0 %596 }
 0x114   :  { %v719_v1 = vsel %vm707_vm11, %v702_v18, %v597_v8  ;;  %v670_v28 = vsel %vm656_vm8, %v653_v63, %v353_v24  ;;  %v1643_v24 = vld [vmem:[%s5598_s4] sm:$0xff]  ;;  %v1644_v8 = vld [vmem:[%s5598_s4 + $0x8] sm:$0xff] }
 0x115   :  { %3192 = vmatmul.mubr.msk.f32.gmra.mrb[10].mxu1 %vm732_vm12, %v719_v1 }
 0x117   :  { %v436_v41 = vpop.permute.xlu1 %435  ;;  %v434_v19 = vpop.permute.xlu0 %433 }
 0x118   :  { %v687_v30 = vsel %vm673_vm9, %v670_v28, %v436_v41  ;;  %v686_v31 = vsel %vm673_vm9, %v669_v23, %v434_v19 }
 0x11b   :  { %v518_v17 = vpop.permute.xlu1 %517  ;;  %v516_v12 = vpop.permute.xlu0 %515 }
 0x11c   :  { %v704_v32 = vsel %vm690_vm10, %v687_v30, %v518_v17  ;;  %v703_v50 = vsel %vm690_vm10, %v686_v31, %v516_v12  ;;  %v1646_v17 = vld [vmem:[%s5598_s4 + $0x18] sm:$0xff]  ;;  %v3308_v12 = vpack.c.bf16 %v1644_v8, %v1643_v24  ;;  %v1647_v31 = vld [vmem:[%s5598_s4 + $0x20] sm:$0xff] }
 0x11d   :  { %v3312_v22 = vpack.c.bf16 %v1646_v17, %v1645_v5 }
 0x11e   :  { %3309 = vmatprep.subr.bf16.mxu1 %v3308_v12 }
 0x11f   :  { %v601_v34 = vpop.permute.xlu1 %600  ;;  %v599_v20 = vpop.permute.xlu0 %598  ;;  %3311 = vmatpush3.bf16.msra.mxu1 %v3308_v12 }
 0x120   :  { %v721_v39 = vsel %vm707_vm11, %v704_v32, %v601_v34  ;;  %v720_v3 = vsel %vm707_vm11, %v703_v50, %v599_v20  ;;  %v1648_v32 = vld [vmem:[%s5598_s4 + $0x28] sm:$0xff]  ;;  %3313 = vmatprep.subr.bf16.mxu1 %v3312_v22 }
 0x121   :  { %3194 = vmatprep.mubr.msk.f32.mxu1 %vm732_vm12, %v720_v3  ;;  %v3316_v50 = vpack.c.bf16 %v1648_v32, %v1647_v31  ;;  %v1649_v3 = vld [vmem:[%s5598_s4 + $0x30] sm:$0xff] }
 0x122   :  { %3195 = vmatmul.mubr.msk.f32.gmra.mrb[12].mxu1 %vm732_vm12, %v721_v39 }
 0x123   :  { %v191_v40 = vpop.permute.xlu1 %190  ;;  %v189_v42 = vpop.permute.xlu0 %188  ;;  %3315 = vmatpush3.bf16.msra.mxu1 %v3312_v22 }
 0x124   :  { %v638_v13 = vsel %vm622_vm6, %v4048_v52, %v191_v40  ;;  %v637_v37 = vsel %vm622_vm6, %v3953_v38, %v189_v42  ;;  %v1650_v40 = vld [vmem:[%s5598_s4 + $0x38] sm:$0xff]  ;;  %3317 = vmatprep.subr.bf16.mxu1 %v3316_v50 }
 0x125   :  { %v3320_v42 = vpack.c.bf16 %v1650_v40, %v1649_v3 }
 0x127   :  { %v274_v43 = vpop.permute.xlu1 %273  ;;  %v272_v47 = vpop.permute.xlu0 %271  ;;  %3319 = vmatpush3.bf16.msra.mxu1 %v3316_v50 }
 0x128   :  { %v655_v25 = vsel %vm639_vm7, %v638_v13, %v274_v43  ;;  %v654_v26 = vsel %vm639_vm7, %v637_v37, %v272_v47  ;;  %3321 = vmatprep.subr.bf16.mxu1 %v3320_v42 }
 0x12b   :  { %v357_v33 = vpop.permute.xlu1 %356  ;;  %v355_v48 = vpop.permute.xlu0 %354  ;;  %3323 = vmatpush3.bf16.msra.mxu1 %v3320_v42 }
 0x12c   :  { %v672_v49 = vsel %vm656_vm8, %v655_v25, %v357_v33  ;;  %v671_v51 = vsel %vm656_vm8, %v654_v26, %v355_v48  ;;  %v1651_v33 = vld [vmem:[%s5598_s4 + $0x40] sm:$0xff]  ;;  %v1652_v48 = vld [vmem:[%s5598_s4 + $0x48] sm:$0xff]  ;;  %v1653_v25 = vld [vmem:[%s5598_s4 + $0x50] sm:$0xff] }
 0x12d   :  { %v1654_v26 = vld [vmem:[%s5598_s4 + $0x58] sm:$0xff] }
 0x12f   :  { %v440_v55 = vpop.permute.xlu1 %439  ;;  %v438_v56 = vpop.permute.xlu0 %437 }
 0x130   :  { %v689_v21 = vsel %vm673_vm9, %v672_v49, %v440_v55  ;;  %v688_v27 = vsel %vm673_vm9, %v671_v51, %v438_v56 }
 0x133   :  { %v522_v58 = vpop.permute.xlu1 %521  ;;  %v520_v16 = vpop.permute.xlu0 %519 }
 0x134   :  { %v706_v29 = vsel %vm690_vm10, %v689_v21, %v522_v58  ;;  %v705_v52 = vsel %vm690_vm10, %v688_v27, %v520_v16  ;;  %v3324_v58 = vpack.c.bf16 %v1652_v48, %v1651_v33 }
 0x136   :  { %3325 = vmatprep.subr.bf16.mxu1 %v3324_v58 }
 0x137   :  { %v605_v53 = vpop.permute.xlu1 %604  ;;  %v603_v38 = vpop.permute.xlu0 %602  ;;  %3327 = vmatpush3.bf16.msra.mxu1 %v3324_v58 }
 0x138   :  { %v723_v45 = vsel %vm707_vm11, %v706_v29, %v605_v53  ;;  %v722_v14 = vsel %vm707_vm11, %v705_v52, %v603_v38  ;;  %v3328_v29 = vpack.c.bf16 %v1654_v26, %v1653_v25 }
 0x139   :  { %3197 = vmatprep.mubr.msk.f32.mxu1 %vm732_vm12, %v722_v14 }
 0x13a   :  { %3198 = vmatmul.mubr.msk.f32.gmra.mrb[14].mxu1 %vm732_vm12, %v723_v45  ;;  %3329 = vmatprep.subr.bf16.mxu1 %v3328_v29 }
 0x13b   :  { %3331 = vmatpush3.bf16.msra.mxu1 %v3328_v29 }
 0x171   :  { %v3178_v54 = vpop.f32.mrb[0].mxu1 }
 0x172   :  { %v856_v57 = vadd.f32 %v3178_v54, %v4226_v36  ;;  %v850_v59 = vpop.f32.mrb[1].mxu1 }
 0x173   :  { %v851_v60 = vadd.f32 %v4226_v36, %v850_v59 }
 0x174   :  { %vm930_vm13 = vcmp.ge.f32.partialorder %v856_v57, 0.0  ;;  %v946_v61 = vmul.f32 0.2, %v856_v57 }
 0x175   :  { %vm929_vm14 = vcmp.ge.f32.partialorder %v851_v60, 0.0  ;;  %v945_v62 = vmul.f32 0.2, %v851_v60 }
 0x176   :  { %v4230_v0 = vsel %vm930_vm13, %v856_v57, %v946_v61  ;;  %v1656_v61 = vld [vmem:[%s5598_s4 + $0x68] sm:$0xff] }
 0x177   :  { %v994_v7 = vrot.slane %v4230_v0, 5  ;;  %v961_v2 = vsel %vm929_vm14, %v851_v60, %v945_v62  ;;  %v1655_v60 = vld [vmem:[%s5598_s4 + $0x60] sm:$0xff] }
 0x178   :  { %v993_v6 = vrot.slane %v961_v2, 5 }
 0x17a   :  { %v4236_v46 = vsel %vm68_vm0, %v993_v6, %v994_v7  ;;  %v4239_v9 = vsel %vm68_vm0, 0.0, %v993_v6 }
 0x17b   :  { %v1377_v15 = vrot.slane %v4239_v9, 5  ;;  %v1378_v10 = vrot.slane %v4236_v46, 5  ;;  %v1049_v4 = vrot.slane %v4239_v9, 1  ;;  %v1050_v44 = vrot.slane %v4236_v46, 1 }
 0x17c   :  { %v1459_v11 = vrot.slane %v4239_v9, 6  ;;  %v1460_v18 = vrot.slane %v4236_v46, 6  ;;  %v1131_v19 = vrot.slane %v4239_v9, 2  ;;  %v1132_v35 = vrot.slane %v4236_v46, 2 }
 0x17d   :  { %v1379_v1 = vsel %vm68_vm0, %v1377_v15, %v1378_v10  ;;  %v1051_v41 = vsel %vm125_vm2, %v1049_v4, %v1050_v44  ;;  %v1213_v28 = vrot.slane %v4239_v9, 3  ;;  %v1214_v30 = vrot.slane %v4236_v46, 3 }
 0x17e   :  { %1411 = vrot.lane.b32.xlu1 %v1379_v1, %s3571_s27  ;;  %1083 = vrot.lane.b32.xlu0 %v1051_v41, %s3572_s2  ;;  %v1461_v63 = vsel %vm539_vm5, %v1459_v11, %v1460_v18  ;;  %v1133_v23 = vsel %vm208_vm1, %v1131_v19, %v1132_v35  ;;  %v1295_v20 = vrot.slane %v4239_v9, 4  ;;  %v1296_v39 = vrot.slane %v4236_v46, 4 }
 0x17f   :  { %v1215_v34 = vsel %vm291_vm3, %v1213_v28, %v1214_v30  ;;  %v3332_v4 = vpack.c.bf16 %v1656_v61, %v1655_v60 }
 0x180   :  { %v1297_v47 = vsel %vm374_vm4, %v1295_v20, %v1296_v39 }
 0x181   :  { %3333 = vmatprep.subr.bf16.mxu1 %v3332_v4 }
 0x182   :  { %1493 = vrot.lane.b32.xlu1 %v1461_v63, %s3573_s30  ;;  %1165 = vrot.lane.b32.xlu0 %v1133_v23, %s3574_s11 }
 0x183   :  { %3335 = vmatpush3.bf16.msra.mxu1 %v3332_v4 }
 0x186   :  { %1247 = vrot.lane.b32.xlu0 %v1215_v34, %s3575_s16 }
 0x189   :  { %v3181_v43 = vpop.f32.mrb[2].mxu1 }
 0x18a   :  { %v866_v55 = vadd.f32 %v3181_v43, %v4226_v36  ;;  %1329 = vrot.lane.b32.xlu0 %v1297_v47, %s3576_s25  ;;  %v860_v56 = vpop.f32.mrb[3].mxu1 }
 0x18b   :  { %v861_v13 = vadd.f32 %v4226_v36, %v860_v56 }
 0x18c   :  { %vm932_vm15 = vcmp.ge.f32.partialorder %v866_v55, 0.0  ;;  %v948_v37 = vmul.f32 0.2, %v866_v55 }
 0x18d   :  { %vm931_vm6 = vcmp.ge.f32.partialorder %v861_v13, 0.0  ;;  %v947_v16 = vmul.f32 0.2, %v861_v13 }
 0x18e   :  { %v964_v49 = vsel %vm932_vm15, %v866_v55, %v948_v37  ;;  %vm1541_vm15 = vcmask 130048  }
 0x18f   :  { %v998_v51 = vrot.slane %v964_v49, 5  ;;  %v963_v21 = vsel %vm931_vm6, %v861_v13, %v947_v16  ;;  %vm1558_vm6 = vcmask 261120  }
 0x190   :  { %v996_v27 = vrot.slane %v963_v21, 5 }
 0x192   :  { %v4316_v52 = vsel %vm68_vm0, %v994_v7, %v996_v27  ;;  %v4319_v53 = vsel %vm68_vm0, %v996_v27, %v998_v51 }
 0x193   :  { %v1298_v38 = vrot.slane %v4316_v52, 4  ;;  %v1052_v45 = vrot.slane %v4316_v52, 1  ;;  %v1380_v57 = vrot.slane %v4316_v52, 5  ;;  %v1134_v59 = vrot.slane %v4316_v52, 2 }
 0x194   :  { %v1462_v6 = vrot.slane %v4316_v52, 6  ;;  %v1216_v15 = vrot.slane %v4316_v52, 3  ;;  %v1300_v5 = vrot.slane %v4319_v53, 4  ;;  %v1054_v12 = vrot.slane %v4319_v53, 1 }
 0x195   :  { %v1299_v14 = vsel %vm374_vm4, %v1296_v39, %v1298_v38  ;;  %v1053_v54 = vsel %vm125_vm2, %v1050_v44, %v1052_v45  ;;  %v1381_v11 = vsel %vm68_vm0, %v1378_v10, %v1380_v57  ;;  %v1135_v24 = vsel %vm208_vm1, %v1132_v35, %v1134_v59 }
 0x196   :  { %1331 = vrot.lane.b32.xlu0 %v1299_v14, %s3576_s25  ;;  %1085 = vrot.lane.b32.xlu1 %v1053_v54, %s3572_s2  ;;  %v3184_v62 = vpop.f32.mrb[4].mxu1  ;;  %v1463_v10 = vsel %vm539_vm5, %v1460_v18, %v1462_v6  ;;  %v1217_v35 = vsel %vm291_vm3, %v1214_v30, %v1216_v15  ;;  %v1301_v23 = vsel %vm374_vm4, %v1298_v38, %v1300_v5  ;;  %v1382_v28 = vrot.slane %v4319_v53, 5 }
 0x197   :  { %v876_v0 = vadd.f32 %v3184_v62, %v4226_v36  ;;  %v870_v7 = vpop.f32.mrb[5].mxu1  ;;  %v1055_v18 = vsel %vm125_vm2, %v1052_v45, %v1054_v12  ;;  %v1136_v30 = vrot.slane %v4319_v53, 2  ;;  %v1464_v50 = vrot.slane %v4319_v53, 6 }
 0x198   :  { %v871_v2 = vadd.f32 %v4226_v36, %v870_v7  ;;  %v1383_v31 = vsel %vm68_vm0, %v1380_v57, %v1382_v28  ;;  %v1218_v34 = vrot.slane %v4319_v53, 3 }
 0x199   :  { %vm934_vm7 = vcmp.ge.f32.partialorder %v876_v0, 0.0  ;;  %v950_v44 = vmul.f32 0.2, %v876_v0  ;;  %v1137_v32 = vsel %vm208_vm1, %v1134_v59, %v1136_v30  ;;  %v1465_v20 = vsel %vm539_vm5, %v1462_v6, %v1464_v50 }
 0x19a   :  { %vm933_vm8 = vcmp.ge.f32.partialorder %v871_v2, 0.0  ;;  %v949_v8 = vmul.f32 0.2, %v871_v2  ;;  %1413 = vrot.lane.b32.xlu0 %v1381_v11, %s3571_s27  ;;  %1167 = vrot.lane.b32.xlu1 %v1135_v24, %s3574_s11  ;;  %v1219_v39 = vsel %vm291_vm3, %v1216_v15, %v1218_v34 }
 0x19b   :  { %v966_v1 = vsel %vm934_vm7, %v876_v0, %v950_v44  ;;  %vm1575_vm7 = vcmask 392192  }
 0x19c   :  { %v1002_v41 = vrot.slane %v966_v1, 5  ;;  %v965_v19 = vsel %vm933_vm8, %v871_v2, %v949_v8 }
 0x19d   :  { %v1000_v17 = vrot.slane %v965_v19, 5 }
 0x19e   :  { %1495 = vrot.lane.b32.xlu0 %v1463_v10, %s3573_s30  ;;  %1249 = vrot.lane.b32.xlu1 %v1217_v35, %s3575_s16 }
 0x19f   :  { %v4360_v22 = vsel %vm68_vm0, %v998_v51, %v1000_v17  ;;  %v4363_v63 = vsel %vm68_vm0, %v1000_v17, %v1002_v41 }
 0x1a0   :  { %v1220_v3 = vrot.slane %v4360_v22, 3  ;;  %v1056_v40 = vrot.slane %v4360_v22, 1  ;;  %v1302_v33 = vrot.slane %v4360_v22, 4  ;;  %v1138_v48 = vrot.slane %v4360_v22, 2 }
 0x1a1   :  { %v1384_v58 = vrot.slane %v4360_v22, 5  ;;  %v1058_v16 = vrot.slane %v4363_v63, 1  ;;  %v1466_v14 = vrot.slane %v4360_v22, 6  ;;  %v1140_v54 = vrot.slane %v4363_v63, 2 }
 0x1a2   :  { %1333 = vrot.lane.b32.xlu0 %v1301_v23, %s3576_s25  ;;  %1087 = vrot.lane.b32.xlu1 %v1055_v18, %s3572_s2  ;;  %v1221_v42 = vsel %vm291_vm3, %v1218_v34, %v1220_v3  ;;  %v1057_v43 = vsel %vm125_vm2, %v1054_v12, %v1056_v40  ;;  %v1303_v26 = vsel %vm374_vm4, %v1300_v5, %v1302_v33  ;;  %v1222_v62 = vrot.slane %v4363_v63, 3 }
 0x1a3   :  { %v1139_v49 = vsel %vm208_vm1, %v1136_v30, %v1138_v48  ;;  %v1385_v38 = vsel %vm68_vm0, %v1382_v28, %v1384_v58  ;;  %v1059_v45 = vsel %vm125_vm2, %v1056_v40, %v1058_v16  ;;  %v1467_v60 = vsel %vm539_vm5, %v1464_v50, %v1466_v14 }
 0x1a4   :  { %v1141_v61 = vsel %vm208_vm1, %v1138_v48, %v1140_v54  ;;  %v1223_v7 = vsel %vm291_vm3, %v1220_v3, %v1222_v62  ;;  %v1304_v6 = vrot.slane %v4363_v63, 4  ;;  %v1386_v11 = vrot.slane %v4363_v63, 5 }
 0x1a6   :  { %1415 = vrot.lane.b32.xlu0 %v1383_v31, %s3571_s27  ;;  %1169 = vrot.lane.b32.xlu1 %v1137_v32, %s3574_s11  ;;  %v1305_v4 = vsel %vm374_vm4, %v1302_v33, %v1304_v6  ;;  %v1387_v8 = vsel %vm68_vm0, %v1384_v58, %v1386_v11 }
 0x1aa   :  { %1497 = vrot.lane.b32.xlu0 %v1465_v20, %s3573_s30  ;;  %1251 = vrot.lane.b32.xlu1 %v1219_v39, %s3575_s16 }
 0x1ad   :  { %v3187_v47 = vpop.f32.mrb[6].mxu1 }
 0x1ae   :  { %1253 = vrot.lane.b32.xlu1 %v1221_v42, %s3575_s16  ;;  %1089 = vrot.lane.b32.xlu0 %v1057_v43, %s3572_s2  ;;  %v886_v55 = vadd.f32 %v3187_v47, %v4226_v36  ;;  %v880_v56 = vpop.f32.mrb[7].mxu1 }
 0x1af   :  { %v881_v13 = vadd.f32 %v4226_v36, %v880_v56 }
 0x1b0   :  { %vm936_vm9 = vcmp.ge.f32.partialorder %v886_v55, 0.0  ;;  %v952_v37 = vmul.f32 0.2, %v886_v55 }
 0x1b1   :  { %vm935_vm10 = vcmp.ge.f32.partialorder %v881_v13, 0.0  ;;  %v951_v25 = vmul.f32 0.2, %v881_v13 }
 0x1b2   :  { %v968_v51 = vsel %vm936_vm9, %v886_v55, %v952_v37  ;;  %1335 = vrot.lane.b32.xlu1 %v1303_v26, %s3576_s25  ;;  %1171 = vrot.lane.b32.xlu0 %v1139_v49, %s3574_s11 }
 0x1b3   :  { %v1006_v21 = vrot.slane %v968_v51, 5  ;;  %v967_v27 = vsel %vm935_vm10, %v881_v13, %v951_v25  ;;  %vm1592_vm10 = vcmask 523264  }
 0x1b4   :  { %v1004_v29 = vrot.slane %v967_v27, 5 }
 0x1b5   :  { %v1043_v12 = vsel %vm68_vm0, %v1006_v21, 0.0 }
 0x1b6   :  { %v4402_v57 = vsel %vm68_vm0, %v1002_v41, %v1004_v29  ;;  %v4405_v59 = vsel %vm68_vm0, %v1004_v29, %v1006_v21  ;;  %1417 = vrot.lane.b32.xlu1 %v1385_v38, %s3571_s27  ;;  %1091 = vrot.lane.b32.xlu0 %v1059_v45, %s3572_s2  ;;  %v1468_v41 = vrot.slane %v4363_v63, 6  ;;  %v1064_v32 = vrot.slane %v1043_v12, 1 }
 0x1b7   :  { %v1060_v0 = vrot.slane %v4402_v57, 1  ;;  %v1142_v15 = vrot.slane %v4402_v57, 2  ;;  %v1224_v24 = vrot.slane %v4402_v57, 3  ;;  %v1306_v19 = vrot.slane %v4402_v57, 4 }
 0x1b8   :  { %v1469_v5 = vsel %vm539_vm5, %v1466_v14, %v1468_v41  ;;  %v1062_v10 = vrot.slane %v4405_v59, 1  ;;  %v1388_v35 = vrot.slane %v4402_v57, 5  ;;  %v1144_v28 = vrot.slane %v4405_v59, 2 }
 0x1b9   :  { %v1061_v2 = vsel %vm125_vm2, %v1058_v16, %v1060_v0  ;;  %v1143_v44 = vsel %vm208_vm1, %v1140_v54, %v1142_v15  ;;  %v1225_v1 = vsel %vm291_vm3, %v1222_v62, %v1224_v24  ;;  %v1307_v17 = vsel %vm374_vm4, %v1304_v6, %v1306_v19 }
 0x1ba   :  { %1499 = vrot.lane.b32.xlu1 %v1467_v60, %s3573_s30  ;;  %1173 = vrot.lane.b32.xlu0 %v1141_v61, %s3574_s11  ;;  %v1063_v23 = vsel %vm125_vm2, %v1060_v0, %v1062_v10  ;;  %v1389_v18 = vsel %vm68_vm0, %v1386_v11, %v1388_v35  ;;  %v1470_v30 = vrot.slane %v4402_v57, 6  ;;  %v1145_v34 = vsel %vm208_vm1, %v1142_v15, %v1144_v28 }
 0x1bb   :  { %v1226_v3 = vrot.slane %v4405_v59, 3  ;;  %v1146_v47 = vrot.slane %v1043_v12, 2  ;;  %v1065_v55 = vsel %vm125_vm2, %v1062_v10, %v1064_v32  ;;  %v1308_v56 = vrot.slane %v4405_v59, 4 }
 0x1bc   :  { %v1471_v20 = vsel %vm539_vm5, %v1468_v41, %v1470_v30  ;;  %v1390_v49 = vrot.slane %v4405_v59, 5  ;;  %v1228_v51 = vrot.slane %v1043_v12, 3  ;;  %v1472_v29 = vrot.slane %v4405_v59, 6 }
 0x1bd   :  { %v1227_v48 = vsel %vm291_vm3, %v1224_v24, %v1226_v3  ;;  %v1147_v16 = vsel %vm208_vm1, %v1144_v28, %v1146_v47  ;;  %v1309_v26 = vsel %vm374_vm4, %v1306_v19, %v1308_v56  ;;  %v1310_v38 = vrot.slane %v1043_v12, 4 }
 0x1be   :  { %1255 = vrot.lane.b32.xlu0 %v1223_v7, %s3575_s16  ;;  %1093 = vrot.lane.b32.xlu1 %v1061_v2, %s3572_s2  ;;  %v1391_v21 = vsel %vm68_vm0, %v1388_v35, %v1390_v49  ;;  %v1229_v27 = vsel %vm291_vm3, %v1226_v3, %v1228_v51  ;;  %v1392_v14 = vrot.slane %v1043_v12, 5  ;;  %v1473_v54 = vsel %vm539_vm5, %v1470_v30, %v1472_v29 }
 0x1bf   :  { %v1311_v60 = vsel %vm374_vm4, %v1308_v56, %v1310_v38  ;;  %v1474_v0 = vrot.slane %v1043_v12, 6 }
 0x1c0   :  { %v1393_v7 = vsel %vm68_vm0, %v1390_v49, %v1392_v14 }
 0x1c2   :  { %1337 = vrot.lane.b32.xlu0 %v1305_v4, %s3576_s25  ;;  %1175 = vrot.lane.b32.xlu1 %v1143_v44, %s3574_s11  ;;  %v1475_v44 = vsel %vm539_vm5, %v1472_v29, %v1474_v0 }
 0x1c6   :  { %1419 = vrot.lane.b32.xlu0 %v1387_v8, %s3571_s27  ;;  %1257 = vrot.lane.b32.xlu1 %v1225_v1, %s3575_s16 }
 0x1ca   :  { %1501 = vrot.lane.b32.xlu0 %v1469_v5, %s3573_s30  ;;  %1339 = vrot.lane.b32.xlu1 %v1307_v17, %s3576_s25 }
 0x1ce   :  { %1095 = vrot.lane.b32.xlu0 %v1063_v23, %s3572_s2  ;;  %1421 = vrot.lane.b32.xlu1 %v1389_v18, %s3571_s27 }
 0x1d0   :  { %v3190_v31 = vpop.f32.mrb[8].mxu1 }
 0x1d1   :  { %v896_v50 = vadd.f32 %v3190_v31, %v4226_v36  ;;  %v890_v39 = vpop.f32.mrb[9].mxu1 }
 0x1d2   :  { %1177 = vrot.lane.b32.xlu0 %v1145_v34, %s3574_s11  ;;  %1503 = vrot.lane.b32.xlu1 %v1471_v20, %s3573_s30  ;;  %v891_v40 = vadd.f32 %v4226_v36, %v890_v39 }
 0x1d3   :  { %vm938_vm11 = vcmp.ge.f32.partialorder %v896_v50, 0.0  ;;  %v954_v42 = vmul.f32 0.2, %v896_v50 }
 0x1d4   :  { %vm937_vm12 = vcmp.ge.f32.partialorder %v891_v40, 0.0  ;;  %v953_v43 = vmul.f32 0.2, %v891_v40 }
 0x1d5   :  { %v4453_v33 = vsel %vm938_vm11, %v896_v50, %v954_v42  ;;  %vm1609_vm11 = vcmask 654336  }
 0x1d6   :  { %v1009_v13 = vrot.slane %v4453_v33, 5  ;;  %v969_v37 = vsel %vm937_vm12, %v891_v40, %v953_v43  ;;  %1259 = vrot.lane.b32.xlu0 %v1227_v48, %s3575_s16  ;;  %1097 = vrot.lane.b32.xlu1 %v1065_v55, %s3572_s2  ;;  %vm1626_vm12 = vcmask 785408  }
 0x1d7   :  { %v1008_v58 = vrot.slane %v969_v37, 5 }
 0x1d9   :  { %v4465_v25 = vsel %vm68_vm0, %v1008_v58, %v1009_v13  ;;  %v4475_v45 = vsel %vm68_vm0, 0.0, %v1008_v58 }
 0x1da   :  { %1341 = vrot.lane.b32.xlu0 %v1309_v26, %s3576_s25  ;;  %1179 = vrot.lane.b32.xlu1 %v1147_v16, %s3574_s11  ;;  %v1066_v61 = vrot.slane %v4475_v45, 1  ;;  %v1067_v62 = vrot.slane %v4465_v25, 1  ;;  %v1148_v6 = vrot.slane %v4475_v45, 2  ;;  %v1149_v15 = vrot.slane %v4465_v25, 2 }
 0x1db   :  { %v1394_v11 = vrot.slane %v4475_v45, 5  ;;  %v1395_v24 = vrot.slane %v4465_v25, 5  ;;  %v1230_v19 = vrot.slane %v4475_v45, 3  ;;  %v1231_v5 = vrot.slane %v4465_v25, 3 }
 0x1dc   :  { %v1068_v2 = vsel %vm125_vm2, %v1066_v61, %v1067_v62  ;;  %v1150_v1 = vsel %vm208_vm1, %v1148_v6, %v1149_v15  ;;  %v1476_v35 = vrot.slane %v4475_v45, 6  ;;  %v1477_v18 = vrot.slane %v4465_v25, 6 }
 0x1dd   :  { %v1396_v23 = vsel %vm68_vm0, %v1394_v11, %v1395_v24  ;;  %v1232_v30 = vsel %vm291_vm3, %v1230_v19, %v1231_v5  ;;  %v1312_v31 = vrot.slane %v4475_v45, 4  ;;  %v1313_v32 = vrot.slane %v4465_v25, 4 }
 0x1de   :  { %1423 = vrot.lane.b32.xlu0 %v1391_v21, %s3571_s27  ;;  %1261 = vrot.lane.b32.xlu1 %v1229_v27, %s3575_s16  ;;  %v1478_v42 = vsel %vm539_vm5, %v1476_v35, %v1477_v18 }
 0x1df   :  { %v1314_v43 = vsel %vm374_vm4, %v1312_v31, %v1313_v32 }
 0x1e2   :  { %1505 = vrot.lane.b32.xlu0 %v1473_v54, %s3573_s30  ;;  %1343 = vrot.lane.b32.xlu1 %v1311_v60, %s3576_s25 }
 0x1e6   :  { %1425 = vrot.lane.b32.xlu1 %v1393_v7, %s3571_s27  ;;  %1099 = vrot.lane.b32.xlu0 %v1068_v2, %s3572_s2 }
 0x1e8   :  { %v3193_v4 = vpop.f32.mrb[10].mxu1 }
 0x1e9   :  { %v906_v8 = vadd.f32 %v3193_v4, %v4226_v36  ;;  %v900_v41 = vpop.f32.mrb[11].mxu1 }
 0x1ea   :  { %1507 = vrot.lane.b32.xlu1 %v1475_v44, %s3573_s30  ;;  %1181 = vrot.lane.b32.xlu0 %v1150_v1, %s3574_s11  ;;  %v901_v17 = vadd.f32 %v4226_v36, %v900_v41 }
 0x1eb   :  { %vm940_vm13 = vcmp.ge.f32.partialorder %v906_v8, 0.0  ;;  %v956_v10 = vmul.f32 0.2, %v906_v8 }
 0x1ec   :  { %vm939_vm14 = vcmp.ge.f32.partialorder %v901_v17, 0.0  ;;  %v955_v12 = vmul.f32 0.2, %v901_v17 }
 0x1ed   :  { %v4506_v28 = vsel %vm940_vm13, %v906_v8, %v956_v10  ;;  %vm1664_vm13 = vcmask 916480  }
 0x1ee   :  { %v1013_v50 = vrot.slane %v4506_v28, 5  ;;  %v971_v34 = vsel %vm939_vm14, %v901_v17, %v955_v12  ;;  %1427 = vrot.lane.b32.xlu1 %v1396_v23, %s3571_s27  ;;  %1263 = vrot.lane.b32.xlu0 %v1232_v30, %s3575_s16 }
 0x1ef   :  { %v1011_v20 = vrot.slane %v971_v34, 5 }
 0x1f0   :  { %v1084_v39 = vpop.permute.xlu0 %1083  ;;  %v1412_v51 = vpop.permute.xlu1 %1411 }
 0x1f1   :  { %v4519_v3 = vsel %vm68_vm0, %v1009_v13, %v1011_v20  ;;  %v4522_v40 = vsel %vm68_vm0, %v1011_v20, %v1013_v50  ;;  %v1542_v61 = vsel %vm1541_vm15, %v4239_v9, %v1084_v39 }
 0x1f2   :  { %1509 = vrot.lane.b32.xlu1 %v1478_v42, %s3573_s30  ;;  %1345 = vrot.lane.b32.xlu0 %v1314_v43, %s3576_s25  ;;  %v1315_v47 = vrot.slane %v4519_v3, 4  ;;  %v1069_v48 = vrot.slane %v4519_v3, 1  ;;  %v1397_v37 = vrot.slane %v4519_v3, 5  ;;  %v1151_v58 = vrot.slane %v4519_v3, 2 }
 0x1f3   :  { %v1479_v29 = vrot.slane %v4519_v3, 6  ;;  %v1233_v38 = vrot.slane %v4519_v3, 3  ;;  %v1317_v9 = vrot.slane %v4522_v40, 4  ;;  %v1071_v8 = vrot.slane %v4522_v40, 1 }
 0x1f4   :  { %v1166_v55 = vpop.permute.xlu0 %1165  ;;  %v1316_v33 = vsel %vm374_vm4, %v1313_v32, %v1315_v47  ;;  %v1070_v56 = vsel %vm125_vm2, %v1067_v62, %v1069_v48  ;;  %v1398_v54 = vsel %vm68_vm0, %v1395_v24, %v1397_v37  ;;  %v1152_v60 = vsel %vm208_vm1, %v1149_v15, %v1151_v58  ;;  %v1494_v1 = vpop.permute.xlu1 %1493 }
 0x1f5   :  { %v3196_v13 = vpop.f32.mrb[12].mxu1  ;;  %v1559_v0 = vsel %vm1558_vm6, %v1542_v61, %v1166_v55  ;;  %v1480_v11 = vsel %vm539_vm5, %v1477_v18, %v1479_v29  ;;  %v1234_v24 = vsel %vm291_vm3, %v1231_v5, %v1233_v38  ;;  %v1318_v5 = vsel %vm374_vm4, %v1315_v47, %v1317_v9 }
 0x1f6   :  { %1347 = vrot.lane.b32.xlu0 %v1316_v33, %s3576_s25  ;;  %1101 = vrot.lane.b32.xlu1 %v1070_v56, %s3572_s2  ;;  %v916_v16 = vadd.f32 %v3196_v13, %v4226_v36  ;;  %v910_v26 = vpop.f32.mrb[13].mxu1  ;;  %v1072_v35 = vsel %vm125_vm2, %v1069_v48, %v1071_v8  ;;  %v1399_v12 = vrot.slane %v4522_v40, 5  ;;  %v1153_v23 = vrot.slane %v4522_v40, 2 }
 0x1f7   :  { %v911_v49 = vadd.f32 %v4226_v36, %v910_v26  ;;  %v1481_v30 = vrot.slane %v4522_v40, 6  ;;  %v1235_v31 = vrot.slane %v4522_v40, 3 }
 0x1f8   :  { %vm942_vm8 = vcmp.ge.f32.partialorder %v916_v16, 0.0  ;;  %v958_v21 = vmul.f32 0.2, %v916_v16  ;;  %v1248_v27 = vpop.permute.xlu0 %1247  ;;  %v1400_v18 = vsel %vm68_vm0, %v1397_v37, %v1399_v12  ;;  %v1154_v28 = vsel %vm208_vm1, %v1151_v58, %v1153_v23 }
 0x1f9   :  { %vm941_vm9 = vcmp.ge.f32.partialorder %v911_v49, 0.0  ;;  %v957_v14 = vmul.f32 0.2, %v911_v49  ;;  %v1576_v15 = vsel %vm1575_vm7, %v1559_v0, %v1248_v27  ;;  %v1482_v34 = vsel %vm539_vm5, %v1479_v29, %v1481_v30 }
 0x1fa   :  { %v4546_v62 = vsel %vm942_vm8, %v916_v16, %v958_v21  ;;  %1429 = vrot.lane.b32.xlu0 %v1398_v54, %s3571_s27  ;;  %1183 = vrot.lane.b32.xlu1 %v1152_v60, %s3574_s11  ;;  %v1236_v20 = vsel %vm291_vm3, %v1233_v38, %v1235_v31 }
 0x1fb   :  { %v1017_v7 = vrot.slane %v4546_v62, 5  ;;  %v973_v2 = vsel %vm941_vm9, %v911_v49, %v957_v14 }
 0x1fc   :  { %v1015_v6 = vrot.slane %v973_v2, 5  ;;  %v1330_v4 = vpop.permute.xlu0 %1329 }
 0x1fd   :  { %v1593_v44 = vsel %vm1592_vm10, %v1576_v15, %v1330_v4 }
 0x1fe   :  { %v4561_v41 = vsel %vm68_vm0, %v1013_v50, %v1015_v6  ;;  %v4566_v19 = vsel %vm68_vm0, %v1015_v6, %v1017_v7  ;;  %v1610_v17 = vsel %vm1609_vm11, %v1593_v44, %v1412_v51  ;;  %1511 = vrot.lane.b32.xlu0 %v1480_v11, %s3573_s30  ;;  %1265 = vrot.lane.b32.xlu1 %v1234_v24, %s3575_s16 }
 0x1ff   :  { %v1627_v10 = vsel %vm1626_vm12, %v1610_v17, %v1494_v1  ;;  %v1237_v39 = vrot.slane %v4561_v41, 3  ;;  %v1073_v42 = vrot.slane %v4561_v41, 1  ;;  %v1319_v48 = vrot.slane %v4561_v41, 4 }
 0x200   :  { %3228 = vmatprep.mubr.msk.f32.mxu1 %vm1664_vm13, %v1627_v10  ;;  %v1155_v13 = vrot.slane %v4561_v41, 2  ;;  %v1401_v49 = vrot.slane %v4561_v41, 5  ;;  %v1075_v51 = vrot.slane %v4566_v19, 1  ;;  %v1157_v1 = vrot.slane %v4566_v19, 2 }
 0x201   :  { %v1238_v55 = vsel %vm291_vm3, %v1235_v31, %v1237_v39  ;;  %v1074_v33 = vsel %vm125_vm2, %v1071_v8, %v1073_v42  ;;  %v1320_v14 = vsel %vm374_vm4, %v1317_v9, %v1319_v48  ;;  %v1483_v8 = vrot.slane %v4561_v41, 6 }
 0x202   :  { %1349 = vrot.lane.b32.xlu0 %v1318_v5, %s3576_s25  ;;  %1103 = vrot.lane.b32.xlu1 %v1072_v35, %s3572_s2  ;;  %v1402_v11 = vsel %vm68_vm0, %v1399_v12, %v1401_v49  ;;  %v1076_v24 = vsel %vm125_vm2, %v1073_v42, %v1075_v51  ;;  %v1239_v62 = vrot.slane %v4566_v19, 3 }
 0x203   :  { %v1484_v12 = vsel %vm539_vm5, %v1481_v30, %v1483_v8 }
 0x206   :  { %1431 = vrot.lane.b32.xlu0 %v1400_v18, %s3571_s27  ;;  %1185 = vrot.lane.b32.xlu1 %v1154_v28, %s3574_s11 }
 0x208   :  { %v1086_v32 = vpop.permute.xlu1 %1085  ;;  %v1332_v50 = vpop.permute.xlu0 %1331 }
 0x209   :  { %v1543_v16 = vsel %vm1541_vm15, %v4236_v46, %v1086_v32 }
 0x20a   :  { %1513 = vrot.lane.b32.xlu0 %v1482_v34, %s3573_s30  ;;  %1267 = vrot.lane.b32.xlu1 %v1236_v20, %s3575_s16  ;;  %v1240_v34 = vsel %vm291_vm3, %v1237_v39, %v1239_v62 }
 0x20c   :  { %v1168_v43 = vpop.permute.xlu1 %1167  ;;  %v1414_v47 = vpop.permute.xlu0 %1413 }
 0x20d   :  { %v3199_v56 = vpop.f32.mrb[14].mxu1  ;;  %v1560_v21 = vsel %vm1558_vm6, %v1543_v16, %v1168_v43 }
 0x20e   :  { %1269 = vrot.lane.b32.xlu1 %v1238_v55, %s3575_s16  ;;  %1105 = vrot.lane.b32.xlu0 %v1074_v33, %s3572_s2  ;;  %v926_v37 = vadd.f32 %v3199_v56, %v4226_v36  ;;  %v920_v58 = vpop.f32.mrb[15].mxu1 }
 0x20f   :  { %v921_v26 = vadd.f32 %v4226_v36, %v920_v58  ;;  %v1156_v36 = vsel %vm208_vm1, %v1153_v23, %v1155_v13  ;;  %v1158_v23 = vsel %vm208_vm1, %v1155_v13, %v1157_v1  ;;  %v1403_v13 = vrot.slane %v4566_v19, 5 }
 0x210   :  { %vm944_vm14 = vcmp.ge.f32.partialorder %v926_v37, 0.0  ;;  %v960_v27 = vmul.f32 0.2, %v926_v37  ;;  %v1250_v29 = vpop.permute.xlu1 %1249  ;;  %v1496_v38 = vpop.permute.xlu0 %1495 }
 0x211   :  { %vm943_vm8 = vcmp.ge.f32.partialorder %v921_v26, 0.0  ;;  %v959_v54 = vmul.f32 0.2, %v921_v26  ;;  %v1577_v46 = vsel %vm1575_vm7, %v1560_v21, %v1250_v29 }
 0x212   :  { %v4611_v60 = vsel %vm944_vm14, %v926_v37, %v960_v27  ;;  %v1594_v61 = vsel %vm1592_vm10, %v1577_v46, %v1332_v50  ;;  %1351 = vrot.lane.b32.xlu1 %v1320_v14, %s3576_s25  ;;  %1187 = vrot.lane.b32.xlu0 %v1156_v36, %s3574_s11  ;;  %v1321_v50 = vrot.slane %v4566_v19, 4 }
 0x213   :  { %v1021_v0 = vrot.slane %v4611_v60, 5  ;;  %v975_v2 = vsel %vm943_vm8, %v921_v26, %v959_v54  ;;  %v1611_v6 = vsel %vm1609_vm11, %v1594_v61, %v1414_v47 }
 0x214   :  { %v1019_v15 = vrot.slane %v975_v2, 5  ;;  %v1628_v4 = vsel %vm1626_vm12, %v1611_v6, %v1496_v38  ;;  %v1088_v9 = vpop.permute.xlu1 %1087  ;;  %v1334_v44 = vpop.permute.xlu0 %1333  ;;  %v1322_v39 = vsel %vm374_vm4, %v1319_v48, %v1321_v50  ;;  %v1404_v48 = vsel %vm68_vm0, %v1401_v49, %v1403_v13 }
 0x215   :  { %3229 = vmatmul.mubr.msk.f32.vlgmr.msra.gmra.mrb[16].mxu1 %vm1664_vm13, %v1628_v4  ;;  %v1544_v18 = vsel %vm1541_vm15, %v4316_v52, %v1088_v9 }
 0x216   :  { %v4629_v17 = vsel %vm68_vm0, %v1017_v7, %v1019_v15  ;;  %v4634_v10 = vsel %vm68_vm0, %v1019_v15, %v1021_v0  ;;  %1433 = vrot.lane.b32.xlu1 %v1402_v11, %s3571_s27  ;;  %1107 = vrot.lane.b32.xlu0 %v1076_v24, %s3572_s2 }
 0x217   :  { %v1077_v7 = vrot.slane %v4629_v17, 1  ;;  %v1159_v42 = vrot.slane %v4629_v17, 2  ;;  %v1241_v37 = vrot.slane %v4629_v17, 3  ;;  %v1323_v29 = vrot.slane %v4629_v17, 4 }
 0x218   :  { %v1170_v5 = vpop.permute.xlu1 %1169  ;;  %v1416_v35 = vpop.permute.xlu0 %1415  ;;  %v1079_v49 = vrot.slane %v4634_v10, 1  ;;  %v1405_v61 = vrot.slane %v4629_v17, 5  ;;  %v1161_v4 = vrot.slane %v4634_v10, 2  ;;  %v1487_v24 = vrot.slane %v4629_v17, 6 }
 0x219   :  { %v1561_v28 = vsel %vm1558_vm6, %v1544_v18, %v1170_v5  ;;  %v1078_v20 = vsel %vm125_vm2, %v1075_v51, %v1077_v7  ;;  %v1160_v56 = vsel %vm208_vm1, %v1157_v1, %v1159_v42  ;;  %v1485_v51 = vrot.slane %v4566_v19, 6 }
 0x21a   :  { %1515 = vrot.lane.b32.xlu1 %v1484_v12, %s3573_s30  ;;  %1189 = vrot.lane.b32.xlu0 %v1158_v23, %s3574_s11  ;;  %v1242_v27 = vsel %vm291_vm3, %v1239_v62, %v1241_v37  ;;  %v1324_v36 = vsel %vm374_vm4, %v1321_v50, %v1323_v29  ;;  %v1406_v11 = vsel %vm68_vm0, %v1403_v13, %v1405_v61  ;;  %v1243_v23 = vrot.slane %v4634_v10, 3 }
 0x21b   :  { %v1486_v54 = vsel %vm539_vm5, %v1483_v8, %v1485_v51  ;;  %v4696_v8 = vsel %vm68_vm0, %v1021_v0, 0.0  ;;  %v1488_v12 = vsel %vm539_vm5, %v1485_v51, %v1487_v24 }
 0x21c   :  { %v1252_v31 = vpop.permute.xlu1 %1251  ;;  %v1498_v32 = vpop.permute.xlu0 %1497  ;;  %v1081_v62 = vrot.slane %v4696_v8, 1  ;;  %v1244_v18 = vsel %vm291_vm3, %v1241_v37, %v1243_v23 }
 0x21d   :  { %v1578_v30 = vsel %vm1575_vm7, %v1561_v28, %v1252_v31  ;;  %v1325_v31 = vrot.slane %v4634_v10, 4 }
 0x21e   :  { %v1595_v43 = vsel %vm1592_vm10, %v1578_v30, %v1334_v44  ;;  %1271 = vrot.lane.b32.xlu0 %v1240_v34, %s3575_s16  ;;  %1109 = vrot.lane.b32.xlu1 %v1078_v20, %s3572_s2  ;;  %v1080_v44 = vsel %vm125_vm2, %v1077_v7, %v1079_v49  ;;  %v1163_v7 = vrot.slane %v4696_v8, 2  ;;  %v1082_v28 = vsel %vm125_vm2, %v1079_v49, %v1081_v62 }
 0x21f   :  { %v1612_v52 = vsel %vm1609_vm11, %v1595_v43, %v1416_v35  ;;  %v1162_v35 = vsel %vm208_vm1, %v1159_v42, %v1161_v4  ;;  %v1326_v42 = vsel %vm374_vm4, %v1323_v29, %v1325_v31  ;;  %v1407_v43 = vrot.slane %v4634_v10, 5 }
 0x220   :  { %v1629_v47 = vsel %vm1626_vm12, %v1612_v52, %v1498_v32  ;;  %v1254_v55 = vpop.permute.xlu1 %1253  ;;  %v1090_v33 = vpop.permute.xlu0 %1089  ;;  %v1164_v34 = vsel %vm208_vm1, %v1161_v4, %v1163_v7  ;;  %v1245_v52 = vrot.slane %v4696_v8, 3 }
 0x221   :  { %3231 = vmatprep.mubr.msk.f32.mxu1 %vm1664_vm13, %v1629_v47  ;;  %v1545_v58 = vsel %vm1541_vm15, %v4319_v53, %v1090_v33  ;;  %v1408_v37 = vsel %vm68_vm0, %v1405_v61, %v1407_v43  ;;  %v1491_v61 = vrot.slane %v4696_v8, 6 }
 0x222   :  { %1353 = vrot.lane.b32.xlu0 %v1322_v39, %s3576_s25  ;;  %1191 = vrot.lane.b32.xlu1 %v1160_v56, %s3574_s11  ;;  %v1489_v56 = vrot.slane %v4634_v10, 6 }
 0x224   :  { %v1336_v16 = vpop.permute.xlu1 %1335  ;;  %v1172_v26 = vpop.permute.xlu0 %1171 }
 0x225   :  { %v1562_v21 = vsel %vm1558_vm6, %v1545_v58, %v1172_v26  ;;  %v1246_v58 = vsel %vm291_vm3, %v1243_v23, %v1245_v52 }
 0x226   :  { %v1579_v38 = vsel %vm1575_vm7, %v1562_v21, %v1254_v55  ;;  %1435 = vrot.lane.b32.xlu0 %v1404_v48, %s3571_s27  ;;  %1273 = vrot.lane.b32.xlu1 %v1242_v27, %s3575_s16  ;;  %v1490_v27 = vsel %vm539_vm5, %v1487_v24, %v1489_v56 }
 0x227   :  { %v1596_v46 = vsel %vm1592_vm10, %v1579_v38, %v1336_v16  ;;  %v1327_v16 = vrot.slane %v4696_v8, 4  ;;  %v1409_v38 = vrot.slane %v4696_v8, 5 }
 0x228   :  { %v1418_v53 = vpop.permute.xlu1 %1417  ;;  %v1092_v14 = vpop.permute.xlu0 %1091 }
 0x229   :  { %v1613_v2 = vsel %vm1609_vm11, %v1596_v46, %v1418_v53  ;;  %v1546_v32 = vsel %vm1541_vm15, %v4360_v22, %v1092_v14  ;;  %v1328_v29 = vsel %vm374_vm4, %v1325_v31, %v1327_v16  ;;  %v1410_v49 = vsel %vm68_vm0, %v1407_v43, %v1409_v38 }
 0x22a   :  { %1517 = vrot.lane.b32.xlu0 %v1486_v54, %s3573_s30  ;;  %1355 = vrot.lane.b32.xlu1 %v1324_v36, %s3576_s25 }
 0x22c   :  { %v1500_v6 = vpop.permute.xlu1 %1499  ;;  %v1174_v15 = vpop.permute.xlu0 %1173 }
 0x22d   :  { %v1630_v9 = vsel %vm1626_vm12, %v1613_v2, %v1500_v6  ;;  %v1563_v20 = vsel %vm1558_vm6, %v1546_v32, %v1174_v15  ;;  %v1492_v15 = vsel %vm539_vm5, %v1489_v56, %v1491_v61 }
 0x22e   :  { %1111 = vrot.lane.b32.xlu0 %v1080_v44, %s3572_s2  ;;  %1437 = vrot.lane.b32.xlu1 %v1406_v11, %s3571_s27 }
 0x22f   :  { %3232 = vmatmul.mubr.msk.f32.gmra.mrb[18].mxu1 %vm1664_vm13, %v1630_v9 }
 0x230   :  { %v1094_v1 = vpop.permute.xlu1 %1093  ;;  %v1256_v5 = vpop.permute.xlu0 %1255 }
 0x231   :  { %v1580_v47 = vsel %vm1575_vm7, %v1563_v20, %v1256_v5  ;;  %v1547_v26 = vsel %vm1541_vm15, %v4363_v63, %v1094_v1 }
 0x232   :  { %1193 = vrot.lane.b32.xlu0 %v1162_v35, %s3574_s11  ;;  %1519 = vrot.lane.b32.xlu1 %v1488_v12, %s3573_s30 }
 0x234   :  { %v1176_v60 = vpop.permute.xlu1 %1175  ;;  %v1338_v0 = vpop.permute.xlu0 %1337 }
 0x235   :  { %v1597_v22 = vsel %vm1592_vm10, %v1580_v47, %v1338_v0  ;;  %v1564_v48 = vsel %vm1558_vm6, %v1547_v26, %v1176_v60 }
 0x236   :  { %1275 = vrot.lane.b32.xlu0 %v1244_v18, %s3575_s16  ;;  %1113 = vrot.lane.b32.xlu1 %v1082_v28, %s3572_s2 }
 0x238   :  { %v1258_v50 = vpop.permute.xlu1 %1257  ;;  %v1420_v30 = vpop.permute.xlu0 %1419 }
 0x239   :  { %v1614_v55 = vsel %vm1609_vm11, %v1597_v22, %v1420_v30  ;;  %v1581_v53 = vsel %vm1575_vm7, %v1564_v48, %v1258_v50 }
 0x23a   :  { %1357 = vrot.lane.b32.xlu0 %v1326_v42, %s3576_s25  ;;  %1195 = vrot.lane.b32.xlu1 %v1164_v34, %s3574_s11 }
 0x23c   :  { %v1340_v33 = vpop.permute.xlu1 %1339  ;;  %v1502_v39 = vpop.permute.xlu0 %1501 }
 0x23d   :  { %v1631_v13 = vsel %vm1626_vm12, %v1614_v55, %v1502_v39  ;;  %v1598_v14 = vsel %vm1592_vm10, %v1581_v53, %v1340_v33 }
 0x23e   :  { %1439 = vrot.lane.b32.xlu0 %v1408_v37, %s3571_s27  ;;  %1277 = vrot.lane.b32.xlu1 %v1246_v58, %s3575_s16 }
 0x23f   :  { %3234 = vmatprep.mubr.msk.f32.mxu1 %vm1664_vm13, %v1631_v13 }
 0x240   :  { %v1422_v51 = vpop.permute.xlu1 %1421  ;;  %v1096_v21 = vpop.permute.xlu0 %1095 }
 0x241   :  { %v1615_v63 = vsel %vm1609_vm11, %v1598_v14, %v1422_v51  ;;  %v1548_v44 = vsel %vm1541_vm15, %v4402_v57, %v1096_v21 }
 0x242   :  { %1521 = vrot.lane.b32.xlu0 %v1490_v27, %s3573_s30  ;;  %1359 = vrot.lane.b32.xlu1 %v1328_v29, %s3576_s25 }
 0x244   :  { %v1504_v54 = vpop.permute.xlu1 %1503  ;;  %v1178_v46 = vpop.permute.xlu0 %1177 }
 0x245   :  { %v1632_v36 = vsel %vm1626_vm12, %v1615_v63, %v1504_v54  ;;  %v1565_v1 = vsel %vm1558_vm6, %v1548_v44, %v1178_v46 }
 0x246   :  { %1441 = vrot.lane.b32.xlu1 %v1410_v49, %s3571_s27  ;;  %3235 = vmatmul.mubr.msk.f32.gmra.mrb[20].mxu1 %vm1664_vm13, %v1632_v36 }
 0x248   :  { %v1098_v2 = vpop.permute.xlu1 %1097  ;;  %v1260_v6 = vpop.permute.xlu0 %1259 }
 0x249   :  { %v1582_v8 = vsel %vm1575_vm7, %v1565_v1, %v1260_v6  ;;  %v1549_v60 = vsel %vm1541_vm15, %v4405_v59, %v1098_v2 }
 0x24a   :  { %1523 = vrot.lane.b32.xlu1 %v1492_v15, %s3573_s30 }
 0x24c   :  { %v1180_v4 = vpop.permute.xlu1 %1179  ;;  %v1342_v9 = vpop.permute.xlu0 %1341 }
 0x24d   :  { %v1599_v5 = vsel %vm1592_vm10, %v1582_v8, %v1342_v9  ;;  %v1566_v7 = vsel %vm1558_vm6, %v1549_v60, %v1180_v4 }
 0x250   :  { %v1262_v11 = vpop.permute.xlu1 %1261  ;;  %v1424_v24 = vpop.permute.xlu0 %1423 }
 0x251   :  { %v1616_v35 = vsel %vm1609_vm11, %v1599_v5, %v1424_v24  ;;  %v1583_v18 = vsel %vm1575_vm7, %v1566_v7, %v1262_v11 }
 0x254   :  { %v1344_v12 = vpop.permute.xlu1 %1343  ;;  %v1506_v23 = vpop.permute.xlu0 %1505 }
 0x255   :  { %v1633_v62 = vsel %vm1626_vm12, %v1616_v35, %v1506_v23  ;;  %v1600_v28 = vsel %vm1592_vm10, %v1583_v18, %v1344_v12 }
 0x256   :  { %3237 = vmatprep.mubr.msk.f32.mxu1 %vm1664_vm13, %v1633_v62 }
 0x258   :  { %v1426_v57 = vpop.permute.xlu1 %1425  ;;  %v1100_v0 = vpop.permute.xlu0 %1099 }
 0x259   :  { %v1617_v31 = vsel %vm1609_vm11, %v1600_v28, %v1426_v57  ;;  %v1550_v59 = vsel %vm1541_vm15, %v4475_v45, %v1100_v0 }
 0x25c   :  { %v1508_v32 = vpop.permute.xlu1 %1507  ;;  %v1182_v50 = vpop.permute.xlu0 %1181 }
 0x25d   :  { %v1634_v30 = vsel %vm1626_vm12, %v1617_v31, %v1508_v32  ;;  %v1567_v42 = vsel %vm1558_vm6, %v1550_v59, %v1182_v50 }
 0x25e   :  { %3238 = vmatmul.mubr.msk.f32.gmra.mrb[22].mxu1 %vm1664_vm13, %v1634_v30 }
 0x260   :  { %v1428_v34 = vpop.permute.xlu1 %1427  ;;  %v1264_v20 = vpop.permute.xlu0 %1263 }
 0x261   :  { %v1584_v43 = vsel %vm1575_vm7, %v1567_v42, %v1264_v20 }
 0x264   :  { %v1510_v52 = vpop.permute.xlu1 %1509  ;;  %v1346_v47 = vpop.permute.xlu0 %1345 }
 0x265   :  { %v1601_v22 = vsel %vm1592_vm10, %v1584_v43, %v1346_v47 }
 0x266   :  { %v1618_v55 = vsel %vm1609_vm11, %v1601_v22, %v1428_v34 }
 0x267   :  { %v1635_v33 = vsel %vm1626_vm12, %v1618_v55, %v1510_v52 }
 0x268   :  { %v1102_v39 = vpop.permute.xlu1 %1101  ;;  %3240 = vmatprep.mubr.msk.f32.mxu1 %vm1664_vm13, %v1635_v33  ;;  %v1348_v56 = vpop.permute.xlu0 %1347 }
 0x269   :  { %v1551_v45 = vsel %vm1541_vm15, %v4465_v25, %v1102_v39 }
 0x26c   :  { %v1184_v13 = vpop.permute.xlu1 %1183  ;;  %v1430_v37 = vpop.permute.xlu0 %1429 }
 0x26d   :  { %v1568_v58 = vsel %vm1558_vm6, %v1551_v45, %v1184_v13 }
 0x270   :  { %v1266_v16 = vpop.permute.xlu1 %1265  ;;  %v1512_v26 = vpop.permute.xlu0 %1511 }
 0x271   :  { %v1585_v51 = vsel %vm1575_vm7, %v1568_v58, %v1266_v16 }
 0x272   :  { %v1602_v21 = vsel %vm1592_vm10, %v1585_v51, %v1348_v56 }
 0x273   :  { %v1619_v48 = vsel %vm1609_vm11, %v1602_v21, %v1430_v37 }
 0x274   :  { %v1636_v27 = vsel %vm1626_vm12, %v1619_v48, %v1512_v26  ;;  %v1104_v29 = vpop.permute.xlu1 %1103  ;;  %v1350_v38 = vpop.permute.xlu0 %1349 }
 0x275   :  { %3241 = vmatmul.mubr.msk.f32.gmra.mrb[24].mxu1 %vm1664_vm13, %v1636_v27  ;;  %v1552_v25 = vsel %vm1541_vm15, %v4519_v3, %v1104_v29 }
 0x278   :  { %v1186_v53 = vpop.permute.xlu1 %1185  ;;  %v1432_v14 = vpop.permute.xlu0 %1431 }
 0x279   :  { %v1569_v63 = vsel %vm1558_vm6, %v1552_v25, %v1186_v53 }
 0x27c   :  { %v1268_v54 = vpop.permute.xlu1 %1267  ;;  %v1514_v46 = vpop.permute.xlu0 %1513 }
 0x27d   :  { %v1586_v36 = vsel %vm1575_vm7, %v1569_v63, %v1268_v54 }
 0x27e   :  { %v1603_v49 = vsel %vm1592_vm10, %v1586_v36, %v1350_v38 }
 0x27f   :  { %v1620_v61 = vsel %vm1609_vm11, %v1603_v49, %v1432_v14  ;;  %v2557_v49 = vld [vmem:[%s5600_s6] sm:$0xff] }
 0x280   :  { %v1637_v2 = vsel %vm1626_vm12, %v1620_v61, %v1514_v46  ;;  %v1270_v6 = vpop.permute.xlu1 %1269  ;;  %v1106_v15 = vpop.permute.xlu0 %1105  ;;  %v3577_v61 = vmov 0.0|0.0  }
 0x281   :  { %3243 = vmatprep.mubr.msk.f32.mxu1 %vm1664_vm13, %v1637_v2  ;;  %v1553_v4 = vsel %vm1541_vm15, %v4522_v40, %v1106_v15  ;;  %3336 = vmatprep.subr.bf16.mxu0 %v3577_v61  ;;  %v2560_v15 = vld [vmem:[%s5600_s6 + $0x18] sm:$0xff] }
 0x284   :  { %v1352_v3 = vpop.permute.xlu1 %1351  ;;  %v1188_v9 = vpop.permute.xlu0 %1187 }
 0x285   :  { %v1570_v44 = vsel %vm1558_vm6, %v1553_v4, %v1188_v9  ;;  %v2561_v4 = vld [vmem:[%s5600_s6 + $0x20] sm:$0xff]  ;;  %v2562_v9 = vld [vmem:[%s5600_s6 + $0x28] sm:$0xff] }
 0x286   :  { %v1587_v11 = vsel %vm1575_vm7, %v1570_v44, %v1270_v6  ;;  %v2559_v6 = vld [vmem:[%s5600_s6 + $0x10] sm:$0xff]  ;;  %v3343_v44 = vpack.c.bf16 %v2562_v9, %v2561_v4 }
 0x287   :  { %v1604_v8 = vsel %vm1592_vm10, %v1587_v11, %v1352_v3  ;;  %v3340_v3 = vpack.c.bf16 %v2560_v15, %v2559_v6  ;;  %v4856_v11 = vld [vmem:[%s5599_s5] ss:$0 sm:$0xff]  ;;  %v2582_v6 = vld [vmem:[%s5600_s6 + $0xc8] sm:$0xff] }
 0x288   :  { %v1434_v24 = vpop.permute.xlu1 %1433  ;;  %v1108_v1 = vpop.permute.xlu0 %1107 }
 0x289   :  { %v1621_v5 = vsel %vm1609_vm11, %v1604_v8, %v1434_v24  ;;  %v1554_v0 = vsel %vm1541_vm15, %v4561_v41, %v1108_v1  ;;  %v2563_v1 = vld [vmem:[%s5600_s6 + $0x30] sm:$0xff]  ;;  %v2564_v8 = vld [vmem:[%s5600_s6 + $0x38] sm:$0xff] }
 0x28c   :  { %v1516_v35 = vpop.permute.xlu1 %1515  ;;  %v1190_v12 = vpop.permute.xlu0 %1189 }
 0x28d   :  { %v1638_v23 = vsel %vm1626_vm12, %v1621_v5, %v1516_v35  ;;  %v1571_v28 = vsel %vm1558_vm6, %v1554_v0, %v1190_v12  ;;  %v3346_v12 = vpack.c.bf16 %v2564_v8, %v2563_v1 }
 0x28e   :  { %3244 = vmatmul.mubr.msk.f32.gmra.mrb[26].mxu1 %vm1664_vm13, %v1638_v23 }
 0x290   :  { %v1110_v62 = vpop.permute.xlu1 %1109  ;;  %v1272_v40 = vpop.permute.xlu0 %1271 }
 0x291   :  { %v1588_v31 = vsel %vm1575_vm7, %v1571_v28, %v1272_v40  ;;  %v1555_v59 = vsel %vm1541_vm15, %v4566_v19, %v1110_v62  ;;  %v2565_v62 = vld [vmem:[%s5600_s6 + $0x40] sm:$0xff]  ;;  %v2566_v40 = vld [vmem:[%s5600_s6 + $0x48] sm:$0xff] }
 0x294   :  { %v1192_v60 = vpop.permute.xlu1 %1191  ;;  %v1354_v57 = vpop.permute.xlu0 %1353 }
 0x295   :  { %v1605_v32 = vsel %vm1592_vm10, %v1588_v31, %v1354_v57  ;;  %v1572_v43 = vsel %vm1558_vm6, %v1555_v59, %v1192_v60  ;;  %v3349_v57 = vpack.c.bf16 %v2566_v40, %v2565_v62  ;;  %v2583_v40 = vld [vmem:[%s5600_s6 + $0xd0] sm:$0xff] }
 0x298   :  { %v1274_v7 = vpop.permute.xlu1 %1273  ;;  %v1436_v18 = vpop.permute.xlu0 %1435 }
 0x299   :  { %v1622_v50 = vsel %vm1609_vm11, %v1605_v32, %v1436_v18  ;;  %v1589_v52 = vsel %vm1575_vm7, %v1572_v43, %v1274_v7  ;;  %v2567_v7 = vld [vmem:[%s5600_s6 + $0x50] sm:$0xff]  ;;  %v2568_v18 = vld [vmem:[%s5600_s6 + $0x58] sm:$0xff] }
 0x29c   :  { %v1356_v30 = vpop.permute.xlu1 %1355  ;;  %v1518_v34 = vpop.permute.xlu0 %1517 }
 0x29d   :  { %v1639_v20 = vsel %vm1626_vm12, %v1622_v50, %v1518_v34  ;;  %v1606_v47 = vsel %vm1592_vm10, %v1589_v52, %v1356_v30  ;;  %v3352_v30 = vpack.c.bf16 %v2568_v18, %v2567_v7  ;;  %v2569_v34 = vld [vmem:[%s5600_s6 + $0x60] sm:$0xff] }
 0x29e   :  { %3246 = vmatprep.mubr.msk.f32.mxu1 %vm1664_vm13, %v1639_v20  ;;  %v2570_v20 = vld [vmem:[%s5600_s6 + $0x68] sm:$0xff] }
 0x29f   :  { %v3355_v52 = vpack.c.bf16 %v2570_v20, %v2569_v34 }
 0x2a0   :  { %v1438_v41 = vpop.permute.xlu1 %1437  ;;  %v1112_v42 = vpop.permute.xlu0 %1111 }
 0x2a1   :  { %v1623_v22 = vsel %vm1609_vm11, %v1606_v47, %v1438_v41  ;;  %v1556_v45 = vsel %vm1541_vm15, %v4629_v17, %v1112_v42 }
 0x2a4   :  { %v1520_v55 = vpop.permute.xlu1 %1519  ;;  %v1194_v33 = vpop.permute.xlu0 %1193 }
 0x2a5   :  { %v1640_v39 = vsel %vm1626_vm12, %v1623_v22, %v1520_v55  ;;  %v1573_v26 = vsel %vm1558_vm6, %v1556_v45, %v1194_v33  ;;  %v2571_v33 = vld [vmem:[%s5600_s6 + $0x70] sm:$0xff] }
 0x2a6   :  { %3247 = vmatmul.mubr.msk.f32.gmra.mrb[28].mxu1 %vm1664_vm13, %v1640_v39  ;;  %v2572_v39 = vld [vmem:[%s5600_s6 + $0x78] sm:$0xff] }
 0x2a8   :  { %v1114_v56 = vpop.permute.xlu1 %1113  ;;  %v1276_v13 = vpop.permute.xlu0 %1275 }
 0x2a9   :  { %v1590_v51 = vsel %vm1575_vm7, %v1573_v26, %v1276_v13  ;;  %v1557_v53 = vsel %vm1541_vm15, %v4634_v10, %v1114_v56  ;;  %v2558_v10 = vld [vmem:[%s5600_s6 + $0x8] sm:$0xff]  ;;  %v3358_v56 = vpack.c.bf16 %v2572_v39, %v2571_v33 }
 0x2aa   :  { %v3337_v2 = vpack.c.bf16 %v2558_v10, %v2557_v49 }
 0x2ac   :  { %v1196_v37 = vpop.permute.xlu1 %1195  ;;  %v1358_v19 = vpop.permute.xlu0 %1357  ;;  %3338 = vmatpush1.bf16.msra.mxu0 %v3337_v2  ;;  %v2581_v2 = vld [vmem:[%s5600_s6 + $0xc0] sm:$0xff] }
 0x2ad   :  { %v1607_v21 = vsel %vm1592_vm10, %v1590_v51, %v1358_v19  ;;  %v1574_v14 = vsel %vm1558_vm6, %v1557_v53, %v1196_v37  ;;  %3339 = vmatprep.subr.bf16.mxu0 %v3577_v61  ;;  %v2573_v37 = vld [vmem:[%s5600_s6 + $0x80] sm:$0xff]  ;;  %v2574_v19 = vld [vmem:[%s5600_s6 + $0x88] sm:$0xff]  ;;  %v3373_v8 = vpack.c.bf16 %v2582_v6, %v2581_v2 }
 0x2ae   :  { %v3361_v45 = vpack.c.bf16 %v2574_v19, %v2573_v37 }
 0x2b0   :  { %v1278_v58 = vpop.permute.xlu1 %1277  ;;  %v1440_v16 = vpop.permute.xlu0 %1439  ;;  %3341 = vmatpush1.bf16.msra.mxu0 %v3340_v3 }
 0x2b1   :  { %v1624_v48 = vsel %vm1609_vm11, %v1607_v21, %v1440_v16  ;;  %v1591_v25 = vsel %vm1575_vm7, %v1574_v14, %v1278_v58  ;;  %3342 = vmatprep.subr.bf16.mxu0 %v3577_v61  ;;  %v2575_v58 = vld [vmem:[%s5600_s6 + $0x90] sm:$0xff]  ;;  %v2576_v16 = vld [vmem:[%s5600_s6 + $0x98] sm:$0xff]  ;;  %v2577_v21 = vld [vmem:[%s5600_s6 + $0xa0] sm:$0xff] }
 0x2b2   :  { %v3364_v26 = vpack.c.bf16 %v2576_v16, %v2575_v58  ;;  %v2580_v14 = vld [vmem:[%s5600_s6 + $0xb8] sm:$0xff] }
 0x2b4   :  { %v1360_v27 = vpop.permute.xlu1 %1359  ;;  %v1522_v29 = vpop.permute.xlu0 %1521  ;;  %3344 = vmatpush1.bf16.msra.mxu0 %v3343_v44 }
 0x2b5   :  { %v1641_v38 = vsel %vm1626_vm12, %v1624_v48, %v1522_v29  ;;  %v1608_v63 = vsel %vm1592_vm10, %v1591_v25, %v1360_v27  ;;  %3345 = vmatprep.subr.bf16.mxu0 %v3577_v61  ;;  %v2578_v48 = vld [vmem:[%s5600_s6 + $0xa8] sm:$0xff] }
 0x2b6   :  { %3249 = vmatprep.mubr.msk.f32.mxu1 %vm1664_vm13, %v1641_v38  ;;  %v3367_v38 = vpack.c.bf16 %v2578_v48, %v2577_v21 }
 0x2b8   :  { %v1442_v17 = vpop.permute.xlu1 %1441  ;;  %3347 = vmatpush1.bf16.msra.mxu0 %v3346_v12 }
 0x2b9   :  { %v1625_v54 = vsel %vm1609_vm11, %v1608_v63, %v1442_v17  ;;  %3348 = vmatprep.subr.bf16.mxu0 %v3577_v61  ;;  %v2579_v17 = vld [vmem:[%s5600_s6 + $0xb0] sm:$0xff] }
 0x2bc   :  { %v1524_v46 = vpop.permute.xlu1 %1523  ;;  %3350 = vmatpush1.bf16.msra.mxu0 %v3349_v57 }
 0x2bd   :  { %v1642_v36 = vsel %vm1626_vm12, %v1625_v54, %v1524_v46  ;;  %3351 = vmatprep.subr.bf16.mxu0 %v3577_v61  ;;  %v3370_v46 = vpack.c.bf16 %v2580_v14, %v2579_v17 }
 0x2be   :  { %3250 = vmatmul.mubr.msk.f32.gmra.mrb[30].mxu1 %vm1664_vm13, %v1642_v36 }
 0x2c0   :  { %3353 = vmatpush1.bf16.msra.mxu0 %v3352_v30 }
 0x2c1   :  { %3354 = vmatprep.subr.bf16.mxu0 %v3577_v61 }
 0x2c4   :  { %3356 = vmatpush1.bf16.msra.mxu0 %v3355_v52 }
 0x2c5   :  { %3357 = vmatprep.subr.bf16.mxu0 %v3577_v61 }
 0x2c8   :  { %3359 = vmatpush1.bf16.msra.mxu0 %v3358_v56 }
 0x2c9   :  { %3360 = vmatprep.subr.bf16.mxu0 %v3577_v61 }
 0x2cc   :  { %3362 = vmatpush1.bf16.msra.mxu0 %v3361_v45 }
 0x2cd   :  { %3363 = vmatprep.subr.bf16.mxu0 %v3577_v61 }
 0x2d0   :  { %3365 = vmatpush1.bf16.msra.mxu0 %v3364_v26 }
 0x2d1   :  { %3366 = vmatprep.subr.bf16.mxu0 %v3577_v61 }
 0x2d4   :  { %3368 = vmatpush1.bf16.msra.mxu0 %v3367_v38 }
 0x2d5   :  { %3369 = vmatprep.subr.bf16.mxu0 %v3577_v61 }
 0x2d8   :  { %3371 = vmatpush1.bf16.msra.mxu0 %v3370_v46 }
 0x2d9   :  { %3372 = vmatprep.subr.bf16.mxu0 %v3577_v61 }
 0x2dc   :  { %3374 = vmatpush1.bf16.msra.mxu0 %v3373_v8 }
 0x2dd   :  { %3375 = vmatprep.subr.bf16.mxu0 %v3577_v61 }
 0x2e8   :  { %v3230_v24 = vpop.f32.mrb[16].mxu1 }
 0x2e9   :  { %v1785_v5 = vadd.f32 %v3230_v24, %v4856_v11  ;;  %v1779_v35 = vpop.f32.mrb[17].mxu1 }
 0x2ea   :  { %v1780_v23 = vadd.f32 %v4856_v11, %v1779_v35 }
 0x2eb   :  { %vm1859_vm15 = vcmp.ge.f32.partialorder %v1785_v5, 0.0  ;;  %v1875_v60 = vmul.f32 0.2, %v1785_v5 }
 0x2ec   :  { %vm1858_vm7 = vcmp.ge.f32.partialorder %v1780_v23, 0.0  ;;  %v1874_v0 = vmul.f32 0.2, %v1780_v23 }
 0x2ed   :  { %v4879_v28 = vsel %vm1859_vm15, %v1785_v5, %v1875_v60  ;;  %v2584_v60 = vld [vmem:[%s5600_s6 + $0xd8] sm:$0xff] }
 0x2ee   :  { %v1962_v31 = vrot.slane %v4879_v28, 5  ;;  %v1890_v32 = vsel %vm1858_vm7, %v1780_v23, %v1874_v0  ;;  %v3376_v18 = vpack.c.bf16 %v2584_v60, %v2583_v40 }
 0x2ef   :  { %v1961_v50 = vrot.slane %v1890_v32, 5 }
 0x2f0   :  { %3377 = vmatpush1.bf16.msra.mxu0 %v3376_v18 }
 0x2f1   :  { %v4892_v59 = vsel %vm68_vm0, %v1961_v50, %v1962_v31  ;;  %v4895_v41 = vsel %vm68_vm0, 0.0, %v1961_v50 }
 0x2f2   :  { %v2313_v42 = vrot.slane %v4895_v41, 5  ;;  %v2314_v43 = vrot.slane %v4892_v59, 5  ;;  %v2395_v22 = vrot.slane %v4895_v41, 6  ;;  %v2396_v55 = vrot.slane %v4892_v59, 6 }
 0x2f3   :  { %v2017_v15 = vrot.slane %v4895_v41, 1  ;;  %v2018_v4 = vrot.slane %v4892_v59, 1  ;;  %v2099_v5 = vrot.slane %v4895_v41, 2  ;;  %v2100_v62 = vrot.slane %v4892_v59, 2 }
 0x2f4   :  { %v2315_v47 = vsel %vm68_vm0, %v2313_v42, %v2314_v43  ;;  %v2397_v13 = vsel %vm539_vm5, %v2395_v22, %v2396_v55  ;;  %v2182_v32 = vrot.slane %v4892_v59, 3 }
 0x2f5   :  { %2347 = vrot.lane.b32.xlu1 %v2315_v47, %s3574_s11  ;;  %v2019_v12 = vsel %vm125_vm2, %v2017_v15, %v2018_v4  ;;  %v2101_v28 = vsel %vm208_vm1, %v2099_v5, %v2100_v62 }
 0x2f9   :  { %2429 = vrot.lane.b32.xlu1 %v2397_v13, %s3576_s25 }
 0x302   :  { %v3233_v51 = vpop.f32.mrb[18].mxu1 }
 0x303   :  { %v1795_v27 = vadd.f32 %v3233_v51, %v4856_v11  ;;  %v1789_v29 = vpop.f32.mrb[19].mxu1 }
 0x304   :  { %v1790_v53 = vadd.f32 %v4856_v11, %v1789_v29 }
 0x305   :  { %vm1861_vm9 = vcmp.ge.f32.partialorder %v1795_v27, 0.0  ;;  %v1877_v25 = vmul.f32 0.2, %v1795_v27 }
 0x306   :  { %vm1860_vm11 = vcmp.ge.f32.partialorder %v1790_v53, 0.0  ;;  %v1876_v63 = vmul.f32 0.2, %v1790_v53 }
 0x307   :  { %v4944_v54 = vsel %vm1861_vm9, %v1795_v27, %v1877_v25 }
 0x308   :  { %v1966_v36 = vrot.slane %v4944_v54, 5  ;;  %v1892_v49 = vsel %vm1860_vm11, %v1790_v53, %v1876_v63 }
 0x309   :  { %v1964_v10 = vrot.slane %v1892_v49, 5 }
 0x30b   :  { %v4959_v3 = vsel %vm68_vm0, %v1962_v31, %v1964_v10  ;;  %v4962_v9 = vsel %vm68_vm0, %v1964_v10, %v1966_v36  ;;  %v2181_v31 = vrot.slane %v4895_v41, 3 }
 0x30c   :  { %v2316_v44 = vrot.slane %v4959_v3, 5  ;;  %v2020_v24 = vrot.slane %v4959_v3, 1  ;;  %v2102_v1 = vrot.slane %v4959_v3, 2  ;;  %v2184_v7 = vrot.slane %v4959_v3, 3 }
 0x30d   :  { %v2183_v34 = vsel %vm291_vm3, %v2181_v31, %v2182_v32  ;;  %v2398_v42 = vrot.slane %v4959_v3, 6  ;;  %v2318_v39 = vrot.slane %v4962_v9, 5  ;;  %v2400_v16 = vrot.slane %v4962_v9, 6 }
 0x30e   :  { %v2317_v35 = vsel %vm68_vm0, %v2314_v43, %v2316_v44  ;;  %v2021_v23 = vsel %vm125_vm2, %v2018_v4, %v2020_v24  ;;  %v2103_v0 = vsel %vm208_vm1, %v2100_v62, %v2102_v1  ;;  %v2185_v30 = vsel %vm291_vm3, %v2182_v32, %v2184_v7 }
 0x30f   :  { %2349 = vrot.lane.b32.xlu1 %v2317_v35, %s3574_s11  ;;  %v3426_v57 = vpack.i.bf16 %v2021_v23, %v2019_v12  ;;  %v3431_v50 = vpack.i.bf16 %v2103_v0, %v2101_v28  ;;  %v3436_v20 = vpack.i.bf16 %v2185_v30, %v2183_v34  ;;  %v2399_v33 = vsel %vm539_vm5, %v2396_v55, %v2398_v42 }
 0x310   :  { %v2319_v58 = vsel %vm68_vm0, %v2316_v44, %v2318_v39  ;;  %v2022_v26 = vrot.slane %v4962_v9, 1  ;;  %v2401_v27 = vsel %vm539_vm5, %v2398_v42, %v2400_v16  ;;  %v2104_v17 = vrot.slane %v4962_v9, 2 }
 0x311   :  { %3427 = vrot.lane.b32.xlu0 %v3426_v57, %s3574_s11 }
 0x312   :  { %v2023_v38 = vsel %vm125_vm2, %v2020_v24, %v2022_v26  ;;  %v2105_v46 = vsel %vm208_vm1, %v2102_v1, %v2104_v17 }
 0x315   :  { %3432 = vrot.lane.b32.xlu0 %v3431_v50, %s3576_s25 }
 0x319   :  { %3437 = vrot.lane.b32.xlu0 %v3436_v20, %s3573_s30  ;;  %v3236_v61 = vpop.f32.mrb[20].mxu1 }
 0x31a   :  { %v1805_v43 = vadd.f32 %v3236_v61, %v4856_v11  ;;  %v1799_v52 = vpop.f32.mrb[21].mxu1 }
 0x31b   :  { %v1800_v47 = vadd.f32 %v4856_v11, %v1799_v52 }
 0x31c   :  { %vm1863_vm13 = vcmp.ge.f32.partialorder %v1805_v43, 0.0  ;;  %v1879_v22 = vmul.f32 0.2, %v1805_v43 }
 0x31d   :  { %vm1862_vm14 = vcmp.ge.f32.partialorder %v1800_v47, 0.0  ;;  %v1878_v56 = vmul.f32 0.2, %v1800_v47  ;;  %2431 = vrot.lane.b32.xlu0 %v2399_v33, %s3576_s25 }
 0x31e   :  { %v1895_v13 = vsel %vm1863_vm13, %v1805_v43, %v1879_v22 }
 0x31f   :  { %v1970_v37 = vrot.slane %v1895_v13, 5  ;;  %v1894_v19 = vsel %vm1862_vm14, %v1800_v47, %v1878_v56 }
 0x320   :  { %v1968_v45 = vrot.slane %v1894_v19, 5 }
 0x321   :  { %2351 = vrot.lane.b32.xlu0 %v2319_v58, %s3574_s11 }
 0x322   :  { %v5006_v55 = vsel %vm68_vm0, %v1966_v36, %v1968_v45  ;;  %v5009_v51 = vsel %vm68_vm0, %v1968_v45, %v1970_v37  ;;  %v2186_v36 = vrot.slane %v4962_v9, 3 }
 0x323   :  { %v2024_v21 = vrot.slane %v5006_v55, 1  ;;  %v2106_v48 = vrot.slane %v5006_v55, 2  ;;  %v2320_v29 = vrot.slane %v5006_v55, 5  ;;  %v2188_v63 = vrot.slane %v5006_v55, 3 }
 0x324   :  { %v2187_v2 = vsel %vm291_vm3, %v2184_v7, %v2186_v36  ;;  %v2402_v15 = vrot.slane %v5006_v55, 6  ;;  %v2322_v5 = vrot.slane %v5009_v51, 5  ;;  %v2404_v62 = vrot.slane %v5009_v51, 6 }
 0x325   :  { %2433 = vrot.lane.b32.xlu0 %v2401_v27, %s3576_s25  ;;  %v2025_v53 = vsel %vm125_vm2, %v2022_v26, %v2024_v21  ;;  %v2107_v25 = vsel %vm208_vm1, %v2104_v17, %v2106_v48  ;;  %v2321_v54 = vsel %vm68_vm0, %v2318_v39, %v2320_v29  ;;  %v2189_v10 = vsel %vm291_vm3, %v2186_v36, %v2188_v63 }
 0x326   :  { %v3441_v14 = vpack.i.bf16 %v2025_v53, %v2023_v38  ;;  %v3446_v49 = vpack.i.bf16 %v2107_v25, %v2105_v46  ;;  %v3451_v6 = vpack.i.bf16 %v2189_v10, %v2187_v2  ;;  %v2403_v8 = vsel %vm539_vm5, %v2400_v16, %v2402_v15 }
 0x327   :  { %v2323_v57 = vsel %vm68_vm0, %v2320_v29, %v2322_v5  ;;  %v2026_v18 = vrot.slane %v5009_v51, 1  ;;  %v2405_v32 = vsel %vm539_vm5, %v2402_v15, %v2404_v62  ;;  %v2108_v52 = vrot.slane %v5009_v51, 2 }
 0x328   :  { %3442 = vrot.lane.b32.xlu1 %v3441_v14, %s3574_s11  ;;  %v2190_v58 = vrot.slane %v5009_v51, 3 }
 0x329   :  { %2353 = vrot.lane.b32.xlu0 %v2321_v54, %s3574_s11  ;;  %v2027_v61 = vsel %vm125_vm2, %v2024_v21, %v2026_v18  ;;  %v2109_v45 = vsel %vm208_vm1, %v2106_v48, %v2108_v52 }
 0x32a   :  { %v2191_v48 = vsel %vm291_vm3, %v2188_v63, %v2190_v58 }
 0x32c   :  { %3447 = vrot.lane.b32.xlu1 %v3446_v49, %s3576_s25 }
 0x330   :  { %3452 = vrot.lane.b32.xlu1 %v3451_v6, %s3573_s30 }
 0x331   :  { %v3239_v4 = vpop.f32.mrb[22].mxu1 }
 0x332   :  { %v1815_v44 = vadd.f32 %v3239_v4, %v4856_v11  ;;  %v1809_v24 = vpop.f32.mrb[23].mxu1 }
 0x333   :  { %v1810_v1 = vadd.f32 %v4856_v11, %v1809_v24 }
 0x334   :  { %vm1865_vm8 = vcmp.ge.f32.partialorder %v1815_v44, 0.0  ;;  %v1881_v35 = vmul.f32 0.2, %v1815_v44  ;;  %2435 = vrot.lane.b32.xlu1 %v2403_v8, %s3576_s25 }
 0x335   :  { %vm1864_vm15 = vcmp.ge.f32.partialorder %v1810_v1, 0.0  ;;  %v1880_v12 = vmul.f32 0.2, %v1810_v1 }
 0x336   :  { %v1897_v23 = vsel %vm1865_vm8, %v1815_v44, %v1881_v35 }
 0x337   :  { %v1974_v40 = vrot.slane %v1897_v23, 5  ;;  %v1896_v60 = vsel %vm1864_vm15, %v1810_v1, %v1880_v12 }
 0x338   :  { %v1972_v0 = vrot.slane %v1896_v60, 5  ;;  %2355 = vrot.lane.b32.xlu1 %v2323_v57, %s3574_s11 }
 0x339   :  { %v5046_v7 = vsel %vm68_vm0, %v1974_v40, 0.0 }
 0x33a   :  { %v5050_v28 = vsel %vm68_vm0, %v1970_v37, %v1972_v0  ;;  %v5053_v31 = vsel %vm68_vm0, %v1972_v0, %v1974_v40  ;;  %v2032_v50 = vrot.slane %v5046_v7, 1  ;;  %v2114_v33 = vrot.slane %v5046_v7, 2 }
 0x33b   :  { %v2324_v30 = vrot.slane %v5050_v28, 5  ;;  %v2028_v34 = vrot.slane %v5050_v28, 1  ;;  %v2030_v20 = vrot.slane %v5053_v31, 1  ;;  %v2110_v42 = vrot.slane %v5050_v28, 2 }
 0x33c   :  { %2437 = vrot.lane.b32.xlu1 %v2405_v32, %s3576_s25  ;;  %v2112_v22 = vrot.slane %v5053_v31, 2  ;;  %v2192_v39 = vrot.slane %v5050_v28, 3  ;;  %v2194_v21 = vrot.slane %v5053_v31, 3  ;;  %v2196_v53 = vrot.slane %v5046_v7, 3 }
 0x33d   :  { %v2029_v43 = vsel %vm125_vm2, %v2026_v18, %v2028_v34  ;;  %v2325_v56 = vsel %vm68_vm0, %v2322_v5, %v2324_v30  ;;  %v2031_v13 = vsel %vm125_vm2, %v2028_v34, %v2030_v20  ;;  %v2033_v37 = vsel %vm125_vm2, %v2030_v20, %v2032_v50 }
 0x33e   :  { %v3456_v47 = vpack.i.bf16 %v2029_v43, %v2027_v61  ;;  %v2111_v19 = vsel %vm208_vm1, %v2108_v52, %v2110_v42  ;;  %v3471_v16 = vpack.i.bf16 %v2033_v37, %v2031_v13  ;;  %v2113_v27 = vsel %vm208_vm1, %v2110_v42, %v2112_v22 }
 0x33f   :  { %v3461_v26 = vpack.i.bf16 %v2111_v19, %v2109_v45  ;;  %v2115_v29 = vsel %vm208_vm1, %v2112_v22, %v2114_v33  ;;  %v2193_v38 = vsel %vm291_vm3, %v2190_v58, %v2192_v39  ;;  %v2195_v25 = vsel %vm291_vm3, %v2192_v39, %v2194_v21 }
 0x340   :  { %2357 = vrot.lane.b32.xlu1 %v2325_v56, %s3574_s11  ;;  %3457 = vrot.lane.b32.xlu0 %v3456_v47, %s3574_s11  ;;  %v3476_v17 = vpack.i.bf16 %v2115_v29, %v2113_v27  ;;  %v3466_v14 = vpack.i.bf16 %v2193_v38, %v2191_v48  ;;  %v2197_v54 = vsel %vm291_vm3, %v2194_v21, %v2196_v53  ;;  %v2406_v46 = vrot.slane %v5050_v28, 6 }
 0x341   :  { %v3481_v6 = vpack.i.bf16 %v2197_v54, %v2195_v25  ;;  %v2408_v63 = vrot.slane %v5053_v31, 6  ;;  %v2410_v15 = vrot.slane %v5046_v7, 6  ;;  %v2326_v24 = vrot.slane %v5053_v31, 5 }
 0x342   :  { %v2407_v44 = vsel %vm539_vm5, %v2404_v62, %v2406_v46  ;;  %v2328_v32 = vrot.slane %v5046_v7, 5  ;;  %v2263_v56 = vrot.slane %v4895_v41, 4  ;;  %v2264_v13 = vrot.slane %v4892_v59, 4 }
 0x343   :  { %v2411_v23 = vsel %vm539_vm5, %v2408_v63, %v2410_v15  ;;  %v2327_v40 = vsel %vm68_vm0, %v2324_v30, %v2326_v24  ;;  %v2409_v18 = vsel %vm539_vm5, %v2406_v46, %v2408_v63 }
 0x344   :  { %3472 = vrot.lane.b32.xlu1 %v3471_v16, %s3574_s11  ;;  %3462 = vrot.lane.b32.xlu0 %v3461_v26, %s3576_s25  ;;  %v2329_v20 = vsel %vm68_vm0, %v2326_v24, %v2328_v32  ;;  %v2265_v29 = vsel %vm374_vm4, %v2263_v56, %v2264_v13 }
 0x348   :  { %3477 = vrot.lane.b32.xlu1 %v3476_v17, %s3576_s25  ;;  %3467 = vrot.lane.b32.xlu0 %v3466_v14, %s3573_s30  ;;  %v3242_v36 = vpop.f32.mrb[24].mxu1 }
 0x349   :  { %v1825_v49 = vadd.f32 %v3242_v36, %v4856_v11  ;;  %v1819_v10 = vpop.f32.mrb[25].mxu1 }
 0x34a   :  { %v1820_v2 = vadd.f32 %v4856_v11, %v1819_v10 }
 0x34b   :  { %vm1867_vm7 = vcmp.ge.f32.partialorder %v1825_v49, 0.0  ;;  %v1883_v4 = vmul.f32 0.2, %v1825_v49 }
 0x34c   :  { %vm1866_vm9 = vcmp.ge.f32.partialorder %v1820_v2, 0.0  ;;  %v1882_v1 = vmul.f32 0.2, %v1820_v2  ;;  %3482 = vrot.lane.b32.xlu1 %v3481_v6, %s3573_s30  ;;  %2439 = vrot.lane.b32.xlu0 %v2407_v44, %s3576_s25 }
 0x34d   :  { %v1899_v8 = vsel %vm1867_vm7, %v1825_v49, %v1883_v4 }
 0x34e   :  { %v1977_v5 = vrot.slane %v1899_v8, 5  ;;  %v1898_v35 = vsel %vm1866_vm9, %v1820_v2, %v1882_v1 }
 0x34f   :  { %v1976_v12 = vrot.slane %v1898_v35, 5 }
 0x350   :  { %2443 = vrot.lane.b32.xlu1 %v2411_v23, %s3576_s25  ;;  %2359 = vrot.lane.b32.xlu0 %v2327_v40, %s3574_s11 }
 0x351   :  { %v5106_v62 = vsel %vm68_vm0, %v1976_v12, %v1977_v5  ;;  %v5109_v60 = vsel %vm68_vm0, 0.0, %v1976_v12 }
 0x352   :  { %v2330_v57 = vrot.slane %v5109_v60, 5  ;;  %v2331_v0 = vrot.slane %v5106_v62, 5  ;;  %v2412_v30 = vrot.slane %v5109_v60, 6  ;;  %v2413_v34 = vrot.slane %v5106_v62, 6 }
 0x353   :  { %v2034_v16 = vrot.slane %v5109_v60, 1  ;;  %v2035_v26 = vrot.slane %v5106_v62, 1  ;;  %v2116_v54 = vrot.slane %v5109_v60, 2  ;;  %v2117_v10 = vrot.slane %v5106_v62, 2 }
 0x354   :  { %2441 = vrot.lane.b32.xlu0 %v2409_v18, %s3576_s25  ;;  %v2332_v50 = vsel %vm68_vm0, %v2330_v57, %v2331_v0  ;;  %v2414_v42 = vsel %vm539_vm5, %v2412_v30, %v2413_v34  ;;  %v2198_v4 = vrot.slane %v5109_v60, 3  ;;  %v2199_v44 = vrot.slane %v5106_v62, 3 }
 0x355   :  { %2363 = vrot.lane.b32.xlu1 %v2332_v50, %s3574_s11  ;;  %v2036_v36 = vsel %vm125_vm2, %v2034_v16, %v2035_v26  ;;  %v2118_v15 = vsel %vm208_vm1, %v2116_v54, %v2117_v10 }
 0x356   :  { %v2200_v8 = vsel %vm291_vm3, %v2198_v4, %v2199_v44 }
 0x358   :  { %2361 = vrot.lane.b32.xlu0 %v2329_v20, %s3574_s11 }
 0x359   :  { %2445 = vrot.lane.b32.xlu1 %v2414_v42, %s3576_s25 }
 0x361   :  { %v3245_v61 = vpop.f32.mrb[26].mxu1 }
 0x362   :  { %v1835_v43 = vadd.f32 %v3245_v61, %v4856_v11  ;;  %v1829_v52 = vpop.f32.mrb[27].mxu1 }
 0x363   :  { %v1830_v47 = vadd.f32 %v4856_v11, %v1829_v52 }
 0x364   :  { %vm1869_vm11 = vcmp.ge.f32.partialorder %v1835_v43, 0.0  ;;  %v1885_v22 = vmul.f32 0.2, %v1835_v43 }
 0x365   :  { %vm1868_vm13 = vcmp.ge.f32.partialorder %v1830_v47, 0.0  ;;  %v1884_v33 = vmul.f32 0.2, %v1830_v47 }
 0x366   :  { %v1901_v39 = vsel %vm1869_vm11, %v1835_v43, %v1885_v22 }
 0x367   :  { %v1981_v37 = vrot.slane %v1901_v39, 5  ;;  %v1900_v19 = vsel %vm1868_vm13, %v1830_v47, %v1884_v33  ;;  %v2348_v45 = vpop.permute.xlu1 %2347 }
 0x368   :  { %v1979_v58 = vrot.slane %v1900_v19, 5  ;;  %v2525_v38 = vsel %vm1558_vm6, %v2265_v29, %v2348_v45 }
 0x36a   :  { %v5131_v21 = vsel %vm68_vm0, %v1977_v5, %v1979_v58  ;;  %v5134_v27 = vsel %vm68_vm0, %v1979_v58, %v1981_v37 }
 0x36b   :  { %v2430_v53 = vpop.permute.xlu1 %2429  ;;  %v2333_v48 = vrot.slane %v5131_v21, 5  ;;  %v2037_v17 = vrot.slane %v5131_v21, 1  ;;  %v2119_v14 = vrot.slane %v5131_v21, 2  ;;  %v2201_v63 = vrot.slane %v5131_v21, 3 }
 0x36c   :  { %v2541_v25 = vsel %vm1592_vm10, %v2525_v38, %v2430_v53  ;;  %v2415_v35 = vrot.slane %v5131_v21, 6  ;;  %v2335_v18 = vrot.slane %v5134_v27, 5  ;;  %v2417_v43 = vrot.slane %v5134_v27, 6 }
 0x36d   :  { %3078 = vmatprep.mubr.msk.f32.mxu0 %vm1626_vm12, %v2541_v25  ;;  %v2334_v46 = vsel %vm68_vm0, %v2331_v0, %v2333_v48  ;;  %v2038_v49 = vsel %vm125_vm2, %v2035_v26, %v2037_v17  ;;  %v2120_v6 = vsel %vm208_vm1, %v2117_v10, %v2119_v14  ;;  %v2202_v1 = vsel %vm291_vm3, %v2199_v44, %v2201_v63 }
 0x36e   :  { %2365 = vrot.lane.b32.xlu1 %v2334_v46, %s3574_s11  ;;  %v3486_v2 = vpack.i.bf16 %v2038_v49, %v2036_v36  ;;  %v3491_v24 = vpack.i.bf16 %v2120_v6, %v2118_v15  ;;  %v3496_v5 = vpack.i.bf16 %v2202_v1, %v2200_v8  ;;  %v2416_v0 = vsel %vm539_vm5, %v2413_v34, %v2415_v35 }
 0x36f   :  { %v2336_v61 = vsel %vm68_vm0, %v2333_v48, %v2335_v18  ;;  %v2039_v34 = vrot.slane %v5134_v27, 1  ;;  %v2418_v39 = vsel %vm539_vm5, %v2415_v35, %v2417_v43  ;;  %v2121_v16 = vrot.slane %v5134_v27, 2 }
 0x370   :  { %3487 = vrot.lane.b32.xlu0 %v3486_v2, %s3574_s11  ;;  %v2203_v46 = vrot.slane %v5134_v27, 3  ;;  %v2266_v36 = vrot.slane %v4959_v3, 4 }
 0x371   :  { %v2040_v58 = vsel %vm125_vm2, %v2037_v17, %v2039_v34  ;;  %v2122_v54 = vsel %vm208_vm1, %v2119_v14, %v2121_v16 }
 0x372   :  { %v2204_v1 = vsel %vm291_vm3, %v2201_v63, %v2203_v46  ;;  %v2267_v8 = vsel %vm374_vm4, %v2264_v13, %v2266_v36 }
 0x374   :  { %3492 = vrot.lane.b32.xlu0 %v3491_v24, %s3576_s25 }
 0x378   :  { %3497 = vrot.lane.b32.xlu0 %v3496_v5, %s3573_s30 }
 0x379   :  { %v3248_v12 = vpop.f32.mrb[28].mxu1 }
 0x37a   :  { %v1845_v23 = vadd.f32 %v3248_v12, %v4856_v11  ;;  %v1839_v40 = vpop.f32.mrb[29].mxu1 }
 0x37b   :  { %v1840_v57 = vadd.f32 %v4856_v11, %v1839_v40 }
 0x37c   :  { %vm1871_vm14 = vcmp.ge.f32.partialorder %v1845_v23, 0.0  ;;  %v1887_v32 = vmul.f32 0.2, %v1845_v23  ;;  %2447 = vrot.lane.b32.xlu0 %v2416_v0, %s3576_s25 }
 0x37d   :  { %vm1870_vm8 = vcmp.ge.f32.partialorder %v1840_v57, 0.0  ;;  %v1886_v50 = vmul.f32 0.2, %v1840_v57 }
 0x37e   :  { %v5171_v30 = vsel %vm1871_vm14, %v1845_v23, %v1887_v32 }
 0x37f   :  { %v1985_v20 = vrot.slane %v5171_v30, 5  ;;  %v1902_v42 = vsel %vm1870_vm8, %v1840_v57, %v1886_v50  ;;  %v2268_v50 = vrot.slane %v4962_v9, 4 }
 0x380   :  { %v1983_v52 = vrot.slane %v1902_v42, 5  ;;  %2367 = vrot.lane.b32.xlu0 %v2336_v61, %s3574_s11 }
 0x381   :  { %v2350_v6 = vpop.permute.xlu1 %2349 }
 0x382   :  { %v5179_v47 = vsel %vm68_vm0, %v1981_v37, %v1983_v52  ;;  %v5184_v22 = vsel %vm68_vm0, %v1983_v52, %v1985_v20  ;;  %v2526_v23 = vsel %vm1558_vm6, %v2267_v8, %v2350_v6 }
 0x383   :  { %v3428_v33 = vpop.permute.xlu0 %3427  ;;  %v2337_v56 = vrot.slane %v5179_v47, 5  ;;  %v2041_v19 = vrot.slane %v5179_v47, 1  ;;  %v2123_v45 = vrot.slane %v5179_v47, 2  ;;  %v2205_v48 = vrot.slane %v5179_v47, 3 }
 0x384   :  { %2449 = vrot.lane.b32.xlu0 %v2418_v39, %s3576_s25  ;;  %v3429_v25 = vunpack.i.l.bf16 %v3428_v33  ;;  %v3430_v15 = vunpack.i.h.bf16 %v3428_v33  ;;  %v2339_v61 = vrot.slane %v5184_v22, 5 }
 0x385   :  { %v2042_v37 = vsel %vm125_vm2, %v2039_v34, %v2041_v19  ;;  %v2338_v38 = vsel %vm68_vm0, %v2335_v18, %v2337_v56  ;;  %v2124_v53 = vsel %vm208_vm1, %v2121_v16, %v2123_v45  ;;  %v2206_v2 = vsel %vm291_vm3, %v2203_v46, %v2205_v48 }
 0x386   :  { %v3501_v26 = vpack.i.bf16 %v2042_v37, %v2040_v58  ;;  %v3506_v49 = vpack.i.bf16 %v2124_v53, %v2122_v54  ;;  %v2477_v44 = vsel %vm1558_vm6, %v4895_v41, %v3429_v25  ;;  %v3511_v12 = vpack.i.bf16 %v2206_v2, %v2204_v1 }
 0x387   :  { %v3433_v29 = vpop.permute.xlu0 %3432  ;;  %v2419_v41 = vrot.slane %v5179_v47, 6  ;;  %v2478_v63 = vsel %vm1558_vm6, %v4892_v59, %v3430_v15  ;;  %v2269_v37 = vsel %vm374_vm4, %v2266_v36, %v2268_v50  ;;  %v2340_v16 = vsel %vm68_vm0, %v2337_v56, %v2339_v61 }
 0x388   :  { %2369 = vrot.lane.b32.xlu0 %v2338_v38, %s3574_s11  ;;  %3502 = vrot.lane.b32.xlu1 %v3501_v26, %s3574_s11  ;;  %v3434_v17 = vunpack.i.l.bf16 %v3433_v29  ;;  %v3435_v24 = vunpack.i.h.bf16 %v3433_v29  ;;  %v2043_v54 = vrot.slane %v5184_v22, 1 }
 0x389   :  { %v2420_v59 = vsel %vm539_vm5, %v2417_v43, %v2419_v41  ;;  %v2421_v43 = vrot.slane %v5184_v22, 6 }
 0x38a   :  { %v2493_v14 = vsel %vm1592_vm10, %v2477_v44, %v3434_v17  ;;  %v2494_v0 = vsel %vm1592_vm10, %v2478_v63, %v3435_v24  ;;  %v2044_v15 = vsel %vm125_vm2, %v2041_v19, %v2043_v54  ;;  %v2125_v44 = vrot.slane %v5184_v22, 2 }
 0x38b   :  { %v3438_v10 = vpop.permute.xlu0 %3437 }
 0x38c   :  { %v3439_v4 = vunpack.i.l.bf16 %v3438_v10  ;;  %3507 = vrot.lane.b32.xlu1 %v3506_v49, %s3576_s25  ;;  %v3440_v5 = vunpack.i.h.bf16 %v3438_v10  ;;  %v2422_v49 = vsel %vm539_vm5, %v2419_v41, %v2421_v43  ;;  %v2126_v63 = vsel %vm208_vm1, %v2123_v45, %v2125_v44 }
 0x38e   :  { %v2509_v35 = vsel %vm1626_vm12, %v2493_v14, %v3439_v4  ;;  %v2510_v42 = vsel %vm1626_vm12, %v2494_v0, %v3440_v5 }
 0x38f   :  { %v2432_v40 = vpop.permute.xlu0 %2431  ;;  %2698 = vmatmul.mubr.f32.vlgmr.msra.gmra.mrb[0].mxu0 %v2509_v35 }
 0x390   :  { %v2542_v57 = vsel %vm1592_vm10, %v2526_v23, %v2432_v40  ;;  %3512 = vrot.lane.b32.xlu1 %v3511_v12, %s3573_s30 }
 0x391   :  { %3079 = vmatprep.mubr.msk.f32.mxu0 %vm1626_vm12, %v2542_v57  ;;  %v3251_v13 = vpop.f32.mrb[30].mxu1  ;;  %v2270_v57 = vrot.slane %v5006_v55, 4 }
 0x392   :  { %v1855_v18 = vadd.f32 %v3251_v13, %v4856_v11  ;;  %v1849_v32 = vpop.f32.mrb[31].mxu1  ;;  %v2207_v13 = vrot.slane %v5184_v22, 3 }
 0x393   :  { %v1850_v52 = vadd.f32 %v4856_v11, %v1849_v32  ;;  %v2352_v34 = vpop.permute.xlu0 %2351  ;;  %2703 = vmatmul.mubr.f32.gmra.mrb[2].mxu0 %v2510_v42 }
 0x394   :  { %vm1873_vm15 = vcmp.ge.f32.partialorder %v1855_v18, 0.0  ;;  %v1889_v33 = vmul.f32 0.2, %v1855_v18  ;;  %2451 = vrot.lane.b32.xlu1 %v2420_v59, %s3576_s25  ;;  %v2527_v11 = vsel %vm1558_vm6, %v2269_v37, %v2352_v34  ;;  %v2271_v37 = vsel %vm374_vm4, %v2268_v50, %v2270_v57 }
 0x395   :  { %vm1872_vm7 = vcmp.ge.f32.partialorder %v1850_v52, 0.0  ;;  %v1888_v39 = vmul.f32 0.2, %v1850_v52 }
 0x396   :  { %v1905_v58 = vsel %vm1873_vm15, %v1855_v18, %v1889_v33 }
 0x397   :  { %v1989_v26 = vrot.slane %v1905_v58, 5  ;;  %v1904_v29 = vsel %vm1872_vm7, %v1850_v52, %v1888_v39  ;;  %v2434_v38 = vpop.permute.xlu0 %2433 }
 0x398   :  { %v1987_v53 = vrot.slane %v1904_v29, 5  ;;  %v2543_v25 = vsel %vm1592_vm10, %v2527_v11, %v2434_v38  ;;  %2371 = vrot.lane.b32.xlu1 %v2340_v16, %s3574_s11 }
 0x399   :  { %v5246_v17 = vsel %vm68_vm0, %v1989_v26, 0.0  ;;  %3080 = vmatprep.mubr.msk.f32.mxu0 %vm1626_vm12, %v2543_v25 }
 0x39a   :  { %v5253_v56 = vsel %vm68_vm0, %v1985_v20, %v1987_v53  ;;  %v5256_v46 = vsel %vm68_vm0, %v1987_v53, %v1989_v26  ;;  %v3443_v36 = vpop.permute.xlu1 %3442  ;;  %v2049_v6 = vrot.slane %v5246_v17, 1  ;;  %v2131_v24 = vrot.slane %v5246_v17, 2 }
 0x39b   :  { %v2341_v10 = vrot.slane %v5253_v56, 5  ;;  %v2045_v2 = vrot.slane %v5253_v56, 1  ;;  %v2047_v30 = vrot.slane %v5256_v46, 1  ;;  %v2127_v20 = vrot.slane %v5253_v56, 2  ;;  %v2354_v52 = vpop.permute.xlu0 %2353 }
 0x39c   :  { %2453 = vrot.lane.b32.xlu1 %v2422_v49, %s3576_s25  ;;  %v3444_v14 = vunpack.i.l.bf16 %v3443_v36  ;;  %v2129_v35 = vrot.slane %v5256_v46, 2  ;;  %v2209_v40 = vrot.slane %v5253_v56, 3  ;;  %v3445_v0 = vunpack.i.h.bf16 %v3443_v36 }
 0x39d   :  { %v2046_v4 = vsel %vm125_vm2, %v2043_v54, %v2045_v2  ;;  %v2342_v8 = vsel %vm68_vm0, %v2339_v61, %v2341_v10  ;;  %v2048_v12 = vsel %vm125_vm2, %v2045_v2, %v2047_v30  ;;  %v2050_v23 = vsel %vm125_vm2, %v2047_v30, %v2049_v6 }
 0x39e   :  { %v3448_v1 = vpop.permute.xlu1 %3447  ;;  %v3516_v5 = vpack.i.bf16 %v2046_v4, %v2044_v15  ;;  %v2128_v19 = vsel %vm208_vm1, %v2125_v44, %v2127_v20  ;;  %v3531_v32 = vpack.i.bf16 %v2050_v23, %v2048_v12  ;;  %v2479_v61 = vsel %vm1558_vm6, %v4959_v3, %v3444_v14  ;;  %v2844_v23 = vld [vmem:[%s5602_s8 + $0x10] sm:$0xff] }
 0x39f   :  { %v3449_v41 = vunpack.i.l.bf16 %v3448_v1  ;;  %v3521_v42 = vpack.i.bf16 %v2128_v19, %v2126_v63  ;;  %v2130_v59 = vsel %vm208_vm1, %v2127_v20, %v2129_v35  ;;  %v2132_v33 = vsel %vm208_vm1, %v2129_v35, %v2131_v24  ;;  %v2843_v35 = vld [vmem:[%s5602_s8 + $0x8] sm:$0xff] }
 0x3a0   :  { %2373 = vrot.lane.b32.xlu1 %v2342_v8, %s3574_s11  ;;  %3517 = vrot.lane.b32.xlu0 %v3516_v5, %s3574_s11  ;;  %v2210_v39 = vsel %vm291_vm3, %v2207_v13, %v2209_v40  ;;  %v3450_v58 = vunpack.i.h.bf16 %v3448_v1  ;;  %v2208_v26 = vsel %vm291_vm3, %v2205_v48, %v2207_v13  ;;  %v2528_v29 = vsel %vm1558_vm6, %v2271_v37, %v2354_v52  ;;  %v2842_v5 = vld [vmem:[%s5602_s8] sm:$0xff]  ;;  %v2847_v63 = vld [vmem:[%s5602_s8 + $0x28] sm:$0xff] }
 0x3a1   :  { %v2495_v45 = vsel %vm1592_vm10, %v2479_v61, %v3449_v41  ;;  %v3536_v38 = vpack.i.bf16 %v2132_v33, %v2130_v59  ;;  %v3526_v53 = vpack.i.bf16 %v2210_v39, %v2208_v26  ;;  %v2211_v25 = vrot.slane %v5256_v46, 3  ;;  %v2848_v61 = vld [vmem:[%s5602_s8 + $0x30] sm:$0xff]  ;;  %v2849_v52 = vld [vmem:[%s5602_s8 + $0x38] sm:$0xff]  ;;  %v2851_v26 = vld [vmem:[%s5602_s8 + $0x48] sm:$0xff] }
 0x3a2   :  { %v3453_v18 = vpop.permute.xlu1 %3452  ;;  %v2480_v50 = vsel %vm1558_vm6, %v4962_v9, %v3445_v0  ;;  %v2423_v36 = vrot.slane %v5253_v56, 6  ;;  %v2272_v49 = vrot.slane %v5009_v51, 4  ;;  %v2425_v20 = vrot.slane %v5256_v46, 6 }
 0x3a3   :  { %v3454_v34 = vunpack.i.l.bf16 %v3453_v18  ;;  %v3455_v3 = vunpack.i.h.bf16 %v3453_v18  ;;  %v2496_v48 = vsel %vm1592_vm10, %v2480_v50, %v3450_v58  ;;  %v2212_v9 = vsel %vm291_vm3, %v2209_v40, %v2211_v25 }
 0x3a4   :  { %3532 = vrot.lane.b32.xlu1 %v3531_v32, %s3574_s11  ;;  %3522 = vrot.lane.b32.xlu0 %v3521_v42, %s3576_s25  ;;  %v2424_v30 = vsel %vm539_vm5, %v2421_v43, %v2423_v36  ;;  %v2427_v15 = vrot.slane %v5246_v17, 6  ;;  %v2343_v4 = vrot.slane %v5256_v46, 5  ;;  %v2273_v44 = vsel %vm374_vm4, %v2270_v57, %v2272_v49  ;;  %v2846_v57 = vld [vmem:[%s5602_s8 + $0x20] sm:$0xff] }
 0x3a5   :  { %v2511_v16 = vsel %vm1626_vm12, %v2495_v45, %v3454_v34  ;;  %v2512_v2 = vsel %vm1626_vm12, %v2496_v48, %v3455_v3  ;;  %v3378_v12 = vpack.c.bf16 %v2843_v35, %v2842_v5  ;;  %v2426_v13 = vsel %vm539_vm5, %v2423_v36, %v2425_v20 }
 0x3a6   :  { %v2436_v11 = vpop.permute.xlu1 %2435  ;;  %2708 = vmatmul.mubr.f32.gmra.mrb[4].mxu0 %v2511_v16  ;;  %v2428_v43 = vsel %vm539_vm5, %v2425_v20, %v2427_v15  ;;  %v2344_v8 = vsel %vm68_vm0, %v2341_v10, %v2343_v4  ;;  %v2845_v10 = vld [vmem:[%s5602_s8 + $0x18] sm:$0xff]  ;;  %v2345_v0 = vrot.slane %v5246_v17, 5  ;;  %v3386_v18 = vpack.c.bf16 %v2847_v63, %v2846_v57  ;;  %v2850_v16 = vld [vmem:[%s5602_s8 + $0x40] sm:$0xff] }
 0x3a7   :  { %v2544_v54 = vsel %vm1592_vm10, %v2528_v29, %v2436_v11  ;;  %v3382_v41 = vpack.c.bf16 %v2845_v10, %v2844_v23  ;;  %3379 = vmatprep.subr.bf16.mxu1 %v3378_v12  ;;  %v2213_v33 = vrot.slane %v5246_v17, 3  ;;  %v2274_v58 = vrot.slane %v5050_v28, 4  ;;  %v2853_v20 = vld [vmem:[%s5602_s8 + $0x58] sm:$0xff] }
 0x3a8   :  { %3537 = vrot.lane.b32.xlu1 %v3536_v38, %s3576_s25  ;;  %3527 = vrot.lane.b32.xlu0 %v3526_v53, %s3573_s30  ;;  %v2346_v59 = vsel %vm68_vm0, %v2343_v4, %v2345_v0  ;;  %v3390_v45 = vpack.c.bf16 %v2849_v52, %v2848_v61  ;;  %v2280_v0 = vrot.slane %v5109_v60, 4 }
 0x3a9   :  { %3081 = vmatprep.mubr.msk.f32.mxu0 %vm1626_vm12, %v2544_v54  ;;  %3381 = vmatpush3.bf16.msra.mxu1 %v3378_v12  ;;  %v2214_v38 = vsel %vm291_vm3, %v2211_v25, %v2213_v33  ;;  %v2275_v36 = vsel %vm374_vm4, %v2272_v49, %v2274_v58 }
 0x3aa   :  { %v2356_v6 = vpop.permute.xlu1 %2355  ;;  %2713 = vmatmul.mubr.f32.gmra.mrb[6].mxu0 %v2512_v2  ;;  %3383 = vmatprep.subr.bf16.mxu1 %v3382_v41 }
 0x3ab   :  { %v2529_v24 = vsel %vm1558_vm6, %v2273_v44, %v2356_v6  ;;  %v3394_v6 = vpack.c.bf16 %v2851_v26, %v2850_v16  ;;  %v2276_v44 = vrot.slane %v5053_v31, 4  ;;  %v2855_v16 = vld [vmem:[%s5602_s8 + $0x68] sm:$0xff] }
 0x3ac   :  { %2243 = vrot.lane.b32.xlu1 %v2212_v9, %s3573_s30  ;;  %2455 = vrot.lane.b32.xlu0 %v2424_v30, %s3576_s25 }
 0x3ad   :  { %3385 = vmatpush3.bf16.msra.mxu1 %v3382_v41 }
 0x3ae   :  { %v2438_v14 = vpop.permute.xlu1 %2437  ;;  %3387 = vmatprep.subr.bf16.mxu1 %v3386_v18 }
 0x3af   :  { %v2545_v1 = vsel %vm1592_vm10, %v2529_v24, %v2438_v14 }
 0x3b0   :  { %2459 = vrot.lane.b32.xlu1 %v2428_v43, %s3576_s25  ;;  %2375 = vrot.lane.b32.xlu0 %v2344_v8, %s3574_s11 }
 0x3b1   :  { %3082 = vmatprep.mubr.msk.f32.mxu0 %vm1626_vm12, %v2545_v1  ;;  %3389 = vmatpush3.bf16.msra.mxu1 %v3386_v18  ;;  %v2281_v18 = vrot.slane %v5106_v62, 4 }
 0x3b2   :  { %v2358_v19 = vpop.permute.xlu1 %2357  ;;  %v3458_v40 = vpop.permute.xlu0 %3457  ;;  %3391 = vmatprep.subr.bf16.mxu1 %v3390_v45 }
 0x3b3   :  { %v3459_v34 = vunpack.i.l.bf16 %v3458_v40  ;;  %v3460_v29 = vunpack.i.h.bf16 %v3458_v40  ;;  %v2530_v25 = vsel %vm1558_vm6, %v2275_v36, %v2358_v19  ;;  %v2278_v19 = vrot.slane %v5046_v7, 4 }
 0x3b4   :  { %2457 = vrot.lane.b32.xlu0 %v2426_v13, %s3576_s25 }
 0x3b5   :  { %v2481_v53 = vsel %vm1558_vm6, %v5006_v55, %v3459_v34  ;;  %v2852_v55 = vld [vmem:[%s5602_s8 + $0x50] sm:$0xff]  ;;  %v2482_v15 = vsel %vm1558_vm6, %v5009_v51, %v3460_v29  ;;  %3393 = vmatpush3.bf16.msra.mxu1 %v3390_v45  ;;  %v2277_v51 = vsel %vm374_vm4, %v2274_v58, %v2276_v44  ;;  %v2279_v7 = vsel %vm374_vm4, %v2276_v44, %v2278_v19 }
 0x3b6   :  { %v5359_v32 = vpop.permute.xlu1 %3472  ;;  %v3463_v42 = vpop.permute.xlu0 %3462  ;;  %3395 = vmatprep.subr.bf16.mxu1 %v3394_v6  ;;  %v3398_v14 = vpack.c.bf16 %v2853_v20, %v2852_v55 }
 0x3b7   :  { %v3464_v39 = vunpack.i.l.bf16 %v3463_v42  ;;  %v3465_v54 = vunpack.i.h.bf16 %v3463_v42  ;;  %v3474_v1 = vunpack.i.l.bf16 %v5359_v32  ;;  %v3475_v40 = vunpack.i.h.bf16 %v5359_v32 }
 0x3b8   :  { %2377 = vrot.lane.b32.xlu0 %v2346_v59, %s3574_s11  ;;  %v2282_v59 = vsel %vm374_vm4, %v2280_v0, %v2281_v18 }
 0x3b9   :  { %v2497_v50 = vsel %vm1592_vm10, %v2481_v53, %v3464_v39  ;;  %v2498_v4 = vsel %vm1592_vm10, %v2482_v15, %v3465_v54  ;;  %3397 = vmatpush3.bf16.msra.mxu1 %v3394_v6  ;;  %v2483_v10 = vsel %vm1558_vm6, %v5050_v28, %v3474_v1  ;;  %v2484_v34 = vsel %vm1558_vm6, %v5053_v31, %v3475_v40  ;;  %v2854_v31 = vld [vmem:[%s5602_s8 + $0x60] sm:$0xff]  ;;  %v2856_v6 = vld [vmem:[%s5602_s8 + $0x70] sm:$0xff] }
 0x3ba   :  { %v5371_v37 = vpop.permute.xlu1 %3477  ;;  %v3468_v3 = vpop.permute.xlu0 %3467  ;;  %3399 = vmatprep.subr.bf16.mxu1 %v3398_v14  ;;  %v3402_v29 = vpack.c.bf16 %v2855_v16, %v2854_v31  ;;  %v2283_v53 = vrot.slane %v5131_v21, 4  ;;  %v2285_v1 = vrot.slane %v5134_v27, 4  ;;  %v2287_v40 = vrot.slane %v5179_v47, 4 }
 0x3bb   :  { %v3469_v11 = vunpack.i.l.bf16 %v3468_v3  ;;  %v3470_v48 = vunpack.i.h.bf16 %v3468_v3  ;;  %v3479_v5 = vunpack.i.l.bf16 %v5371_v37  ;;  %v3480_v13 = vunpack.i.h.bf16 %v5371_v37 }
 0x3bc   :  { %2245 = vrot.lane.b32.xlu0 %v2214_v38, %s3573_s30  ;;  %v2284_v20 = vsel %vm374_vm4, %v2281_v18, %v2283_v53 }
 0x3bd   :  { %v2513_v2 = vsel %vm1626_vm12, %v2497_v50, %v3469_v11  ;;  %v2514_v24 = vsel %vm1626_vm12, %v2498_v4, %v3470_v48  ;;  %v2499_v63 = vsel %vm1592_vm10, %v2483_v10, %v3479_v5  ;;  %3401 = vmatpush3.bf16.msra.mxu1 %v3398_v14  ;;  %v2500_v39 = vsel %vm1592_vm10, %v2484_v34, %v3480_v13 }
 0x3be   :  { %v3483_v9 = vpop.permute.xlu1 %3482  ;;  %v2440_v30 = vpop.permute.xlu0 %2439  ;;  %2718 = vmatmul.mubr.f32.gmra.mrb[8].mxu0 %v2513_v2  ;;  %3403 = vmatprep.subr.bf16.mxu1 %v3402_v29  ;;  %v2286_v5 = vsel %vm374_vm4, %v2283_v53, %v2285_v1  ;;  %v2291_v53 = vrot.slane %v5253_v56, 4 }
 0x3bf   :  { %v2546_v49 = vsel %vm1592_vm10, %v2530_v25, %v2440_v30  ;;  %v3484_v35 = vunpack.i.l.bf16 %v3483_v9  ;;  %v3485_v28 = vunpack.i.h.bf16 %v3483_v9  ;;  %v2857_v25 = vld [vmem:[%s5602_s8 + $0x78] sm:$0xff] }
 0x3c0   :  { %3083 = vmatprep.mubr.msk.f32.mxu0 %vm1626_vm12, %v2546_v49  ;;  %v3406_v55 = vpack.c.bf16 %v2857_v25, %v2856_v6 }
 0x3c1   :  { %v2515_v42 = vsel %vm1626_vm12, %v2499_v63, %v3484_v35  ;;  %v2516_v45 = vsel %vm1626_vm12, %v2500_v39, %v3485_v28  ;;  %3405 = vmatpush3.bf16.msra.mxu1 %v3402_v29  ;;  %v2288_v28 = vsel %vm374_vm4, %v2285_v1, %v2287_v40 }
 0x3c2   :  { %v2444_v43 = vpop.permute.xlu1 %2443  ;;  %v2360_v8 = vpop.permute.xlu0 %2359  ;;  %2723 = vmatmul.mubr.f32.gmra.mrb[10].mxu0 %v2514_v24  ;;  %3407 = vmatprep.subr.bf16.mxu1 %v3406_v55 }
 0x3c3   :  { %v2531_v12 = vsel %vm1558_vm6, %v2277_v51, %v2360_v8 }
 0x3c5   :  { %3409 = vmatpush3.bf16.msra.mxu1 %v3406_v55 }
 0x3c6   :  { %v2442_v23 = vpop.permute.xlu0 %2441 }
 0x3c7   :  { %v2547_v41 = vsel %vm1592_vm10, %v2531_v12, %v2442_v23  ;;  %v2364_v57 = vpop.permute.xlu1 %2363 }
 0x3c8   :  { %3084 = vmatprep.mubr.msk.f32.mxu0 %vm1626_vm12, %v2547_v41  ;;  %v2533_v58 = vsel %vm1558_vm6, %v2282_v59, %v2364_v57 }
 0x3c9   :  { %2728 = vmatmul.mubr.f32.gmra.mrb[12].mxu0 %v2515_v42 }
 0x3ca   :  { %v2362_v32 = vpop.permute.xlu0 %2361 }
 0x3cb   :  { %v2532_v61 = vsel %vm1558_vm6, %v2279_v7, %v2362_v32  ;;  %v2446_v52 = vpop.permute.xlu1 %2445 }
 0x3cc   :  { %v2548_v33 = vsel %vm1592_vm10, %v2532_v61, %v2444_v43  ;;  %v2549_v37 = vsel %vm1592_vm10, %v2533_v58, %v2446_v52 }
 0x3cd   :  { %3085 = vmatprep.mubr.msk.f32.mxu0 %vm1626_vm12, %v2548_v33  ;;  %v2289_v33 = vrot.slane %v5184_v22, 4 }
 0x3ce   :  { %2733 = vmatmul.mubr.f32.gmra.mrb[14].mxu0 %v2516_v45 }
 0x3cf   :  { %3086 = vmatprep.mubr.msk.f32.mxu0 %vm1626_vm12, %v2549_v37  ;;  %v2290_v45 = vsel %vm374_vm4, %v2287_v40, %v2289_v33  ;;  %v2292_v25 = vsel %vm374_vm4, %v2289_v33, %v2291_v53 }
 0x3e0   :  { %v2366_v50 = vpop.permute.xlu1 %2365 }
 0x3e1   :  { %v2534_v4 = vsel %vm1558_vm6, %v2284_v20, %v2366_v50 }
 0x3e2   :  { %v3488_v3 = vpop.permute.xlu0 %3487 }
 0x3e3   :  { %v3489_v11 = vunpack.i.l.bf16 %v3488_v3  ;;  %v3490_v36 = vunpack.i.h.bf16 %v3488_v3 }
 0x3e5   :  { %v2485_v2 = vsel %vm1558_vm6, %v5109_v60, %v3489_v11  ;;  %v2486_v24 = vsel %vm1558_vm6, %v5106_v62, %v3490_v36 }
 0x3e6   :  { %v3493_v26 = vpop.permute.xlu0 %3492 }
 0x3e7   :  { %v3494_v38 = vunpack.i.l.bf16 %v3493_v26  ;;  %v3495_v9 = vunpack.i.h.bf16 %v3493_v26 }
 0x3e9   :  { %v2501_v30 = vsel %vm1592_vm10, %v2485_v2, %v3494_v38  ;;  %v2502_v14 = vsel %vm1592_vm10, %v2486_v24, %v3495_v9  ;;  %v2293_v24 = vrot.slane %v5256_v46, 4 }
 0x3ea   :  { %v3498_v54 = vpop.permute.xlu0 %3497 }
 0x3eb   :  { %v3499_v48 = vunpack.i.l.bf16 %v3498_v54  ;;  %v3500_v49 = vunpack.i.h.bf16 %v3498_v54 }
 0x3ed   :  { %v2517_v15 = vsel %vm1626_vm12, %v2501_v30, %v3499_v48  ;;  %v2518_v43 = vsel %vm1626_vm12, %v2502_v14, %v3500_v49 }
 0x3ee   :  { %v2448_v60 = vpop.permute.xlu0 %2447  ;;  %2738 = vmatmul.mubr.f32.gmra.mrb[16].mxu0 %v2517_v15 }
 0x3ef   :  { %v2550_v44 = vsel %vm1592_vm10, %v2534_v4, %v2448_v60 }
 0x3f0   :  { %3087 = vmatprep.mubr.msk.f32.mxu0 %vm1626_vm12, %v2550_v44 }
 0x3f2   :  { %v2368_v8 = vpop.permute.xlu0 %2367  ;;  %2743 = vmatmul.mubr.f32.gmra.mrb[18].mxu0 %v2518_v43 }
 0x3f3   :  { %v2535_v35 = vsel %vm1558_vm6, %v2286_v5, %v2368_v8  ;;  %v2294_v5 = vsel %vm374_vm4, %v2291_v53, %v2293_v24 }
 0x3f6   :  { %v2450_v51 = vpop.permute.xlu0 %2449 }
 0x3f7   :  { %v2551_v12 = vsel %vm1592_vm10, %v2535_v35, %v2450_v51 }
 0x3f8   :  { %3088 = vmatprep.mubr.msk.f32.mxu0 %vm1626_vm12, %v2551_v12  ;;  %v2295_v12 = vrot.slane %v5246_v17, 4 }
 0x3fa   :  { %v3503_v62 = vpop.permute.xlu1 %3502  ;;  %v2370_v63 = vpop.permute.xlu0 %2369 }
 0x3fb   :  { %v3504_v10 = vunpack.i.l.bf16 %v3503_v62  ;;  %v3505_v57 = vunpack.i.h.bf16 %v3503_v62  ;;  %v2536_v61 = vsel %vm1558_vm6, %v2288_v28, %v2370_v63  ;;  %v5516_v28 = vld [vmem:[%s5601_s7] ss:$0 sm:$0xff] }
 0x3fd   :  { %v2487_v0 = vsel %vm1558_vm6, %v5131_v21, %v3504_v10  ;;  %v2488_v59 = vsel %vm1558_vm6, %v5134_v27, %v3505_v57 }
 0x3fe   :  { %v3508_v23 = vpop.permute.xlu1 %3507 }
 0x3ff   :  { %v3509_v19 = vunpack.i.l.bf16 %v3508_v23  ;;  %v3510_v18 = vunpack.i.h.bf16 %v3508_v23 }
 0x401   :  { %v2503_v42 = vsel %vm1592_vm10, %v2487_v0, %v3509_v19  ;;  %v2504_v21 = vsel %vm1592_vm10, %v2488_v59, %v3510_v18 }
 0x402   :  { %v3513_v41 = vpop.permute.xlu1 %3512 }
 0x403   :  { %v3514_v13 = vunpack.i.l.bf16 %v3513_v41  ;;  %v3515_v7 = vunpack.i.h.bf16 %v3513_v41 }
 0x405   :  { %v2519_v32 = vsel %vm1626_vm12, %v2503_v42, %v3514_v13  ;;  %v2520_v39 = vsel %vm1626_vm12, %v2504_v21, %v3515_v7  ;;  %v1906_v42 = vld [vmem:[%s5594_s0] sm:$0xff] }
 0x406   :  { %v2452_v52 = vpop.permute.xlu1 %2451  ;;  %2748 = vmatmul.mubr.f32.gmra.mrb[20].mxu0 %v2519_v32  ;;  %v1929_v7 = vadd.f32 %v5516_v28, %v1906_v42 }
 0x407   :  { %v2552_v34 = vsel %vm1592_vm10, %v2536_v61, %v2452_v52 }
 0x408   :  { %3089 = vmatprep.mubr.msk.f32.mxu0 %vm1626_vm12, %v2552_v34 }
 0x40a   :  { %v2372_v58 = vpop.permute.xlu1 %2371  ;;  %2753 = vmatmul.mubr.f32.gmra.mrb[22].mxu0 %v2520_v39 }
 0x40b   :  { %v2537_v37 = vsel %vm1558_vm6, %v2290_v45, %v2372_v58 }
 0x40e   :  { %v2454_v3 = vpop.permute.xlu1 %2453 }
 0x40f   :  { %v2553_v31 = vsel %vm1592_vm10, %v2537_v37, %v2454_v3  ;;  %v1908_v3 = vld [vmem:[%s5594_s0 + $0x10] sm:$0xff] }
 0x410   :  { %3090 = vmatprep.mubr.msk.f32.mxu0 %vm1626_vm12, %v2553_v31  ;;  %v1931_v31 = vadd.f32 %v5516_v28, %v1908_v3 }
 0x412   :  { %v2374_v27 = vpop.permute.xlu1 %2373  ;;  %v3518_v16 = vpop.permute.xlu0 %3517 }
 0x413   :  { %v3519_v29 = vunpack.i.l.bf16 %v3518_v16  ;;  %v3520_v50 = vunpack.i.h.bf16 %v3518_v16  ;;  %v2538_v55 = vsel %vm1558_vm6, %v2292_v25, %v2374_v27  ;;  %v1909_v27 = vld [vmem:[%s5594_s0 + $0x18] sm:$0xff] }
 0x415   :  { %v2489_v48 = vsel %vm1558_vm6, %v5179_v47, %v3519_v29  ;;  %v2490_v4 = vsel %vm1558_vm6, %v5184_v22, %v3520_v50 }
 0x416   :  { %v3523_v26 = vpop.permute.xlu0 %3522  ;;  %v3533_v11 = vpop.permute.xlu1 %3532 }
 0x417   :  { %v3524_v38 = vunpack.i.l.bf16 %v3523_v26  ;;  %v3525_v2 = vunpack.i.h.bf16 %v3523_v26  ;;  %v3534_v60 = vunpack.i.l.bf16 %v3533_v11  ;;  %v3535_v10 = vunpack.i.h.bf16 %v3533_v11 }
 0x418   :  { %v1932_v11 = vadd.f32 %v5516_v28, %v1909_v27 }
 0x419   :  { %v2505_v6 = vsel %vm1592_vm10, %v2489_v48, %v3524_v38  ;;  %v2506_v47 = vsel %vm1592_vm10, %v2490_v4, %v3525_v2  ;;  %v2491_v43 = vsel %vm1558_vm6, %v5253_v56, %v3534_v60  ;;  %v2296_v56 = vsel %vm374_vm4, %v2293_v24, %v2295_v12  ;;  %v1912_v24 = vld [vmem:[%s5594_s0 + $0x30] sm:$0xff] }
 0x41a   :  { %v3528_v54 = vpop.permute.xlu0 %3527  ;;  %v3538_v20 = vpop.permute.xlu1 %3537  ;;  %v2492_v17 = vsel %vm1558_vm6, %v5256_v46, %v3535_v10  ;;  %v1907_v46 = vld [vmem:[%s5594_s0 + $0x8] sm:$0xff] }
 0x41b   :  { %v3529_v36 = vunpack.i.l.bf16 %v3528_v54  ;;  %v3530_v9 = vunpack.i.h.bf16 %v3528_v54  ;;  %v3539_v44 = vunpack.i.l.bf16 %v3538_v20  ;;  %v3540_v19 = vunpack.i.h.bf16 %v3538_v20 }
 0x41c   :  { %v1930_v34 = vadd.f32 %v5516_v28, %v1907_v46 }
 0x41d   :  { %v2521_v30 = vsel %vm1626_vm12, %v2505_v6, %v3529_v36  ;;  %v2522_v14 = vsel %vm1626_vm12, %v2506_v47, %v3530_v9  ;;  %v2507_v22 = vsel %vm1592_vm10, %v2491_v43, %v3539_v44  ;;  %v2508_v0 = vsel %vm1592_vm10, %v2492_v17, %v3540_v19  ;;  %v1910_v6 = vld [vmem:[%s5594_s0 + $0x20] sm:$0xff]  ;;  %v1911_v9 = vld [vmem:[%s5594_s0 + $0x28] sm:$0xff] }
 0x41e   :  { %v2456_v49 = vpop.permute.xlu0 %2455  ;;  %2758 = vmatmul.mubr.f32.gmra.mrb[24].mxu0 %v2521_v30  ;;  %v2244_v8 = vpop.permute.xlu1 %2243  ;;  %v1933_v25 = vadd.f32 %v5516_v28, %v1910_v6 }
 0x41f   :  { %v2554_v15 = vsel %vm1592_vm10, %v2538_v55, %v2456_v49  ;;  %v2523_v23 = vsel %vm1626_vm12, %v2507_v22, %v2244_v8  ;;  %v1934_v49 = vadd.f32 %v5516_v28, %v1911_v9  ;;  %v1913_v8 = vld [vmem:[%s5594_s0 + $0x38] sm:$0xff] }
 0x420   :  { %3091 = vmatprep.mubr.msk.f32.mxu0 %vm1626_vm12, %v2554_v15 }
 0x422   :  { %v2376_v1 = vpop.permute.xlu0 %2375  ;;  %2763 = vmatmul.mubr.f32.gmra.mrb[26].mxu0 %v2522_v14  ;;  %v2460_v41 = vpop.permute.xlu1 %2459 }
 0x423   :  { %v2539_v35 = vsel %vm1558_vm6, %v2294_v5, %v2376_v1  ;;  %v1935_v1 = vadd.f32 %v5516_v28, %v1912_v24  ;;  %v1921_v24 = vld [vmem:[%s5594_s0 + $0x78] sm:$0xff] }
 0x426   :  { %v2458_v51 = vpop.permute.xlu0 %2457 }
 0x427   :  { %v2555_v62 = vsel %vm1592_vm10, %v2539_v35, %v2458_v51  ;;  %v1936_v51 = vadd.f32 %v5516_v28, %v1913_v8 }
 0x428   :  { %3092 = vmatprep.mubr.msk.f32.mxu0 %vm1626_vm12, %v2555_v62 }
 0x429   :  { %2768 = vmatmul.mubr.f32.gmra.mrb[28].mxu0 %v2523_v23 }
 0x42a   :  { %v2378_v40 = vpop.permute.xlu0 %2377 }
 0x42b   :  { %v2540_v57 = vsel %vm1558_vm6, %v2296_v56, %v2378_v40 }
 0x42c   :  { %v2556_v63 = vsel %vm1592_vm10, %v2540_v57, %v2460_v41  ;;  %v1914_v41 = vld [vmem:[%s5594_s0 + $0x40] sm:$0xff] }
 0x42d   :  { %3093 = vmatprep.mubr.msk.f32.mxu0 %vm1626_vm12, %v2556_v63  ;;  %v1937_v57 = vadd.f32 %v5516_v28, %v1914_v41  ;;  %v1915_v63 = vld [vmem:[%s5594_s0 + $0x48] sm:$0xff] }
 0x42e   :  { %v2246_v13 = vpop.permute.xlu0 %2245 }
 0x42f   :  { %v2524_v18 = vsel %vm1626_vm12, %v2508_v0, %v2246_v13 }
 0x430   :  { %2773 = vmatmul.mubr.f32.gmra.mrb[30].mxu0 %v2524_v18  ;;  %v1938_v18 = vadd.f32 %v5516_v28, %v1915_v63 }
 0x462   :  { %v2699_v32 = vpop.f32.mrb[0].mxu0 }
 0x463   :  { %v2778_v61 = vadd.f32 %v2699_v32, %v1929_v7  ;;  %v2701_v52 = vpop.f32.mrb[1].mxu0 }
 0x465   :  { %v2810_v59 = vmul.f32 0.2, %v2778_v61  ;;  %vm2794_vm0 = vcmp.ge.f32.partialorder %v2778_v61, 0.0 }
 0x466   :  { %v2704_v21 = vpop.f32.mrb[2].mxu0 }
 0x467   :  { %v2779_v33 = vadd.f32 %v2704_v21, %v1930_v34  ;;  %v2706_v39 = vpop.f32.mrb[3].mxu0  ;;  %v2826_v58 = vsel %vm2794_vm0, %v2778_v61, %v2810_v59  ;;  %v1916_v59 = vld [vmem:[%s5594_s0 + $0x50] sm:$0xff] }
 0x468   :  { %3284 = vmatprep.mubr.f32.mxu1 %v2826_v58  ;;  %v1939_v21 = vadd.f32 %v5516_v28, %v1916_v59 }
 0x469   :  { %vm2795_vm1 = vcmp.ge.f32.partialorder %v2779_v33, 0.0  ;;  %v2811_v45 = vmul.f32 0.2, %v2779_v33 }
 0x46b   :  { %v2827_v37 = vsel %vm2795_vm1, %v2779_v33, %v2811_v45  ;;  %v1917_v33 = vld [vmem:[%s5594_s0 + $0x58] sm:$0xff] }
 0x46c   :  { %3285 = vmatmul.mubr.f32.vlgmr.msra.gmra.mrb[32].mxu1 %v2827_v37  ;;  %v1940_v37 = vadd.f32 %v5516_v28, %v1917_v33 }
 0x479   :  { %v2709_v16 = vpop.f32.mrb[4].mxu0 }
 0x47a   :  { %v2780_v26 = vadd.f32 %v2709_v16, %v1931_v31  ;;  %v2711_v29 = vpop.f32.mrb[5].mxu0 }
 0x47c   :  { %v2812_v38 = vmul.f32 0.2, %v2780_v26  ;;  %vm2796_vm2 = vcmp.ge.f32.partialorder %v2780_v26, 0.0 }
 0x47d   :  { %v2714_v53 = vpop.f32.mrb[6].mxu0 }
 0x47e   :  { %v2781_v54 = vadd.f32 %v2714_v53, %v1932_v11  ;;  %v2716_v50 = vpop.f32.mrb[7].mxu0  ;;  %v2828_v36 = vsel %vm2796_vm2, %v2780_v26, %v2812_v38  ;;  %v1918_v38 = vld [vmem:[%s5594_s0 + $0x60] sm:$0xff] }
 0x47f   :  { %3287 = vmatprep.mubr.f32.mxu1 %v2828_v36  ;;  %v1941_v53 = vadd.f32 %v5516_v28, %v1918_v38 }
 0x480   :  { %v2813_v48 = vmul.f32 0.2, %v2781_v54  ;;  %vm2797_vm3 = vcmp.ge.f32.partialorder %v2781_v54, 0.0 }
 0x482   :  { %v2829_v2 = vsel %vm2797_vm3, %v2781_v54, %v2813_v48  ;;  %v1919_v54 = vld [vmem:[%s5594_s0 + $0x68] sm:$0xff] }
 0x483   :  { %3288 = vmatmul.mubr.f32.gmra.mrb[34].mxu1 %v2829_v2  ;;  %v1942_v2 = vadd.f32 %v5516_v28, %v1919_v54 }
 0x491   :  { %v2719_v30 = vpop.f32.mrb[8].mxu0 }
 0x492   :  { %v2782_v55 = vadd.f32 %v2719_v30, %v1933_v25  ;;  %v2721_v20 = vpop.f32.mrb[9].mxu0 }
 0x493   :  { %v1920_v20 = vld [vmem:[%s5594_s0 + $0x70] sm:$0xff]  ;;  %s3578_s0 = smov [#allocation2]  }
 0x494   :  { %v2814_v15 = vmul.f32 0.2, %v2782_v55  ;;  %vm2798_vm4 = vcmp.ge.f32.partialorder %v2782_v55, 0.0 }
 0x495   :  { %v2724_v4 = vpop.f32.mrb[10].mxu0 }
 0x496   :  { %v2783_v60 = vadd.f32 %v2724_v4, %v1934_v49  ;;  %v2726_v47 = vpop.f32.mrb[11].mxu0  ;;  %v2830_v44 = vsel %vm2798_vm4, %v2782_v55, %v2814_v15  ;;  %v1943_v15 = vadd.f32 %v5516_v28, %v1920_v20 }
 0x497   :  { %3290 = vmatprep.mubr.f32.mxu1 %v2830_v44 }
 0x498   :  { %v2815_v14 = vmul.f32 0.2, %v2783_v60  ;;  %vm2799_vm5 = vcmp.ge.f32.partialorder %v2783_v60, 0.0 }
 0x49a   :  { %v2831_v43 = vsel %vm2799_vm5, %v2783_v60, %v2815_v14 }
 0x49b   :  { %3291 = vmatmul.mubr.f32.gmra.mrb[36].mxu1 %v2831_v43 }
 0x49c   :  { %v2729_v5 = vpop.f32.mrb[12].mxu0 }
 0x49d   :  { %v2784_v22 = vadd.f32 %v2729_v5, %v1935_v1  ;;  %v2731_v35 = vpop.f32.mrb[13].mxu0  ;;  %v1944_v1 = vadd.f32 %v5516_v28, %v1921_v24 }
 0x49f   :  { %v2816_v12 = vmul.f32 0.2, %v2784_v22  ;;  %vm2800_vm6 = vcmp.ge.f32.partialorder %v2784_v22, 0.0 }
 0x4a1   :  { %v2734_v62 = vpop.f32.mrb[14].mxu0  ;;  %v2832_v23 = vsel %vm2800_vm6, %v2784_v22, %v2816_v12  ;;  %v3094_v12 = vld [vmem:[%s5603_s9] ss:$0 sm:$0xff]  ;;  %s3031_s9 = sshll.u32 %s3578_s0, 4  ;;  %s3032_s9 = int_to_ptr.vmem [resolvable:$true] %s3031_s9 }
 0x4a2   :  { %v2785_v10 = vadd.f32 %v2734_v62, %v1936_v51  ;;  %v2736_v19 = vpop.f32.mrb[15].mxu0  ;;  %3293 = vmatprep.mubr.f32.mxu1 %v2832_v23  ;;  %s3541_s29 = scalar_lea.vmem %s3032_s9, 2048  ;;  %p3546_p1 = scmp.lt.s32.totalorder %s3032_s9, %s3032_s9 }
 0x4a3   :  { %p3542_p0 = scmp.ne.s32.totalorder %s3032_s9, %s3541_s29  ;;  %p3547_p2 = scmp.lt.s32.totalorder %s3541_s29, %s3541_s29 }
 0x4a4   :  { %v2817_v56 = vmul.f32 0.2, %v2785_v10  ;;  %vm2801_vm10 = vcmp.ge.f32.partialorder %v2785_v10, 0.0 }
 0x4a5   :  { %p3548_p3 = por %p3547_p2, %p3546_p1 }
 0x4a6   :  { %v2833_v40 = vsel %vm2801_vm10, %v2785_v10, %v2817_v56 }
 0x4a7   :  { %3294 = vmatmul.mubr.f32.gmra.mrb[38].mxu1 %v2833_v40  ;;  %p3549_p4 = pnand %p3548_p3, %p3542_p0 }
 0x4c1   :  { %v2739_v17 = vpop.f32.mrb[16].mxu0 }
 0x4c2   :  { %v2786_v13 = vadd.f32 %v2739_v17, %v1937_v57  ;;  %v2741_v0 = vpop.f32.mrb[17].mxu0 }
 0x4c4   :  { %v2818_v42 = vmul.f32 0.2, %v2786_v13  ;;  %vm2802_vm12 = vcmp.ge.f32.partialorder %v2786_v13, 0.0 }
 0x4c5   :  { %v2744_v7 = vpop.f32.mrb[18].mxu0 }
 0x4c6   :  { %v2787_v46 = vadd.f32 %v2744_v7, %v1938_v18  ;;  %v2746_v32 = vpop.f32.mrb[19].mxu0  ;;  %v2834_v61 = vsel %vm2802_vm12, %v2786_v13, %v2818_v42 }
 0x4c7   :  { %3296 = vmatprep.mubr.f32.mxu1 %v2834_v61 }
 0x4c8   :  { %v2819_v52 = vmul.f32 0.2, %v2787_v46  ;;  %vm2803_vm9 = vcmp.ge.f32.partialorder %v2787_v46, 0.0 }
 0x4ca   :  { %v2835_v34 = vsel %vm2803_vm9, %v2787_v46, %v2819_v52 }
 0x4cb   :  { %3297 = vmatmul.mubr.f32.gmra.mrb[40].mxu1 %v2835_v34 }
 0x4d9   :  { %v2749_v39 = vpop.f32.mrb[20].mxu0 }
 0x4da   :  { %v2788_v58 = vadd.f32 %v2749_v39, %v1939_v21  ;;  %v2751_v45 = vpop.f32.mrb[21].mxu0 }
 0x4dc   :  { %v2820_v3 = vmul.f32 0.2, %v2788_v58  ;;  %vm2804_vm11 = vcmp.ge.f32.partialorder %v2788_v58, 0.0 }
 0x4dd   :  { %v2754_v31 = vpop.f32.mrb[22].mxu0 }
 0x4de   :  { %v2789_v27 = vadd.f32 %v2754_v31, %v1940_v37  ;;  %v2756_v16 = vpop.f32.mrb[23].mxu0  ;;  %v2836_v26 = vsel %vm2804_vm11, %v2788_v58, %v2820_v3 }
 0x4df   :  { %3299 = vmatprep.mubr.f32.mxu1 %v2836_v26 }
 0x4e0   :  { %v2821_v29 = vmul.f32 0.2, %v2789_v27  ;;  %vm2805_vm13 = vcmp.ge.f32.partialorder %v2789_v27, 0.0 }
 0x4e2   :  { %v2837_v11 = vsel %vm2805_vm13, %v2789_v27, %v2821_v29 }
 0x4e3   :  { %3300 = vmatmul.mubr.f32.gmra.mrb[42].mxu1 %v2837_v11 }
 0x4f1   :  { %v2759_v50 = vpop.f32.mrb[24].mxu0 }
 0x4f2   :  { %v2790_v36 = vadd.f32 %v2759_v50, %v1941_v53  ;;  %v2761_v48 = vpop.f32.mrb[25].mxu0 }
 0x4f4   :  { %v2822_v6 = vmul.f32 0.2, %v2790_v36  ;;  %vm2806_vm14 = vcmp.ge.f32.partialorder %v2790_v36, 0.0 }
 0x4f5   :  { %v2764_v25 = vpop.f32.mrb[26].mxu0 }
 0x4f6   :  { %v2791_v9 = vadd.f32 %v2764_v25, %v1942_v2  ;;  %v2766_v30 = vpop.f32.mrb[27].mxu0  ;;  %v2838_v55 = vsel %vm2806_vm14, %v2790_v36, %v2822_v6 }
 0x4f7   :  { %3302 = vmatprep.mubr.f32.mxu1 %v2838_v55 }
 0x4f8   :  { %v2823_v49 = vmul.f32 0.2, %v2791_v9  ;;  %vm2807_vm8 = vcmp.ge.f32.partialorder %v2791_v9, 0.0 }
 0x4fa   :  { %v2839_v4 = vsel %vm2807_vm8, %v2791_v9, %v2823_v49 }
 0x4fb   :  { %3303 = vmatmul.mubr.f32.gmra.mrb[44].mxu1 %v2839_v4 }
 0x4fc   :  { %v2769_v60 = vpop.f32.mrb[28].mxu0 }
 0x4fd   :  { %v2792_v47 = vadd.f32 %v2769_v60, %v1943_v15  ;;  %v2771_v44 = vpop.f32.mrb[29].mxu0 }
 0x4ff   :  { %v2824_v14 = vmul.f32 0.2, %v2792_v47  ;;  %vm2808_vm15 = vcmp.ge.f32.partialorder %v2792_v47, 0.0 }
 0x501   :  { %v2840_v43 = vsel %vm2808_vm15, %v2792_v47, %v2824_v14 }
 0x502   :  { %3305 = vmatprep.mubr.f32.mxu1 %v2840_v43 }
 0x503   :  { %v2774_v8 = vpop.f32.mrb[30].mxu0 }
 0x504   :  { %v2793_v5 = vadd.f32 %v2774_v8, %v1944_v1  ;;  %v2776_v22 = vpop.f32.mrb[31].mxu0 }
 0x506   :  { %v2825_v35 = vmul.f32 0.2, %v2793_v5  ;;  %vm2809_vm7 = vcmp.ge.f32.partialorder %v2793_v5, 0.0 }
 0x508   :  { %v2841_v51 = vsel %vm2809_vm7, %v2793_v5, %v2825_v35 }
 0x509   :  { %3306 = vmatmul.mubr.f32.gmra.mrb[46].mxu1 %v2841_v51 }
 0x53f   :  { %v3286_v62 = vpop.f32.mrb[32].mxu1 }
 0x540   :  { %v2937_v23 = vadd.f32 %v3286_v62, %v3094_v12  ;;  %v2931_v10 = vpop.f32.mrb[33].mxu1 }
 0x541   :  { %v2932_v19 = vadd.f32 %v3094_v12, %v2931_v10 }
 0x542   :  { %3011 = vst [vmem:[#allocation2 + $0x8] sm:$0xff] %v2937_v23 }
 0x543   :  { %3010 = vst [vmem:[#allocation2] sm:$0xff] %v2932_v19 }
 0x556   :  { %v3289_v28 = vpop.f32.mrb[34].mxu1 }
 0x557   :  { %v2947_v56 = vadd.f32 %v3289_v28, %v3094_v12  ;;  %v2941_v40 = vpop.f32.mrb[35].mxu1 }
 0x558   :  { %v2942_v41 = vadd.f32 %v3094_v12, %v2941_v40 }
 0x559   :  { %3013 = vst [vmem:[#allocation2 + $0x18] sm:$0xff] %v2947_v56 }
 0x55a   :  { %3012 = vst [vmem:[#allocation2 + $0x10] sm:$0xff] %v2942_v41 }
 0x56e   :  { %v3292_v57 = vpop.f32.mrb[36].mxu1 }
 0x56f   :  { %v2957_v63 = vadd.f32 %v3292_v57, %v3094_v12  ;;  %v2951_v17 = vpop.f32.mrb[37].mxu1 }
 0x570   :  { %v2952_v13 = vadd.f32 %v3094_v12, %v2951_v17 }
 0x571   :  { %3015 = vst [vmem:[#allocation2 + $0x28] sm:$0xff] %v2957_v63 }
 0x572   :  { %3014 = vst [vmem:[#allocation2 + $0x20] sm:$0xff] %v2952_v13 }
 0x57a   :  { %v3295_v0 = vpop.f32.mrb[38].mxu1 }
 0x57b   :  { %v2967_v18 = vadd.f32 %v3295_v0, %v3094_v12  ;;  %v2961_v42 = vpop.f32.mrb[39].mxu1 }
 0x57c   :  { %v2962_v7 = vadd.f32 %v3094_v12, %v2961_v42 }
 0x57d   :  { %3017 = vst [vmem:[#allocation2 + $0x38] sm:$0xff] %v2967_v18 }
 0x57e   :  { %3016 = vst [vmem:[#allocation2 + $0x30] sm:$0xff] %v2962_v7 }
 0x59e   :  { %v3298_v46 = vpop.f32.mrb[40].mxu1 }
 0x59f   :  { %v2977_v32 = vadd.f32 %v3298_v46, %v3094_v12  ;;  %v2971_v61 = vpop.f32.mrb[41].mxu1 }
 0x5a0   :  { %v2972_v52 = vadd.f32 %v3094_v12, %v2971_v61 }
 0x5a1   :  { %3019 = vst [vmem:[#allocation2 + $0x48] sm:$0xff] %v2977_v32 }
 0x5a2   :  { %3018 = vst [vmem:[#allocation2 + $0x40] sm:$0xff] %v2972_v52 }
 0x5b6   :  { %v3301_v34 = vpop.f32.mrb[42].mxu1 }
 0x5b7   :  { %v2987_v59 = vadd.f32 %v3301_v34, %v3094_v12  ;;  %v2981_v21 = vpop.f32.mrb[43].mxu1 }
 0x5b8   :  { %v2982_v33 = vadd.f32 %v3094_v12, %v2981_v21 }
 0x5b9   :  { %3021 = vst [vmem:[#allocation2 + $0x58] sm:$0xff] %v2987_v59 }
 0x5ba   :  { %3020 = vst [vmem:[#allocation2 + $0x50] sm:$0xff] %v2982_v33 }
 0x5ce   :  { %v3304_v39 = vpop.f32.mrb[44].mxu1 }
 0x5cf   :  { %v2997_v58 = vadd.f32 %v3304_v39, %v3094_v12  ;;  %v2991_v45 = vpop.f32.mrb[45].mxu1 }
 0x5d0   :  { %v2992_v37 = vadd.f32 %v3094_v12, %v2991_v45 }
 0x5d1   :  { %3023 = vst [vmem:[#allocation2 + $0x68] sm:$0xff] %v2997_v58 }
 0x5d2   :  { %3022 = vst [vmem:[#allocation2 + $0x60] sm:$0xff] %v2992_v37 }
 0x5dc   :  { %v3307_v3 = vpop.f32.mrb[46].mxu1 }
 0x5dd   :  { %v3007_v31 = vadd.f32 %v3307_v3, %v3094_v12  ;;  %v3001_v27 = vpop.f32.mrb[47].mxu1 }
 0x5de   :  { %v3002_v16 = vadd.f32 %v3094_v12, %v3001_v27 }
 0x5df   :  { %3025 = vst [vmem:[#allocation2 + $0x78] sm:$0xff] %v3007_v31 }
 0x5e0   :  { %3024 = vst [vmem:[#allocation2 + $0x70] sm:$0xff] %v3002_v16 }
 0x5e1   :  { %3552 = shalt.err (!%p3549_p4)
}
 0x5e2   :  { %s3553_s14 = scalar_lea.hbm %s5604_s10, 2048 }
 0x5e3   :  { %p3554_p5 = scmp.ne.s32.totalorder %s5604_s10, %s3553_s14  ;;  %p3557_p6 = scmp.lt.u32.totalorder %s3553_s14, %s5604_s10 }
 0x5e5   :  { %p3559_p7 = pnand %p3557_p6, %p3554_p5 }
 0x5e7   :  { %3562 = shalt.err (!%p3559_p7)
}
 0x5e8   :  { %s3579_s11 = smov 128   ;;  %s3580_s21 = smov 8  }
 0x5e9   :  { %3037 = dma.vmem_to_hbm [thread:$0]  %s3032_s9, 2048, %s5604_s10, [#allocation3], %s3579_s11, %s3579_s11, %s3580_s21  }
 0x5ea   :  { %3563 = dma.done.wait [#allocation3], 2048  }
 0x5eb   :  { %3564 = vsyncadd [#allocation3], 4294965248 }
 0x5ec   :  { %3041 = vsyncpa [#allocation3], 1 }

</bundles_post_ra>
